<compile_context>
chip_gen: v7x
topology: tpu7x:2x2x1
jax: 0.10.0
libtpu: 0.0.40
codegen_flags: <defaults>
</compile_context>

<pallas_src>
import numpy as np

import jax
import jax.numpy as jnp
from jax.experimental import pallas as pl
from jax.experimental.pallas import tpu as pltpu


_IMG = 32  # spatial size implied by the architecture (final 4x4/stride-2 conv -> 1x1)

# (kind, Cin, Cout, K, stride, padding, activation)
_LAYERS = [
    ("conv", 3, 12, 4, 2, 1, "relu"),
    ("conv", 12, 24, 4, 2, 1, "relu"),
    ("conv", 24, 48, 4, 2, 1, "relu"),
    ("conv", 48, 48, 4, 2, 0, "relu"),
    ("convT", 48, 48, 4, 2, 0, "relu"),
    ("convT", 48, 24, 4, 2, 1, "relu"),
    ("convT", 24, 12, 4, 2, 1, "relu"),
    ("convT", 12, 3, 4, 2, 1, "sigmoid"),
]


def init_params(key):
    """Raw parameters in PyTorch layouts (conv: (Co,Ci,K,K); convT: (Ci,Co,K,K))."""
    params = []
    for (kind, cin, cout, K, _, _, _) in _LAYERS:
        key, kw, kb = jax.random.split(key, 3)
        w_shape = (cout, cin, K, K) if kind == "conv" else (cin, cout, K, K)
        w = 0.05 * jax.random.normal(kw, w_shape, dtype=jnp.float32)
        b = 0.05 * jax.random.normal(kb, (cout,), dtype=jnp.float32)
        params.append((w, b))
    return params


# ----------------------------------------------------------------------------
# One-time host-side weight packing (block-Toeplitz over W).
# Activations are stored per-sample as (H, W*C) with lane order (w, c).
# ----------------------------------------------------------------------------
def _pack_conv(w, b, w_in, pad):
    """Conv2d k4 s2: rows ordered (kh, iw, ci), cols (ow, co)."""
    w = np.asarray(w, np.float32)
    b = np.asarray(b, np.float32)
    co, ci, K, _ = w.shape
    ow = (w_in + 2 * pad - K) // 2 + 1
    m = np.zeros((K, w_in, ci, ow, co), np.float32)
    for kh in range(K):
        for kw in range(K):
            for o in range(ow):
                iw = 2 * o - pad + kw
                if 0 <= iw < w_in:
                    m[kh, iw, :, o, :] += w[:, :, kh, kw].T  # (ci, co)
    wm = m.reshape(K * w_in * ci, ow * co)
    bias = np.tile(b, ow).reshape(1, ow * co)
    return jnp.asarray(wm, jnp.bfloat16), jnp.asarray(bias, jnp.float32)


def _pack_convt_1x1(w, b):
    """ConvTranspose2d k4 s2 p0 on a 1x1 input == matmul; cols ordered (kh, kw, co)."""
    w = np.asarray(w, np.float32)
    b = np.asarray(b, np.float32)
    ci, co, K, _ = w.shape
    wm = np.transpose(w, (0, 2, 3, 1)).reshape(ci, K * K * co)
    bias = np.tile(b, K * K).reshape(1, K * K * co)
    return jnp.asarray(wm, jnp.bfloat16), jnp.asarray(bias, jnp.float32)


def _pack_convt_s2p1(w, b, w_in):
    """ConvTranspose2d k4 s2 p1, even/odd output-row decomposition.

    out row 2u   uses [a[u-1] | a[u]]   with kernel rows (3, 1)
    out row 2u+1 uses [a[u]   | a[u+1]] with kernel rows (2, 0)
    Columns: out col 2v uses (iw=v-1,kw=3),(iw=v,kw=1); 2v+1 uses (v,2),(v+1,0).
    """
    w = np.asarray(w, np.float32)
    b = np.asarray(b, np.float32)
    ci, co, _, _ = w.shape
    ow = 2 * w_in

    def build(kh_first, kh_second):
        m = np.zeros((2, w_in, ci, ow, co), np.float32)
        for r, kh in ((0, kh_first), (1, kh_second)):
            for v in range(w_in):
                for (iw, kw) in ((v - 1, 3), (v, 1)):        # even out col 2v
                    if 0 <= iw < w_in:
                        m[r, iw, :, 2 * v, :] += w[:, :, kh, kw]
                for (iw, kw) in ((v, 2), (v + 1, 0)):        # odd out col 2v+1
                    if 0 <= iw < w_in:
                        m[r, iw, :, 2 * v + 1, :] += w[:, :, kh, kw]
        return m.reshape(2 * w_in * ci, ow * co)

    w_even = build(3, 1)
    w_odd = build(2, 0)
    bias = np.tile(b, ow).reshape(1, ow * co)
    return (jnp.asarray(w_even, jnp.bfloat16),
            jnp.asarray(w_odd, jnp.bfloat16),
            jnp.asarray(bias, jnp.float32))


def prepare_params(raw_params):
    """Flat tuple, in kernel-argument order:
    (w1,b1, w2,b2, w3,b3, w4,b4, w5,b5, w6e,w6o,b6, w7e,w7o,b7, w8e,w8o,b8)."""
    packed = []
    enc_w = [_IMG, _IMG // 2, _IMG // 4, _IMG // 8]          # 32, 16, 8, 4
    for i in range(4):
        w, b = raw_params[i]
        packed.extend(_pack_conv(w, b, enc_w[i], _LAYERS[i][5]))
    w, b = raw_params[4]
    packed.extend(_pack_convt_1x1(w, b))
    dec_w = [_IMG // 8, _IMG // 4, _IMG // 2]                # 4, 8, 16
    for j in range(3):
        w, b = raw_params[5 + j]
        packed.extend(_pack_convt_s2p1(w, b, dec_w[j]))
    return tuple(packed)


# ----------------------------------------------------------------------------
# In-kernel helpers (only matmuls, lane concats, static slices, elementwise).
# ----------------------------------------------------------------------------
def _gather_mat(n_out, n_in, stride, offset):
    """G[o, i] = 1 where i == stride*o + offset (out-of-range rows are zero)."""
    o = jax.lax.broadcasted_iota(jnp.int32, (n_out, n_in), 0)
    i = jax.lax.broadcasted_iota(jnp.int32, (n_out, n_in), 1)
    return jnp.where(i == stride * o + offset, 1.0, 0.0).astype(jnp.bfloat16)


def _scatter_mat(n_out, n_in, stride, offset):
    """S[o, i] = 1 where o == stride*i + offset (row upsample / interleave)."""
    o = jax.lax.broadcasted_iota(jnp.int32, (n_out, n_in), 0)
    i = jax.lax.broadcasted_iota(jnp.int32, (n_out, n_in), 1)
    return jnp.where(o == stride * i + offset, 1.0, 0.0).astype(jnp.bfloat16)


def _relu(t):
    return jnp.maximum(t, 0.0)


def _conv_block(a, wm, bias, *, pad, out_h, act):
    """Conv2d k4 s2.  a: (h, w_in*ci) bf16, wm: (4*w_in*ci, ow*co) bf16."""
    h = a.shape[0]
    taps = []
    for kh in range(4):
        g = _gather_mat(out_h, h, 2, kh - pad)              # row-gather (zero rows = pad)
        taps.append(jnp.dot(g, a, preferred_element_type=jnp.float32))
    p = jnp.concatenate(taps, axis=1).astype(jnp.bfloat16)  # (out_h, 4*w_in*ci)
    out = jnp.dot(p, wm, preferred_element_type=jnp.float32) + bias
    return act(out)


def _convt_block(a, w_even, w_odd, bias, *, act):
    """ConvTranspose2d k4 s2 p1 (even/odd sub-pixel rows + row-scatter interleave)."""
    h = a.shape[0]
    a_prev = jnp.dot(_gather_mat(h, h, 1, -1), a,
                     preferred_element_type=jnp.float32).astype(jnp.bfloat16)
    a_next = jnp.dot(_gather_mat(h, h, 1, 1), a,
                     preferred_element_type=jnp.float32).astype(jnp.bfloat16)
    lhs_e = jnp.concatenate([a_prev, a], axis=1)            # (h, 2*w_in*ci)
    lhs_o = jnp.concatenate([a, a_next], axis=1)
    oe = act(jnp.dot(lhs_e, w_even, preferred_element_type=jnp.float32) + bias)
    oo = act(jnp.dot(lhs_o, w_odd, preferred_element_type=jnp.float32) + bias)
    u_e = _scatter_mat(2 * h, h, 2, 0)
    u_o = _scatter_mat(2 * h, h, 2, 1)
    return (jnp.dot(u_e, oe.astype(jnp.bfloat16), preferred_element_type=jnp.float32)
            + jnp.dot(u_o, oo.astype(jnp.bfloat16), preferred_element_type=jnp.float32))


# ----------------------------------------------------------------------------
# The fused kernel: whole autoencoder for one sample per grid step.
# ----------------------------------------------------------------------------
def _ae_kernel(x_ref,
               w1, b1, w2, b2, w3, b3, w4, b4,
               w5, b5,
               w6e, w6o, b6, w7e, w7o, b7, w8e, w8o, b8,
               enc_ref, dec_ref):
    a = x_ref[...]                                                         # (32, 96) bf16

    # encoder
    a = _conv_block(a, w1[...], b1[...], pad=1, out_h=16, act=_relu).astype(jnp.bfloat16)
    a = _conv_block(a, w2[...], b2[...], pad=1, out_h=8, act=_relu).astype(jnp.bfloat16)
    a = _conv_block(a, w3[...], b3[...], pad=1, out_h=4, act=_relu).astype(jnp.bfloat16)
    code = _conv_block(a, w4[...], b4[...], pad=0, out_h=1, act=_relu)     # (1, 48) f32
    enc_ref[...] = code

    # decoder
    d = _relu(jnp.dot(code.astype(jnp.bfloat16), w5[...],
                      preferred_element_type=jnp.float32) + b5[...])       # (1, 768)
    d = d.astype(jnp.bfloat16)
    row_w = 4 * 48
    a = jnp.concatenate([d[:, k * row_w:(k + 1) * row_w] for k in range(4)],
                        axis=0)                                            # (4, 192)
    a = _convt_block(a, w6e[...], w6o[...], b6[...], act=_relu).astype(jnp.bfloat16)   # (8, 192)
    a = _convt_block(a, w7e[...], w7o[...], b7[...], act=_relu).astype(jnp.bfloat16)   # (16, 192)
    dec = _convt_block(a, w8e[...], w8o[...], b8[...], act=jax.nn.sigmoid)             # (32, 96)
    dec_ref[...] = dec


def ae_cifar10_forward(packed, x_nchw):
    """x: (B, 3, 32, 32) f32 -> (encoded (B,48,1,1), decoded (B,3,32,32))."""
    B = x_nchw.shape[0]
    lane = _IMG * 3
    x = jnp.transpose(x_nchw, (0, 2, 3, 1)).reshape(B, _IMG, lane).astype(jnp.bfloat16)

    in_specs = [pl.BlockSpec((None, _IMG, lane), lambda b: (b, 0, 0))]
    for t in packed:
        in_specs.append(pl.BlockSpec(t.shape, lambda b: (0, 0)))

    out_shape = (jax.ShapeDtypeStruct((B, 1, 48), jnp.float32),
                 jax.ShapeDtypeStruct((B, _IMG, lane), jnp.float32))
    out_specs = (pl.BlockSpec((None, 1, 48), lambda b: (b, 0, 0)),
                 pl.BlockSpec((None, _IMG, lane), lambda b: (b, 0, 0)))

    cost = pl.CostEstimate(flops=20_000_000 * B,
                           transcendentals=_IMG * _IMG * 3 * B,
                           bytes_accessed=1_800_000 + 20_000 * B)

    enc, dec = pl.pallas_call(
        _ae_kernel,
        grid=(B,),
        in_specs=in_specs,
        out_specs=out_specs,
        out_shape=out_shape,
        compiler_params=pltpu.CompilerParams(dimension_semantics=("parallel",)),
        cost_estimate=cost,
    )(x, *packed)

    encoded = enc.reshape(B, 48, 1, 1)
    decoded = jnp.transpose(dec.reshape(B, _IMG, _IMG, 3), (0, 3, 1, 2))
    return encoded, decoded


# ----------------------------------------------------------------------------
# Pure-lax reference (correctness validation only)
# ----------------------------------------------------------------------------
def reference_forward(raw_params, x):
    h = x
    encoded = None
    for idx, cfg in enumerate(_LAYERS):
        kind, cin, cout, K, s, p, act = cfg
        w, b = raw_params[idx]
        if kind == "conv":
            h = jax.lax.conv_general_dilated(
                h, w, window_strides=(s, s), padding=[(p, p), (p, p)],
                dimension_numbers=("NCHW", "OIHW", "NCHW"),
                precision=jax.lax.Precision.HIGHEST)
        else:
            w_c = jnp.flip(w, (2, 3)).transpose(1, 0, 2, 3)
            h = jax.lax.conv_general_dilated(
                h, w_c, window_strides=(1, 1),
                padding=[(K - 1 - p, K - 1 - p)] * 2, lhs_dilation=(s, s),
                dimension_numbers=("NCHW", "OIHW", "NCHW"),
                precision=jax.lax.Precision.HIGHEST)
        h = h + b.reshape(1, -1, 1, 1)
        h = jnp.maximum(h, 0.0) if act == "relu" else jax.nn.sigmoid(h)
        if idx == 3:
            encoded = h
    return encoded, h


if __name__ == "__main__":
    key = jax.random.PRNGKey(0)
    key_p, key_x = jax.random.split(key)
    raw_params = init_params(key_p)
    packed = prepare_params(raw_params)            # one-time host-side weight packing

    # 32x32 input is required by the architecture (4x4/stride-2 bottleneck conv -> 1x1).
    x = jax.random.uniform(key_x, (2, 3, 32, 32), dtype=jnp.float32)

    fwd = jax.jit(ae_cifar10_forward)
    encoded, decoded = fwd(packed, x)
    jax.block_until_ready((encoded, decoded))

    assert encoded.shape == (2, 48, 1, 1), encoded.shape
    assert decoded.shape == (2, 3, 32, 32), decoded.shape
    assert bool(jnp.all(jnp.isfinite(encoded))) and bool(jnp.all(jnp.isfinite(decoded)))

    enc_ref, dec_ref = jax.jit(reference_forward)(raw_params, x)
    jax.block_until_ready((enc_ref, dec_ref))
    assert jnp.allclose(encoded, enc_ref, atol=4e-2, rtol=4e-2), \
        float(jnp.max(jnp.abs(encoded - enc_ref)))
    assert jnp.allclose(decoded, dec_ref, atol=4e-2, rtol=4e-2), \
        float(jnp.max(jnp.abs(decoded - dec_ref)))

    print("KERNEL_OK")
</pallas_src>

<mosaic_0001>
module attributes {stable_mosaic.version = 11 : i64} {
  func.func @_ae_kernel(%arg0: i32, %arg1: memref<1x32x96xbf16, #tpu.memory_space<vmem>>, %arg2: memref<384x192xbf16, #tpu.memory_space<vmem>>, %arg3: memref<1x192xf32, #tpu.memory_space<vmem>>, %arg4: memref<768x192xbf16, #tpu.memory_space<vmem>>, %arg5: memref<1x192xf32, #tpu.memory_space<vmem>>, %arg6: memref<768x192xbf16, #tpu.memory_space<vmem>>, %arg7: memref<1x192xf32, #tpu.memory_space<vmem>>, %arg8: memref<768x48xbf16, #tpu.memory_space<vmem>>, %arg9: memref<1x48xf32, #tpu.memory_space<vmem>>, %arg10: memref<48x768xbf16, #tpu.memory_space<vmem>>, %arg11: memref<1x768xf32, #tpu.memory_space<vmem>>, %arg12: memref<384x192xbf16, #tpu.memory_space<vmem>>, %arg13: memref<384x192xbf16, #tpu.memory_space<vmem>>, %arg14: memref<1x192xf32, #tpu.memory_space<vmem>>, %arg15: memref<384x192xbf16, #tpu.memory_space<vmem>>, %arg16: memref<384x192xbf16, #tpu.memory_space<vmem>>, %arg17: memref<1x192xf32, #tpu.memory_space<vmem>>, %arg18: memref<384x96xbf16, #tpu.memory_space<vmem>>, %arg19: memref<384x96xbf16, #tpu.memory_space<vmem>>, %arg20: memref<1x96xf32, #tpu.memory_space<vmem>>, %arg21: memref<1x1x48xf32, #tpu.memory_space<vmem>>, %arg22: memref<1x32x96xf32, #tpu.memory_space<vmem>>) attributes {dimension_semantics = [#tpu.dimension_semantics<parallel>], iteration_bounds = array<i64: 2>, scalar_prefetch = 0 : i64, scratch_operands = 0 : i64, tpu.core_type = #tpu.core_type<tc>, window_params = [{transform_indices = @transform_0, window_bounds = array<i64: 1, 32, 96>}, {pipeline_mode = #tpu.pipeline_mode<synchronous>, transform_indices = @transform_1, window_bounds = array<i64: 384, 192>}, {pipeline_mode = #tpu.pipeline_mode<synchronous>, transform_indices = @transform_2, window_bounds = array<i64: 1, 192>}, {pipeline_mode = #tpu.pipeline_mode<synchronous>, transform_indices = @transform_3, window_bounds = array<i64: 768, 192>}, {pipeline_mode = #tpu.pipeline_mode<synchronous>, transform_indices = @transform_4, window_bounds = array<i64: 1, 192>}, {pipeline_mode = #tpu.pipeline_mode<synchronous>, transform_indices = @transform_5, window_bounds = array<i64: 768, 192>}, {pipeline_mode = #tpu.pipeline_mode<synchronous>, transform_indices = @transform_6, window_bounds = array<i64: 1, 192>}, {pipeline_mode = #tpu.pipeline_mode<synchronous>, transform_indices = @transform_7, window_bounds = array<i64: 768, 48>}, {pipeline_mode = #tpu.pipeline_mode<synchronous>, transform_indices = @transform_8, window_bounds = array<i64: 1, 48>}, {pipeline_mode = #tpu.pipeline_mode<synchronous>, transform_indices = @transform_9, window_bounds = array<i64: 48, 768>}, {pipeline_mode = #tpu.pipeline_mode<synchronous>, transform_indices = @transform_10, window_bounds = array<i64: 1, 768>}, {pipeline_mode = #tpu.pipeline_mode<synchronous>, transform_indices = @transform_11, window_bounds = array<i64: 384, 192>}, {pipeline_mode = #tpu.pipeline_mode<synchronous>, transform_indices = @transform_12, window_bounds = array<i64: 384, 192>}, {pipeline_mode = #tpu.pipeline_mode<synchronous>, transform_indices = @transform_13, window_bounds = array<i64: 1, 192>}, {pipeline_mode = #tpu.pipeline_mode<synchronous>, transform_indices = @transform_14, window_bounds = array<i64: 384, 192>}, {pipeline_mode = #tpu.pipeline_mode<synchronous>, transform_indices = @transform_15, window_bounds = array<i64: 384, 192>}, {pipeline_mode = #tpu.pipeline_mode<synchronous>, transform_indices = @transform_16, window_bounds = array<i64: 1, 192>}, {pipeline_mode = #tpu.pipeline_mode<synchronous>, transform_indices = @transform_17, window_bounds = array<i64: 384, 96>}, {pipeline_mode = #tpu.pipeline_mode<synchronous>, transform_indices = @transform_18, window_bounds = array<i64: 384, 96>}, {pipeline_mode = #tpu.pipeline_mode<synchronous>, transform_indices = @transform_19, window_bounds = array<i64: 1, 96>}, {transform_indices = @transform_20, window_bounds = array<i64: 1, 1, 48>}, {transform_indices = @transform_21, window_bounds = array<i64: 1, 32, 96>}]} {
    %c0 = arith.constant 0 : index
    %c0_0 = arith.constant 0 : index
    %c0_1 = arith.constant 0 : index
    %0 = vector.load %arg1[%c0, %c0_0, %c0_1] : memref<1x32x96xbf16, #tpu.memory_space<vmem>>, vector<1x32x96xbf16>
    %1 = vector.shape_cast %0 : vector<1x32x96xbf16> to vector<32x96xbf16>
    %c0_2 = arith.constant 0 : index
    %c0_3 = arith.constant 0 : index
    %2 = vector.load %arg2[%c0_2, %c0_3] : memref<384x192xbf16, #tpu.memory_space<vmem>>, vector<384x192xbf16>
    %c0_4 = arith.constant 0 : index
    %c0_5 = arith.constant 0 : index
    %3 = vector.load %arg3[%c0_4, %c0_5] : memref<1x192xf32, #tpu.memory_space<vmem>>, vector<1x192xf32>
    %4 = tpu.iota {dimensions = array<i32: 0>} : vector<16x32xi32>
    %5 = tpu.iota {dimensions = array<i32: 1>} : vector<16x32xi32>
    %c2_i32 = arith.constant 2 : i32
    %6 = vector.broadcast %c2_i32 : i32 to vector<16x32xi32>
    %7 = arith.muli %6, %4 : vector<16x32xi32>
    %c-1_i32 = arith.constant -1 : i32
    %8 = vector.broadcast %c-1_i32 : i32 to vector<16x32xi32>
    %9 = arith.addi %7, %8 : vector<16x32xi32>
    %10 = arith.cmpi eq, %5, %9 : vector<16x32xi32>
    %cst = arith.constant 1.000000e+00 : f32
    %cst_6 = arith.constant 0.000000e+00 : f32
    %11 = vector.broadcast %cst : f32 to vector<16x32xf32>
    %12 = vector.broadcast %cst_6 : f32 to vector<16x32xf32>
    %13 = arith.select %10, %11, %12 : vector<16x32xi1>, vector<16x32xf32>
    %14 = arith.truncf %13 : vector<16x32xf32> to vector<16x32xbf16>
    %cst_7 = arith.constant dense<0.000000e+00> : vector<16x96xf32>
    %15 = tpu.matmul %14, %1, %cst_7 {dimension_numbers = #tpu.dot_dimension_numbers<[1], [0], [0], [1], [0, 0, 1, 1], [], []>} : vector<16x32xbf16>, vector<32x96xbf16>, vector<16x96xf32> -> vector<16x96xf32>
    %16 = tpu.iota {dimensions = array<i32: 0>} : vector<16x32xi32>
    %17 = tpu.iota {dimensions = array<i32: 1>} : vector<16x32xi32>
    %c2_i32_8 = arith.constant 2 : i32
    %18 = vector.broadcast %c2_i32_8 : i32 to vector<16x32xi32>
    %19 = arith.muli %18, %16 : vector<16x32xi32>
    %c0_i32 = arith.constant 0 : i32
    %20 = vector.broadcast %c0_i32 : i32 to vector<16x32xi32>
    %21 = arith.addi %19, %20 : vector<16x32xi32>
    %22 = arith.cmpi eq, %17, %21 : vector<16x32xi32>
    %cst_9 = arith.constant 1.000000e+00 : f32
    %cst_10 = arith.constant 0.000000e+00 : f32
    %23 = vector.broadcast %cst_9 : f32 to vector<16x32xf32>
    %24 = vector.broadcast %cst_10 : f32 to vector<16x32xf32>
    %25 = arith.select %22, %23, %24 : vector<16x32xi1>, vector<16x32xf32>
    %26 = arith.truncf %25 : vector<16x32xf32> to vector<16x32xbf16>
    %cst_11 = arith.constant dense<0.000000e+00> : vector<16x96xf32>
    %27 = tpu.matmul %26, %1, %cst_11 {dimension_numbers = #tpu.dot_dimension_numbers<[1], [0], [0], [1], [0, 0, 1, 1], [], []>} : vector<16x32xbf16>, vector<32x96xbf16>, vector<16x96xf32> -> vector<16x96xf32>
    %28 = tpu.iota {dimensions = array<i32: 0>} : vector<16x32xi32>
    %29 = tpu.iota {dimensions = array<i32: 1>} : vector<16x32xi32>
    %c2_i32_12 = arith.constant 2 : i32
    %30 = vector.broadcast %c2_i32_12 : i32 to vector<16x32xi32>
    %31 = arith.muli %30, %28 : vector<16x32xi32>
    %c1_i32 = arith.constant 1 : i32
    %32 = vector.broadcast %c1_i32 : i32 to vector<16x32xi32>
    %33 = arith.addi %31, %32 : vector<16x32xi32>
    %34 = arith.cmpi eq, %29, %33 : vector<16x32xi32>
    %cst_13 = arith.constant 1.000000e+00 : f32
    %cst_14 = arith.constant 0.000000e+00 : f32
    %35 = vector.broadcast %cst_13 : f32 to vector<16x32xf32>
    %36 = vector.broadcast %cst_14 : f32 to vector<16x32xf32>
    %37 = arith.select %34, %35, %36 : vector<16x32xi1>, vector<16x32xf32>
    %38 = arith.truncf %37 : vector<16x32xf32> to vector<16x32xbf16>
    %cst_15 = arith.constant dense<0.000000e+00> : vector<16x96xf32>
    %39 = tpu.matmul %38, %1, %cst_15 {dimension_numbers = #tpu.dot_dimension_numbers<[1], [0], [0], [1], [0, 0, 1, 1], [], []>} : vector<16x32xbf16>, vector<32x96xbf16>, vector<16x96xf32> -> vector<16x96xf32>
    %40 = tpu.iota {dimensions = array<i32: 0>} : vector<16x32xi32>
    %41 = tpu.iota {dimensions = array<i32: 1>} : vector<16x32xi32>
    %c2_i32_16 = arith.constant 2 : i32
    %42 = vector.broadcast %c2_i32_16 : i32 to vector<16x32xi32>
    %43 = arith.muli %42, %40 : vector<16x32xi32>
    %c2_i32_17 = arith.constant 2 : i32
    %44 = vector.broadcast %c2_i32_17 : i32 to vector<16x32xi32>
    %45 = arith.addi %43, %44 : vector<16x32xi32>
    %46 = arith.cmpi eq, %41, %45 : vector<16x32xi32>
    %cst_18 = arith.constant 1.000000e+00 : f32
    %cst_19 = arith.constant 0.000000e+00 : f32
    %47 = vector.broadcast %cst_18 : f32 to vector<16x32xf32>
    %48 = vector.broadcast %cst_19 : f32 to vector<16x32xf32>
    %49 = arith.select %46, %47, %48 : vector<16x32xi1>, vector<16x32xf32>
    %50 = arith.truncf %49 : vector<16x32xf32> to vector<16x32xbf16>
    %cst_20 = arith.constant dense<0.000000e+00> : vector<16x96xf32>
    %51 = tpu.matmul %50, %1, %cst_20 {dimension_numbers = #tpu.dot_dimension_numbers<[1], [0], [0], [1], [0, 0, 1, 1], [], []>} : vector<16x32xbf16>, vector<32x96xbf16>, vector<16x96xf32> -> vector<16x96xf32>
    %52 = tpu.concatenate %15, %27, %39, %51 in 1 : vector<16x96xf32>, vector<16x96xf32>, vector<16x96xf32>, vector<16x96xf32> -> vector<16x384xf32>
    %53 = arith.truncf %52 : vector<16x384xf32> to vector<16x384xbf16>
    %cst_21 = arith.constant dense<0.000000e+00> : vector<16x192xf32>
    %54 = tpu.matmul %53, %2, %cst_21 {dimension_numbers = #tpu.dot_dimension_numbers<[1], [0], [0], [1], [0, 0, 1, 1], [], []>} : vector<16x384xbf16>, vector<384x192xbf16>, vector<16x192xf32> -> vector<16x192xf32>
    %55 = vector.broadcast %3 : vector<1x192xf32> to vector<16x192xf32>
    %56 = arith.addf %54, %55 : vector<16x192xf32>
    %cst_22 = arith.constant 0.000000e+00 : f32
    %57 = vector.broadcast %cst_22 : f32 to vector<16x192xf32>
    %58 = arith.maximumf %56, %57 : vector<16x192xf32>
    %59 = arith.truncf %58 : vector<16x192xf32> to vector<16x192xbf16>
    %c0_23 = arith.constant 0 : index
    %c0_24 = arith.constant 0 : index
    %60 = vector.load %arg4[%c0_23, %c0_24] : memref<768x192xbf16, #tpu.memory_space<vmem>>, vector<768x192xbf16>
    %c0_25 = arith.constant 0 : index
    %c0_26 = arith.constant 0 : index
    %61 = vector.load %arg5[%c0_25, %c0_26] : memref<1x192xf32, #tpu.memory_space<vmem>>, vector<1x192xf32>
    %62 = tpu.iota {dimensions = array<i32: 0>} : vector<8x16xi32>
    %63 = tpu.iota {dimensions = array<i32: 1>} : vector<8x16xi32>
    %c2_i32_27 = arith.constant 2 : i32
    %64 = vector.broadcast %c2_i32_27 : i32 to vector<8x16xi32>
    %65 = arith.muli %64, %62 : vector<8x16xi32>
    %c-1_i32_28 = arith.constant -1 : i32
    %66 = vector.broadcast %c-1_i32_28 : i32 to vector<8x16xi32>
    %67 = arith.addi %65, %66 : vector<8x16xi32>
    %68 = arith.cmpi eq, %63, %67 : vector<8x16xi32>
    %cst_29 = arith.constant 1.000000e+00 : f32
    %cst_30 = arith.constant 0.000000e+00 : f32
    %69 = vector.broadcast %cst_29 : f32 to vector<8x16xf32>
    %70 = vector.broadcast %cst_30 : f32 to vector<8x16xf32>
    %71 = arith.select %68, %69, %70 : vector<8x16xi1>, vector<8x16xf32>
    %72 = arith.truncf %71 : vector<8x16xf32> to vector<8x16xbf16>
    %cst_31 = arith.constant dense<0.000000e+00> : vector<8x192xf32>
    %73 = tpu.matmul %72, %59, %cst_31 {dimension_numbers = #tpu.dot_dimension_numbers<[1], [0], [0], [1], [0, 0, 1, 1], [], []>} : vector<8x16xbf16>, vector<16x192xbf16>, vector<8x192xf32> -> vector<8x192xf32>
    %74 = tpu.iota {dimensions = array<i32: 0>} : vector<8x16xi32>
    %75 = tpu.iota {dimensions = array<i32: 1>} : vector<8x16xi32>
    %c2_i32_32 = arith.constant 2 : i32
    %76 = vector.broadcast %c2_i32_32 : i32 to vector<8x16xi32>
    %77 = arith.muli %76, %74 : vector<8x16xi32>
    %c0_i32_33 = arith.constant 0 : i32
    %78 = vector.broadcast %c0_i32_33 : i32 to vector<8x16xi32>
    %79 = arith.addi %77, %78 : vector<8x16xi32>
    %80 = arith.cmpi eq, %75, %79 : vector<8x16xi32>
    %cst_34 = arith.constant 1.000000e+00 : f32
    %cst_35 = arith.constant 0.000000e+00 : f32
    %81 = vector.broadcast %cst_34 : f32 to vector<8x16xf32>
    %82 = vector.broadcast %cst_35 : f32 to vector<8x16xf32>
    %83 = arith.select %80, %81, %82 : vector<8x16xi1>, vector<8x16xf32>
    %84 = arith.truncf %83 : vector<8x16xf32> to vector<8x16xbf16>
    %cst_36 = arith.constant dense<0.000000e+00> : vector<8x192xf32>
    %85 = tpu.matmul %84, %59, %cst_36 {dimension_numbers = #tpu.dot_dimension_numbers<[1], [0], [0], [1], [0, 0, 1, 1], [], []>} : vector<8x16xbf16>, vector<16x192xbf16>, vector<8x192xf32> -> vector<8x192xf32>
    %86 = tpu.iota {dimensions = array<i32: 0>} : vector<8x16xi32>
    %87 = tpu.iota {dimensions = array<i32: 1>} : vector<8x16xi32>
    %c2_i32_37 = arith.constant 2 : i32
    %88 = vector.broadcast %c2_i32_37 : i32 to vector<8x16xi32>
    %89 = arith.muli %88, %86 : vector<8x16xi32>
    %c1_i32_38 = arith.constant 1 : i32
    %90 = vector.broadcast %c1_i32_38 : i32 to vector<8x16xi32>
    %91 = arith.addi %89, %90 : vector<8x16xi32>
    %92 = arith.cmpi eq, %87, %91 : vector<8x16xi32>
    %cst_39 = arith.constant 1.000000e+00 : f32
    %cst_40 = arith.constant 0.000000e+00 : f32
    %93 = vector.broadcast %cst_39 : f32 to vector<8x16xf32>
    %94 = vector.broadcast %cst_40 : f32 to vector<8x16xf32>
    %95 = arith.select %92, %93, %94 : vector<8x16xi1>, vector<8x16xf32>
    %96 = arith.truncf %95 : vector<8x16xf32> to vector<8x16xbf16>
    %cst_41 = arith.constant dense<0.000000e+00> : vector<8x192xf32>
    %97 = tpu.matmul %96, %59, %cst_41 {dimension_numbers = #tpu.dot_dimension_numbers<[1], [0], [0], [1], [0, 0, 1, 1], [], []>} : vector<8x16xbf16>, vector<16x192xbf16>, vector<8x192xf32> -> vector<8x192xf32>
    %98 = tpu.iota {dimensions = array<i32: 0>} : vector<8x16xi32>
    %99 = tpu.iota {dimensions = array<i32: 1>} : vector<8x16xi32>
    %c2_i32_42 = arith.constant 2 : i32
    %100 = vector.broadcast %c2_i32_42 : i32 to vector<8x16xi32>
    %101 = arith.muli %100, %98 : vector<8x16xi32>
    %c2_i32_43 = arith.constant 2 : i32
    %102 = vector.broadcast %c2_i32_43 : i32 to vector<8x16xi32>
    %103 = arith.addi %101, %102 : vector<8x16xi32>
    %104 = arith.cmpi eq, %99, %103 : vector<8x16xi32>
    %cst_44 = arith.constant 1.000000e+00 : f32
    %cst_45 = arith.constant 0.000000e+00 : f32
    %105 = vector.broadcast %cst_44 : f32 to vector<8x16xf32>
    %106 = vector.broadcast %cst_45 : f32 to vector<8x16xf32>
    %107 = arith.select %104, %105, %106 : vector<8x16xi1>, vector<8x16xf32>
    %108 = arith.truncf %107 : vector<8x16xf32> to vector<8x16xbf16>
    %cst_46 = arith.constant dense<0.000000e+00> : vector<8x192xf32>
    %109 = tpu.matmul %108, %59, %cst_46 {dimension_numbers = #tpu.dot_dimension_numbers<[1], [0], [0], [1], [0, 0, 1, 1], [], []>} : vector<8x16xbf16>, vector<16x192xbf16>, vector<8x192xf32> -> vector<8x192xf32>
    %110 = tpu.concatenate %73, %85, %97, %109 in 1 : vector<8x192xf32>, vector<8x192xf32>, vector<8x192xf32>, vector<8x192xf32> -> vector<8x768xf32>
    %111 = arith.truncf %110 : vector<8x768xf32> to vector<8x768xbf16>
    %cst_47 = arith.constant dense<0.000000e+00> : vector<8x192xf32>
    %112 = tpu.matmul %111, %60, %cst_47 {dimension_numbers = #tpu.dot_dimension_numbers<[1], [0], [0], [1], [0, 0, 1, 1], [], []>} : vector<8x768xbf16>, vector<768x192xbf16>, vector<8x192xf32> -> vector<8x192xf32>
    %113 = vector.broadcast %61 : vector<1x192xf32> to vector<8x192xf32>
    %114 = arith.addf %112, %113 : vector<8x192xf32>
    %cst_48 = arith.constant 0.000000e+00 : f32
    %115 = vector.broadcast %cst_48 : f32 to vector<8x192xf32>
    %116 = arith.maximumf %114, %115 : vector<8x192xf32>
    %117 = arith.truncf %116 : vector<8x192xf32> to vector<8x192xbf16>
    %c0_49 = arith.constant 0 : index
    %c0_50 = arith.constant 0 : index
    %118 = vector.load %arg6[%c0_49, %c0_50] : memref<768x192xbf16, #tpu.memory_space<vmem>>, vector<768x192xbf16>
    %c0_51 = arith.constant 0 : index
    %c0_52 = arith.constant 0 : index
    %119 = vector.load %arg7[%c0_51, %c0_52] : memref<1x192xf32, #tpu.memory_space<vmem>>, vector<1x192xf32>
    %120 = tpu.iota {dimensions = array<i32: 0>} : vector<4x8xi32>
    %121 = tpu.iota {dimensions = array<i32: 1>} : vector<4x8xi32>
    %c2_i32_53 = arith.constant 2 : i32
    %122 = vector.broadcast %c2_i32_53 : i32 to vector<4x8xi32>
    %123 = arith.muli %122, %120 : vector<4x8xi32>
    %c-1_i32_54 = arith.constant -1 : i32
    %124 = vector.broadcast %c-1_i32_54 : i32 to vector<4x8xi32>
    %125 = arith.addi %123, %124 : vector<4x8xi32>
    %126 = arith.cmpi eq, %121, %125 : vector<4x8xi32>
    %cst_55 = arith.constant 1.000000e+00 : f32
    %cst_56 = arith.constant 0.000000e+00 : f32
    %127 = vector.broadcast %cst_55 : f32 to vector<4x8xf32>
    %128 = vector.broadcast %cst_56 : f32 to vector<4x8xf32>
    %129 = arith.select %126, %127, %128 : vector<4x8xi1>, vector<4x8xf32>
    %130 = arith.truncf %129 : vector<4x8xf32> to vector<4x8xbf16>
    %cst_57 = arith.constant dense<0.000000e+00> : vector<4x192xf32>
    %131 = tpu.matmul %130, %117, %cst_57 {dimension_numbers = #tpu.dot_dimension_numbers<[1], [0], [0], [1], [0, 0, 1, 1], [], []>} : vector<4x8xbf16>, vector<8x192xbf16>, vector<4x192xf32> -> vector<4x192xf32>
    %132 = tpu.iota {dimensions = array<i32: 0>} : vector<4x8xi32>
    %133 = tpu.iota {dimensions = array<i32: 1>} : vector<4x8xi32>
    %c2_i32_58 = arith.constant 2 : i32
    %134 = vector.broadcast %c2_i32_58 : i32 to vector<4x8xi32>
    %135 = arith.muli %134, %132 : vector<4x8xi32>
    %c0_i32_59 = arith.constant 0 : i32
    %136 = vector.broadcast %c0_i32_59 : i32 to vector<4x8xi32>
    %137 = arith.addi %135, %136 : vector<4x8xi32>
    %138 = arith.cmpi eq, %133, %137 : vector<4x8xi32>
    %cst_60 = arith.constant 1.000000e+00 : f32
    %cst_61 = arith.constant 0.000000e+00 : f32
    %139 = vector.broadcast %cst_60 : f32 to vector<4x8xf32>
    %140 = vector.broadcast %cst_61 : f32 to vector<4x8xf32>
    %141 = arith.select %138, %139, %140 : vector<4x8xi1>, vector<4x8xf32>
    %142 = arith.truncf %141 : vector<4x8xf32> to vector<4x8xbf16>
    %cst_62 = arith.constant dense<0.000000e+00> : vector<4x192xf32>
    %143 = tpu.matmul %142, %117, %cst_62 {dimension_numbers = #tpu.dot_dimension_numbers<[1], [0], [0], [1], [0, 0, 1, 1], [], []>} : vector<4x8xbf16>, vector<8x192xbf16>, vector<4x192xf32> -> vector<4x192xf32>
    %144 = tpu.iota {dimensions = array<i32: 0>} : vector<4x8xi32>
    %145 = tpu.iota {dimensions = array<i32: 1>} : vector<4x8xi32>
    %c2_i32_63 = arith.constant 2 : i32
    %146 = vector.broadcast %c2_i32_63 : i32 to vector<4x8xi32>
    %147 = arith.muli %146, %144 : vector<4x8xi32>
    %c1_i32_64 = arith.constant 1 : i32
    %148 = vector.broadcast %c1_i32_64 : i32 to vector<4x8xi32>
    %149 = arith.addi %147, %148 : vector<4x8xi32>
    %150 = arith.cmpi eq, %145, %149 : vector<4x8xi32>
    %cst_65 = arith.constant 1.000000e+00 : f32
    %cst_66 = arith.constant 0.000000e+00 : f32
    %151 = vector.broadcast %cst_65 : f32 to vector<4x8xf32>
    %152 = vector.broadcast %cst_66 : f32 to vector<4x8xf32>
    %153 = arith.select %150, %151, %152 : vector<4x8xi1>, vector<4x8xf32>
    %154 = arith.truncf %153 : vector<4x8xf32> to vector<4x8xbf16>
    %cst_67 = arith.constant dense<0.000000e+00> : vector<4x192xf32>
    %155 = tpu.matmul %154, %117, %cst_67 {dimension_numbers = #tpu.dot_dimension_numbers<[1], [0], [0], [1], [0, 0, 1, 1], [], []>} : vector<4x8xbf16>, vector<8x192xbf16>, vector<4x192xf32> -> vector<4x192xf32>
    %156 = tpu.iota {dimensions = array<i32: 0>} : vector<4x8xi32>
    %157 = tpu.iota {dimensions = array<i32: 1>} : vector<4x8xi32>
    %c2_i32_68 = arith.constant 2 : i32
    %158 = vector.broadcast %c2_i32_68 : i32 to vector<4x8xi32>
    %159 = arith.muli %158, %156 : vector<4x8xi32>
    %c2_i32_69 = arith.constant 2 : i32
    %160 = vector.broadcast %c2_i32_69 : i32 to vector<4x8xi32>
    %161 = arith.addi %159, %160 : vector<4x8xi32>
    %162 = arith.cmpi eq, %157, %161 : vector<4x8xi32>
    %cst_70 = arith.constant 1.000000e+00 : f32
    %cst_71 = arith.constant 0.000000e+00 : f32
    %163 = vector.broadcast %cst_70 : f32 to vector<4x8xf32>
    %164 = vector.broadcast %cst_71 : f32 to vector<4x8xf32>
    %165 = arith.select %162, %163, %164 : vector<4x8xi1>, vector<4x8xf32>
    %166 = arith.truncf %165 : vector<4x8xf32> to vector<4x8xbf16>
    %cst_72 = arith.constant dense<0.000000e+00> : vector<4x192xf32>
    %167 = tpu.matmul %166, %117, %cst_72 {dimension_numbers = #tpu.dot_dimension_numbers<[1], [0], [0], [1], [0, 0, 1, 1], [], []>} : vector<4x8xbf16>, vector<8x192xbf16>, vector<4x192xf32> -> vector<4x192xf32>
    %168 = tpu.concatenate %131, %143, %155, %167 in 1 : vector<4x192xf32>, vector<4x192xf32>, vector<4x192xf32>, vector<4x192xf32> -> vector<4x768xf32>
    %169 = arith.truncf %168 : vector<4x768xf32> to vector<4x768xbf16>
    %cst_73 = arith.constant dense<0.000000e+00> : vector<4x192xf32>
    %170 = tpu.matmul %169, %118, %cst_73 {dimension_numbers = #tpu.dot_dimension_numbers<[1], [0], [0], [1], [0, 0, 1, 1], [], []>} : vector<4x768xbf16>, vector<768x192xbf16>, vector<4x192xf32> -> vector<4x192xf32>
    %171 = vector.broadcast %119 : vector<1x192xf32> to vector<4x192xf32>
    %172 = arith.addf %170, %171 : vector<4x192xf32>
    %cst_74 = arith.constant 0.000000e+00 : f32
    %173 = vector.broadcast %cst_74 : f32 to vector<4x192xf32>
    %174 = arith.maximumf %172, %173 : vector<4x192xf32>
    %175 = arith.truncf %174 : vector<4x192xf32> to vector<4x192xbf16>
    %c0_75 = arith.constant 0 : index
    %c0_76 = arith.constant 0 : index
    %176 = vector.load %arg8[%c0_75, %c0_76] : memref<768x48xbf16, #tpu.memory_space<vmem>>, vector<768x48xbf16>
    %c0_77 = arith.constant 0 : index
    %c0_78 = arith.constant 0 : index
    %177 = vector.load %arg9[%c0_77, %c0_78] : memref<1x48xf32, #tpu.memory_space<vmem>>, vector<1x48xf32>
    %178 = tpu.iota {dimensions = array<i32: 0>} : vector<1x4xi32>
    %179 = tpu.iota {dimensions = array<i32: 1>} : vector<1x4xi32>
    %c2_i32_79 = arith.constant 2 : i32
    %180 = vector.broadcast %c2_i32_79 : i32 to vector<1x4xi32>
    %181 = arith.muli %180, %178 : vector<1x4xi32>
    %c0_i32_80 = arith.constant 0 : i32
    %182 = vector.broadcast %c0_i32_80 : i32 to vector<1x4xi32>
    %183 = arith.addi %181, %182 : vector<1x4xi32>
    %184 = arith.cmpi eq, %179, %183 : vector<1x4xi32>
    %cst_81 = arith.constant 1.000000e+00 : f32
    %cst_82 = arith.constant 0.000000e+00 : f32
    %185 = vector.broadcast %cst_81 : f32 to vector<1x4xf32>
    %186 = vector.broadcast %cst_82 : f32 to vector<1x4xf32>
    %187 = arith.select %184, %185, %186 : vector<1x4xi1>, vector<1x4xf32>
    %188 = arith.truncf %187 : vector<1x4xf32> to vector<1x4xbf16>
    %cst_83 = arith.constant dense<0.000000e+00> : vector<1x192xf32>
    %189 = tpu.matmul %188, %175, %cst_83 {dimension_numbers = #tpu.dot_dimension_numbers<[1], [0], [0], [1], [0, 0, 1, 1], [], []>} : vector<1x4xbf16>, vector<4x192xbf16>, vector<1x192xf32> -> vector<1x192xf32>
    %190 = tpu.iota {dimensions = array<i32: 0>} : vector<1x4xi32>
    %191 = tpu.iota {dimensions = array<i32: 1>} : vector<1x4xi32>
    %c2_i32_84 = arith.constant 2 : i32
    %192 = vector.broadcast %c2_i32_84 : i32 to vector<1x4xi32>
    %193 = arith.muli %192, %190 : vector<1x4xi32>
    %c1_i32_85 = arith.constant 1 : i32
    %194 = vector.broadcast %c1_i32_85 : i32 to vector<1x4xi32>
    %195 = arith.addi %193, %194 : vector<1x4xi32>
    %196 = arith.cmpi eq, %191, %195 : vector<1x4xi32>
    %cst_86 = arith.constant 1.000000e+00 : f32
    %cst_87 = arith.constant 0.000000e+00 : f32
    %197 = vector.broadcast %cst_86 : f32 to vector<1x4xf32>
    %198 = vector.broadcast %cst_87 : f32 to vector<1x4xf32>
    %199 = arith.select %196, %197, %198 : vector<1x4xi1>, vector<1x4xf32>
    %200 = arith.truncf %199 : vector<1x4xf32> to vector<1x4xbf16>
    %cst_88 = arith.constant dense<0.000000e+00> : vector<1x192xf32>
    %201 = tpu.matmul %200, %175, %cst_88 {dimension_numbers = #tpu.dot_dimension_numbers<[1], [0], [0], [1], [0, 0, 1, 1], [], []>} : vector<1x4xbf16>, vector<4x192xbf16>, vector<1x192xf32> -> vector<1x192xf32>
    %202 = tpu.iota {dimensions = array<i32: 0>} : vector<1x4xi32>
    %203 = tpu.iota {dimensions = array<i32: 1>} : vector<1x4xi32>
    %c2_i32_89 = arith.constant 2 : i32
    %204 = vector.broadcast %c2_i32_89 : i32 to vector<1x4xi32>
    %205 = arith.muli %204, %202 : vector<1x4xi32>
    %c2_i32_90 = arith.constant 2 : i32
    %206 = vector.broadcast %c2_i32_90 : i32 to vector<1x4xi32>
    %207 = arith.addi %205, %206 : vector<1x4xi32>
    %208 = arith.cmpi eq, %203, %207 : vector<1x4xi32>
    %cst_91 = arith.constant 1.000000e+00 : f32
    %cst_92 = arith.constant 0.000000e+00 : f32
    %209 = vector.broadcast %cst_91 : f32 to vector<1x4xf32>
    %210 = vector.broadcast %cst_92 : f32 to vector<1x4xf32>
    %211 = arith.select %208, %209, %210 : vector<1x4xi1>, vector<1x4xf32>
    %212 = arith.truncf %211 : vector<1x4xf32> to vector<1x4xbf16>
    %cst_93 = arith.constant dense<0.000000e+00> : vector<1x192xf32>
    %213 = tpu.matmul %212, %175, %cst_93 {dimension_numbers = #tpu.dot_dimension_numbers<[1], [0], [0], [1], [0, 0, 1, 1], [], []>} : vector<1x4xbf16>, vector<4x192xbf16>, vector<1x192xf32> -> vector<1x192xf32>
    %214 = tpu.iota {dimensions = array<i32: 0>} : vector<1x4xi32>
    %215 = tpu.iota {dimensions = array<i32: 1>} : vector<1x4xi32>
    %c2_i32_94 = arith.constant 2 : i32
    %216 = vector.broadcast %c2_i32_94 : i32 to vector<1x4xi32>
    %217 = arith.muli %216, %214 : vector<1x4xi32>
    %c3_i32 = arith.constant 3 : i32
    %218 = vector.broadcast %c3_i32 : i32 to vector<1x4xi32>
    %219 = arith.addi %217, %218 : vector<1x4xi32>
    %220 = arith.cmpi eq, %215, %219 : vector<1x4xi32>
    %cst_95 = arith.constant 1.000000e+00 : f32
    %cst_96 = arith.constant 0.000000e+00 : f32
    %221 = vector.broadcast %cst_95 : f32 to vector<1x4xf32>
    %222 = vector.broadcast %cst_96 : f32 to vector<1x4xf32>
    %223 = arith.select %220, %221, %222 : vector<1x4xi1>, vector<1x4xf32>
    %224 = arith.truncf %223 : vector<1x4xf32> to vector<1x4xbf16>
    %cst_97 = arith.constant dense<0.000000e+00> : vector<1x192xf32>
    %225 = tpu.matmul %224, %175, %cst_97 {dimension_numbers = #tpu.dot_dimension_numbers<[1], [0], [0], [1], [0, 0, 1, 1], [], []>} : vector<1x4xbf16>, vector<4x192xbf16>, vector<1x192xf32> -> vector<1x192xf32>
    %226 = tpu.concatenate %189, %201, %213, %225 in 1 : vector<1x192xf32>, vector<1x192xf32>, vector<1x192xf32>, vector<1x192xf32> -> vector<1x768xf32>
    %227 = arith.truncf %226 : vector<1x768xf32> to vector<1x768xbf16>
    %cst_98 = arith.constant dense<0.000000e+00> : vector<1x48xf32>
    %228 = tpu.matmul %227, %176, %cst_98 {dimension_numbers = #tpu.dot_dimension_numbers<[1], [0], [0], [1], [0, 0, 1, 1], [], []>} : vector<1x768xbf16>, vector<768x48xbf16>, vector<1x48xf32> -> vector<1x48xf32>
    %229 = arith.addf %228, %177 : vector<1x48xf32>
    %cst_99 = arith.constant 0.000000e+00 : f32
    %230 = vector.broadcast %cst_99 : f32 to vector<1x48xf32>
    %231 = arith.maximumf %229, %230 : vector<1x48xf32>
    %c0_100 = arith.constant 0 : index
    %c0_101 = arith.constant 0 : index
    %c0_102 = arith.constant 0 : index
    %232 = vector.load %arg21[%c0_100, %c0_101, %c0_102] : memref<1x1x48xf32, #tpu.memory_space<vmem>>, vector<1x1x48xf32>
    %233 = vector.shape_cast %232 : vector<1x1x48xf32> to vector<1x48xf32>
    %234 = vector.shape_cast %231 : vector<1x48xf32> to vector<1x1x48xf32>
    tpu.vector_store %arg21[%c0_100, %c0_101, %c0_102], %234 {strides = array<i32>} : memref<1x1x48xf32, #tpu.memory_space<vmem>>, vector<1x1x48xf32>,
    %235 = arith.truncf %231 : vector<1x48xf32> to vector<1x48xbf16>
    %c0_103 = arith.constant 0 : index
    %c0_104 = arith.constant 0 : index
    %236 = vector.load %arg10[%c0_103, %c0_104] : memref<48x768xbf16, #tpu.memory_space<vmem>>, vector<48x768xbf16>
    %cst_105 = arith.constant dense<0.000000e+00> : vector<1x768xf32>
    %237 = tpu.matmul %235, %236, %cst_105 {dimension_numbers = #tpu.dot_dimension_numbers<[1], [0], [0], [1], [0, 0, 1, 1], [], []>} : vector<1x48xbf16>, vector<48x768xbf16>, vector<1x768xf32> -> vector<1x768xf32>
    %c0_106 = arith.constant 0 : index
    %c0_107 = arith.constant 0 : index
    %238 = vector.load %arg11[%c0_106, %c0_107] : memref<1x768xf32, #tpu.memory_space<vmem>>, vector<1x768xf32>
    %239 = arith.addf %237, %238 : vector<1x768xf32>
    %cst_108 = arith.constant 0.000000e+00 : f32
    %240 = vector.broadcast %cst_108 : f32 to vector<1x768xf32>
    %241 = arith.maximumf %239, %240 : vector<1x768xf32>
    %242 = arith.truncf %241 : vector<1x768xf32> to vector<1x768xbf16>
    %243 = vector.extract_strided_slice %242 {offsets = [0, 0], sizes = [1, 192], strides = [1, 1]} : vector<1x768xbf16> to vector<1x192xbf16>
    %244 = vector.extract_strided_slice %242 {offsets = [0, 192], sizes = [1, 192], strides = [1, 1]} : vector<1x768xbf16> to vector<1x192xbf16>
    %245 = vector.extract_strided_slice %242 {offsets = [0, 384], sizes = [1, 192], strides = [1, 1]} : vector<1x768xbf16> to vector<1x192xbf16>
    %246 = vector.extract_strided_slice %242 {offsets = [0, 576], sizes = [1, 192], strides = [1, 1]} : vector<1x768xbf16> to vector<1x192xbf16>
    %247 = tpu.concatenate %243, %244, %245, %246 in 0 : vector<1x192xbf16>, vector<1x192xbf16>, vector<1x192xbf16>, vector<1x192xbf16> -> vector<4x192xbf16>
    %c0_109 = arith.constant 0 : index
    %c0_110 = arith.constant 0 : index
    %248 = vector.load %arg12[%c0_109, %c0_110] : memref<384x192xbf16, #tpu.memory_space<vmem>>, vector<384x192xbf16>
    %c0_111 = arith.constant 0 : index
    %c0_112 = arith.constant 0 : index
    %249 = vector.load %arg13[%c0_111, %c0_112] : memref<384x192xbf16, #tpu.memory_space<vmem>>, vector<384x192xbf16>
    %c0_113 = arith.constant 0 : index
    %c0_114 = arith.constant 0 : index
    %250 = vector.load %arg14[%c0_113, %c0_114] : memref<1x192xf32, #tpu.memory_space<vmem>>, vector<1x192xf32>
    %251 = tpu.iota {dimensions = array<i32: 0>} : vector<4x4xi32>
    %252 = tpu.iota {dimensions = array<i32: 1>} : vector<4x4xi32>
    %c1_i32_115 = arith.constant 1 : i32
    %253 = vector.broadcast %c1_i32_115 : i32 to vector<4x4xi32>
    %254 = arith.muli %253, %251 : vector<4x4xi32>
    %c-1_i32_116 = arith.constant -1 : i32
    %255 = vector.broadcast %c-1_i32_116 : i32 to vector<4x4xi32>
    %256 = arith.addi %254, %255 : vector<4x4xi32>
    %257 = arith.cmpi eq, %252, %256 : vector<4x4xi32>
    %cst_117 = arith.constant 1.000000e+00 : f32
    %cst_118 = arith.constant 0.000000e+00 : f32
    %258 = vector.broadcast %cst_117 : f32 to vector<4x4xf32>
    %259 = vector.broadcast %cst_118 : f32 to vector<4x4xf32>
    %260 = arith.select %257, %258, %259 : vector<4x4xi1>, vector<4x4xf32>
    %261 = arith.truncf %260 : vector<4x4xf32> to vector<4x4xbf16>
    %cst_119 = arith.constant dense<0.000000e+00> : vector<4x192xf32>
    %262 = tpu.matmul %261, %247, %cst_119 {dimension_numbers = #tpu.dot_dimension_numbers<[1], [0], [0], [1], [0, 0, 1, 1], [], []>} : vector<4x4xbf16>, vector<4x192xbf16>, vector<4x192xf32> -> vector<4x192xf32>
    %263 = arith.truncf %262 : vector<4x192xf32> to vector<4x192xbf16>
    %264 = tpu.iota {dimensions = array<i32: 0>} : vector<4x4xi32>
    %265 = tpu.iota {dimensions = array<i32: 1>} : vector<4x4xi32>
    %c1_i32_120 = arith.constant 1 : i32
    %266 = vector.broadcast %c1_i32_120 : i32 to vector<4x4xi32>
    %267 = arith.muli %266, %264 : vector<4x4xi32>
    %c1_i32_121 = arith.constant 1 : i32
    %268 = vector.broadcast %c1_i32_121 : i32 to vector<4x4xi32>
    %269 = arith.addi %267, %268 : vector<4x4xi32>
    %270 = arith.cmpi eq, %265, %269 : vector<4x4xi32>
    %cst_122 = arith.constant 1.000000e+00 : f32
    %cst_123 = arith.constant 0.000000e+00 : f32
    %271 = vector.broadcast %cst_122 : f32 to vector<4x4xf32>
    %272 = vector.broadcast %cst_123 : f32 to vector<4x4xf32>
    %273 = arith.select %270, %271, %272 : vector<4x4xi1>, vector<4x4xf32>
    %274 = arith.truncf %273 : vector<4x4xf32> to vector<4x4xbf16>
    %cst_124 = arith.constant dense<0.000000e+00> : vector<4x192xf32>
    %275 = tpu.matmul %274, %247, %cst_124 {dimension_numbers = #tpu.dot_dimension_numbers<[1], [0], [0], [1], [0, 0, 1, 1], [], []>} : vector<4x4xbf16>, vector<4x192xbf16>, vector<4x192xf32> -> vector<4x192xf32>
    %276 = arith.truncf %275 : vector<4x192xf32> to vector<4x192xbf16>
    %277 = tpu.concatenate %263, %247 in 1 : vector<4x192xbf16>, vector<4x192xbf16> -> vector<4x384xbf16>
    %278 = tpu.concatenate %247, %276 in 1 : vector<4x192xbf16>, vector<4x192xbf16> -> vector<4x384xbf16>
    %cst_125 = arith.constant dense<0.000000e+00> : vector<4x192xf32>
    %279 = tpu.matmul %277, %248, %cst_125 {dimension_numbers = #tpu.dot_dimension_numbers<[1], [0], [0], [1], [0, 0, 1, 1], [], []>} : vector<4x384xbf16>, vector<384x192xbf16>, vector<4x192xf32> -> vector<4x192xf32>
    %280 = vector.broadcast %250 : vector<1x192xf32> to vector<4x192xf32>
    %281 = arith.addf %279, %280 : vector<4x192xf32>
    %cst_126 = arith.constant 0.000000e+00 : f32
    %282 = vector.broadcast %cst_126 : f32 to vector<4x192xf32>
    %283 = arith.maximumf %281, %282 : vector<4x192xf32>
    %cst_127 = arith.constant dense<0.000000e+00> : vector<4x192xf32>
    %284 = tpu.matmul %278, %249, %cst_127 {dimension_numbers = #tpu.dot_dimension_numbers<[1], [0], [0], [1], [0, 0, 1, 1], [], []>} : vector<4x384xbf16>, vector<384x192xbf16>, vector<4x192xf32> -> vector<4x192xf32>
    %285 = vector.broadcast %250 : vector<1x192xf32> to vector<4x192xf32>
    %286 = arith.addf %284, %285 : vector<4x192xf32>
    %cst_128 = arith.constant 0.000000e+00 : f32
    %287 = vector.broadcast %cst_128 : f32 to vector<4x192xf32>
    %288 = arith.maximumf %286, %287 : vector<4x192xf32>
    %289 = tpu.iota {dimensions = array<i32: 0>} : vector<8x4xi32>
    %290 = tpu.iota {dimensions = array<i32: 1>} : vector<8x4xi32>
    %c2_i32_129 = arith.constant 2 : i32
    %291 = vector.broadcast %c2_i32_129 : i32 to vector<8x4xi32>
    %292 = arith.muli %291, %290 : vector<8x4xi32>
    %c0_i32_130 = arith.constant 0 : i32
    %293 = vector.broadcast %c0_i32_130 : i32 to vector<8x4xi32>
    %294 = arith.addi %292, %293 : vector<8x4xi32>
    %295 = arith.cmpi eq, %289, %294 : vector<8x4xi32>
    %cst_131 = arith.constant 1.000000e+00 : f32
    %cst_132 = arith.constant 0.000000e+00 : f32
    %296 = vector.broadcast %cst_131 : f32 to vector<8x4xf32>
    %297 = vector.broadcast %cst_132 : f32 to vector<8x4xf32>
    %298 = arith.select %295, %296, %297 : vector<8x4xi1>, vector<8x4xf32>
    %299 = arith.truncf %298 : vector<8x4xf32> to vector<8x4xbf16>
    %300 = tpu.iota {dimensions = array<i32: 0>} : vector<8x4xi32>
    %301 = tpu.iota {dimensions = array<i32: 1>} : vector<8x4xi32>
    %c2_i32_133 = arith.constant 2 : i32
    %302 = vector.broadcast %c2_i32_133 : i32 to vector<8x4xi32>
    %303 = arith.muli %302, %301 : vector<8x4xi32>
    %c1_i32_134 = arith.constant 1 : i32
    %304 = vector.broadcast %c1_i32_134 : i32 to vector<8x4xi32>
    %305 = arith.addi %303, %304 : vector<8x4xi32>
    %306 = arith.cmpi eq, %300, %305 : vector<8x4xi32>
    %cst_135 = arith.constant 1.000000e+00 : f32
    %cst_136 = arith.constant 0.000000e+00 : f32
    %307 = vector.broadcast %cst_135 : f32 to vector<8x4xf32>
    %308 = vector.broadcast %cst_136 : f32 to vector<8x4xf32>
    %309 = arith.select %306, %307, %308 : vector<8x4xi1>, vector<8x4xf32>
    %310 = arith.truncf %309 : vector<8x4xf32> to vector<8x4xbf16>
    %311 = arith.truncf %283 : vector<4x192xf32> to vector<4x192xbf16>
    %cst_137 = arith.constant dense<0.000000e+00> : vector<8x192xf32>
    %312 = tpu.matmul %299, %311, %cst_137 {dimension_numbers = #tpu.dot_dimension_numbers<[1], [0], [0], [1], [0, 0, 1, 1], [], []>} : vector<8x4xbf16>, vector<4x192xbf16>, vector<8x192xf32> -> vector<8x192xf32>
    %313 = arith.truncf %288 : vector<4x192xf32> to vector<4x192xbf16>
    %cst_138 = arith.constant dense<0.000000e+00> : vector<8x192xf32>
    %314 = tpu.matmul %310, %313, %cst_138 {dimension_numbers = #tpu.dot_dimension_numbers<[1], [0], [0], [1], [0, 0, 1, 1], [], []>} : vector<8x4xbf16>, vector<4x192xbf16>, vector<8x192xf32> -> vector<8x192xf32>
    %315 = arith.addf %312, %314 : vector<8x192xf32>
    %316 = arith.truncf %315 : vector<8x192xf32> to vector<8x192xbf16>
    %c0_139 = arith.constant 0 : index
    %c0_140 = arith.constant 0 : index
    %317 = vector.load %arg15[%c0_139, %c0_140] : memref<384x192xbf16, #tpu.memory_space<vmem>>, vector<384x192xbf16>
    %c0_141 = arith.constant 0 : index
    %c0_142 = arith.constant 0 : index
    %318 = vector.load %arg16[%c0_141, %c0_142] : memref<384x192xbf16, #tpu.memory_space<vmem>>, vector<384x192xbf16>
    %c0_143 = arith.constant 0 : index
    %c0_144 = arith.constant 0 : index
    %319 = vector.load %arg17[%c0_143, %c0_144] : memref<1x192xf32, #tpu.memory_space<vmem>>, vector<1x192xf32>
    %320 = tpu.iota {dimensions = array<i32: 0>} : vector<8x8xi32>
    %321 = tpu.iota {dimensions = array<i32: 1>} : vector<8x8xi32>
    %c1_i32_145 = arith.constant 1 : i32
    %322 = vector.broadcast %c1_i32_145 : i32 to vector<8x8xi32>
    %323 = arith.muli %322, %320 : vector<8x8xi32>
    %c-1_i32_146 = arith.constant -1 : i32
    %324 = vector.broadcast %c-1_i32_146 : i32 to vector<8x8xi32>
    %325 = arith.addi %323, %324 : vector<8x8xi32>
    %326 = arith.cmpi eq, %321, %325 : vector<8x8xi32>
    %cst_147 = arith.constant 1.000000e+00 : f32
    %cst_148 = arith.constant 0.000000e+00 : f32
    %327 = vector.broadcast %cst_147 : f32 to vector<8x8xf32>
    %328 = vector.broadcast %cst_148 : f32 to vector<8x8xf32>
    %329 = arith.select %326, %327, %328 : vector<8x8xi1>, vector<8x8xf32>
    %330 = arith.truncf %329 : vector<8x8xf32> to vector<8x8xbf16>
    %cst_149 = arith.constant dense<0.000000e+00> : vector<8x192xf32>
    %331 = tpu.matmul %330, %316, %cst_149 {dimension_numbers = #tpu.dot_dimension_numbers<[1], [0], [0], [1], [0, 0, 1, 1], [], []>} : vector<8x8xbf16>, vector<8x192xbf16>, vector<8x192xf32> -> vector<8x192xf32>
    %332 = arith.truncf %331 : vector<8x192xf32> to vector<8x192xbf16>
    %333 = tpu.iota {dimensions = array<i32: 0>} : vector<8x8xi32>
    %334 = tpu.iota {dimensions = array<i32: 1>} : vector<8x8xi32>
    %c1_i32_150 = arith.constant 1 : i32
    %335 = vector.broadcast %c1_i32_150 : i32 to vector<8x8xi32>
    %336 = arith.muli %335, %333 : vector<8x8xi32>
    %c1_i32_151 = arith.constant 1 : i32
    %337 = vector.broadcast %c1_i32_151 : i32 to vector<8x8xi32>
    %338 = arith.addi %336, %337 : vector<8x8xi32>
    %339 = arith.cmpi eq, %334, %338 : vector<8x8xi32>
    %cst_152 = arith.constant 1.000000e+00 : f32
    %cst_153 = arith.constant 0.000000e+00 : f32
    %340 = vector.broadcast %cst_152 : f32 to vector<8x8xf32>
    %341 = vector.broadcast %cst_153 : f32 to vector<8x8xf32>
    %342 = arith.select %339, %340, %341 : vector<8x8xi1>, vector<8x8xf32>
    %343 = arith.truncf %342 : vector<8x8xf32> to vector<8x8xbf16>
    %cst_154 = arith.constant dense<0.000000e+00> : vector<8x192xf32>
    %344 = tpu.matmul %343, %316, %cst_154 {dimension_numbers = #tpu.dot_dimension_numbers<[1], [0], [0], [1], [0, 0, 1, 1], [], []>} : vector<8x8xbf16>, vector<8x192xbf16>, vector<8x192xf32> -> vector<8x192xf32>
    %345 = arith.truncf %344 : vector<8x192xf32> to vector<8x192xbf16>
    %346 = tpu.concatenate %332, %316 in 1 : vector<8x192xbf16>, vector<8x192xbf16> -> vector<8x384xbf16>
    %347 = tpu.concatenate %316, %345 in 1 : vector<8x192xbf16>, vector<8x192xbf16> -> vector<8x384xbf16>
    %cst_155 = arith.constant dense<0.000000e+00> : vector<8x192xf32>
    %348 = tpu.matmul %346, %317, %cst_155 {dimension_numbers = #tpu.dot_dimension_numbers<[1], [0], [0], [1], [0, 0, 1, 1], [], []>} : vector<8x384xbf16>, vector<384x192xbf16>, vector<8x192xf32> -> vector<8x192xf32>
    %349 = vector.broadcast %319 : vector<1x192xf32> to vector<8x192xf32>
    %350 = arith.addf %348, %349 : vector<8x192xf32>
    %cst_156 = arith.constant 0.000000e+00 : f32
    %351 = vector.broadcast %cst_156 : f32 to vector<8x192xf32>
    %352 = arith.maximumf %350, %351 : vector<8x192xf32>
    %cst_157 = arith.constant dense<0.000000e+00> : vector<8x192xf32>
    %353 = tpu.matmul %347, %318, %cst_157 {dimension_numbers = #tpu.dot_dimension_numbers<[1], [0], [0], [1], [0, 0, 1, 1], [], []>} : vector<8x384xbf16>, vector<384x192xbf16>, vector<8x192xf32> -> vector<8x192xf32>
    %354 = vector.broadcast %319 : vector<1x192xf32> to vector<8x192xf32>
    %355 = arith.addf %353, %354 : vector<8x192xf32>
    %cst_158 = arith.constant 0.000000e+00 : f32
    %356 = vector.broadcast %cst_158 : f32 to vector<8x192xf32>
    %357 = arith.maximumf %355, %356 : vector<8x192xf32>
    %358 = tpu.iota {dimensions = array<i32: 0>} : vector<16x8xi32>
    %359 = tpu.iota {dimensions = array<i32: 1>} : vector<16x8xi32>
    %c2_i32_159 = arith.constant 2 : i32
    %360 = vector.broadcast %c2_i32_159 : i32 to vector<16x8xi32>
    %361 = arith.muli %360, %359 : vector<16x8xi32>
    %c0_i32_160 = arith.constant 0 : i32
    %362 = vector.broadcast %c0_i32_160 : i32 to vector<16x8xi32>
    %363 = arith.addi %361, %362 : vector<16x8xi32>
    %364 = arith.cmpi eq, %358, %363 : vector<16x8xi32>
    %cst_161 = arith.constant 1.000000e+00 : f32
    %cst_162 = arith.constant 0.000000e+00 : f32
    %365 = vector.broadcast %cst_161 : f32 to vector<16x8xf32>
    %366 = vector.broadcast %cst_162 : f32 to vector<16x8xf32>
    %367 = arith.select %364, %365, %366 : vector<16x8xi1>, vector<16x8xf32>
    %368 = arith.truncf %367 : vector<16x8xf32> to vector<16x8xbf16>
    %369 = tpu.iota {dimensions = array<i32: 0>} : vector<16x8xi32>
    %370 = tpu.iota {dimensions = array<i32: 1>} : vector<16x8xi32>
    %c2_i32_163 = arith.constant 2 : i32
    %371 = vector.broadcast %c2_i32_163 : i32 to vector<16x8xi32>
    %372 = arith.muli %371, %370 : vector<16x8xi32>
    %c1_i32_164 = arith.constant 1 : i32
    %373 = vector.broadcast %c1_i32_164 : i32 to vector<16x8xi32>
    %374 = arith.addi %372, %373 : vector<16x8xi32>
    %375 = arith.cmpi eq, %369, %374 : vector<16x8xi32>
    %cst_165 = arith.constant 1.000000e+00 : f32
    %cst_166 = arith.constant 0.000000e+00 : f32
    %376 = vector.broadcast %cst_165 : f32 to vector<16x8xf32>
    %377 = vector.broadcast %cst_166 : f32 to vector<16x8xf32>
    %378 = arith.select %375, %376, %377 : vector<16x8xi1>, vector<16x8xf32>
    %379 = arith.truncf %378 : vector<16x8xf32> to vector<16x8xbf16>
    %380 = arith.truncf %352 : vector<8x192xf32> to vector<8x192xbf16>
    %cst_167 = arith.constant dense<0.000000e+00> : vector<16x192xf32>
    %381 = tpu.matmul %368, %380, %cst_167 {dimension_numbers = #tpu.dot_dimension_numbers<[1], [0], [0], [1], [0, 0, 1, 1], [], []>} : vector<16x8xbf16>, vector<8x192xbf16>, vector<16x192xf32> -> vector<16x192xf32>
    %382 = arith.truncf %357 : vector<8x192xf32> to vector<8x192xbf16>
    %cst_168 = arith.constant dense<0.000000e+00> : vector<16x192xf32>
    %383 = tpu.matmul %379, %382, %cst_168 {dimension_numbers = #tpu.dot_dimension_numbers<[1], [0], [0], [1], [0, 0, 1, 1], [], []>} : vector<16x8xbf16>, vector<8x192xbf16>, vector<16x192xf32> -> vector<16x192xf32>
    %384 = arith.addf %381, %383 : vector<16x192xf32>
    %385 = arith.truncf %384 : vector<16x192xf32> to vector<16x192xbf16>
    %c0_169 = arith.constant 0 : index
    %c0_170 = arith.constant 0 : index
    %386 = vector.load %arg18[%c0_169, %c0_170] : memref<384x96xbf16, #tpu.memory_space<vmem>>, vector<384x96xbf16>
    %c0_171 = arith.constant 0 : index
    %c0_172 = arith.constant 0 : index
    %387 = vector.load %arg19[%c0_171, %c0_172] : memref<384x96xbf16, #tpu.memory_space<vmem>>, vector<384x96xbf16>
    %c0_173 = arith.constant 0 : index
    %c0_174 = arith.constant 0 : index
    %388 = vector.load %arg20[%c0_173, %c0_174] : memref<1x96xf32, #tpu.memory_space<vmem>>, vector<1x96xf32>
    %389 = tpu.iota {dimensions = array<i32: 0>} : vector<16x16xi32>
    %390 = tpu.iota {dimensions = array<i32: 1>} : vector<16x16xi32>
    %c1_i32_175 = arith.constant 1 : i32
    %391 = vector.broadcast %c1_i32_175 : i32 to vector<16x16xi32>
    %392 = arith.muli %391, %389 : vector<16x16xi32>
    %c-1_i32_176 = arith.constant -1 : i32
    %393 = vector.broadcast %c-1_i32_176 : i32 to vector<16x16xi32>
    %394 = arith.addi %392, %393 : vector<16x16xi32>
    %395 = arith.cmpi eq, %390, %394 : vector<16x16xi32>
    %cst_177 = arith.constant 1.000000e+00 : f32
    %cst_178 = arith.constant 0.000000e+00 : f32
    %396 = vector.broadcast %cst_177 : f32 to vector<16x16xf32>
    %397 = vector.broadcast %cst_178 : f32 to vector<16x16xf32>
    %398 = arith.select %395, %396, %397 : vector<16x16xi1>, vector<16x16xf32>
    %399 = arith.truncf %398 : vector<16x16xf32> to vector<16x16xbf16>
    %cst_179 = arith.constant dense<0.000000e+00> : vector<16x192xf32>
    %400 = tpu.matmul %399, %385, %cst_179 {dimension_numbers = #tpu.dot_dimension_numbers<[1], [0], [0], [1], [0, 0, 1, 1], [], []>} : vector<16x16xbf16>, vector<16x192xbf16>, vector<16x192xf32> -> vector<16x192xf32>
    %401 = arith.truncf %400 : vector<16x192xf32> to vector<16x192xbf16>
    %402 = tpu.iota {dimensions = array<i32: 0>} : vector<16x16xi32>
    %403 = tpu.iota {dimensions = array<i32: 1>} : vector<16x16xi32>
    %c1_i32_180 = arith.constant 1 : i32
    %404 = vector.broadcast %c1_i32_180 : i32 to vector<16x16xi32>
    %405 = arith.muli %404, %402 : vector<16x16xi32>
    %c1_i32_181 = arith.constant 1 : i32
    %406 = vector.broadcast %c1_i32_181 : i32 to vector<16x16xi32>
    %407 = arith.addi %405, %406 : vector<16x16xi32>
    %408 = arith.cmpi eq, %403, %407 : vector<16x16xi32>
    %cst_182 = arith.constant 1.000000e+00 : f32
    %cst_183 = arith.constant 0.000000e+00 : f32
    %409 = vector.broadcast %cst_182 : f32 to vector<16x16xf32>
    %410 = vector.broadcast %cst_183 : f32 to vector<16x16xf32>
    %411 = arith.select %408, %409, %410 : vector<16x16xi1>, vector<16x16xf32>
    %412 = arith.truncf %411 : vector<16x16xf32> to vector<16x16xbf16>
    %cst_184 = arith.constant dense<0.000000e+00> : vector<16x192xf32>
    %413 = tpu.matmul %412, %385, %cst_184 {dimension_numbers = #tpu.dot_dimension_numbers<[1], [0], [0], [1], [0, 0, 1, 1], [], []>} : vector<16x16xbf16>, vector<16x192xbf16>, vector<16x192xf32> -> vector<16x192xf32>
    %414 = arith.truncf %413 : vector<16x192xf32> to vector<16x192xbf16>
    %415 = tpu.concatenate %401, %385 in 1 : vector<16x192xbf16>, vector<16x192xbf16> -> vector<16x384xbf16>
    %416 = tpu.concatenate %385, %414 in 1 : vector<16x192xbf16>, vector<16x192xbf16> -> vector<16x384xbf16>
    %cst_185 = arith.constant dense<0.000000e+00> : vector<16x96xf32>
    %417 = tpu.matmul %415, %386, %cst_185 {dimension_numbers = #tpu.dot_dimension_numbers<[1], [0], [0], [1], [0, 0, 1, 1], [], []>} : vector<16x384xbf16>, vector<384x96xbf16>, vector<16x96xf32> -> vector<16x96xf32>
    %418 = vector.broadcast %388 : vector<1x96xf32> to vector<16x96xf32>
    %419 = arith.addf %417, %418 : vector<16x96xf32>
    %420 = arith.negf %419 : vector<16x96xf32>
    %421 = math.exp %420 : vector<16x96xf32>
    %cst_186 = arith.constant 1.000000e+00 : f32
    %422 = vector.broadcast %cst_186 : f32 to vector<16x96xf32>
    %423 = arith.addf %422, %421 : vector<16x96xf32>
    %424 = arith.divf %422, %423 : vector<16x96xf32>
    %cst_187 = arith.constant dense<0.000000e+00> : vector<16x96xf32>
    %425 = tpu.matmul %416, %387, %cst_187 {dimension_numbers = #tpu.dot_dimension_numbers<[1], [0], [0], [1], [0, 0, 1, 1], [], []>} : vector<16x384xbf16>, vector<384x96xbf16>, vector<16x96xf32> -> vector<16x96xf32>
    %426 = vector.broadcast %388 : vector<1x96xf32> to vector<16x96xf32>
    %427 = arith.addf %425, %426 : vector<16x96xf32>
    %428 = arith.negf %427 : vector<16x96xf32>
    %429 = math.exp %428 : vector<16x96xf32>
    %cst_188 = arith.constant 1.000000e+00 : f32
    %430 = vector.broadcast %cst_188 : f32 to vector<16x96xf32>
    %431 = arith.addf %430, %429 : vector<16x96xf32>
    %432 = arith.divf %430, %431 : vector<16x96xf32>
    %433 = tpu.iota {dimensions = array<i32: 0>} : vector<32x16xi32>
    %434 = tpu.iota {dimensions = array<i32: 1>} : vector<32x16xi32>
    %c2_i32_189 = arith.constant 2 : i32
    %435 = vector.broadcast %c2_i32_189 : i32 to vector<32x16xi32>
    %436 = arith.muli %435, %434 : vector<32x16xi32>
    %c0_i32_190 = arith.constant 0 : i32
    %437 = vector.broadcast %c0_i32_190 : i32 to vector<32x16xi32>
    %438 = arith.addi %436, %437 : vector<32x16xi32>
    %439 = arith.cmpi eq, %433, %438 : vector<32x16xi32>
    %cst_191 = arith.constant 1.000000e+00 : f32
    %cst_192 = arith.constant 0.000000e+00 : f32
    %440 = vector.broadcast %cst_191 : f32 to vector<32x16xf32>
    %441 = vector.broadcast %cst_192 : f32 to vector<32x16xf32>
    %442 = arith.select %439, %440, %441 : vector<32x16xi1>, vector<32x16xf32>
    %443 = arith.truncf %442 : vector<32x16xf32> to vector<32x16xbf16>
    %444 = tpu.iota {dimensions = array<i32: 0>} : vector<32x16xi32>
    %445 = tpu.iota {dimensions = array<i32: 1>} : vector<32x16xi32>
    %c2_i32_193 = arith.constant 2 : i32
    %446 = vector.broadcast %c2_i32_193 : i32 to vector<32x16xi32>
    %447 = arith.muli %446, %445 : vector<32x16xi32>
    %c1_i32_194 = arith.constant 1 : i32
    %448 = vector.broadcast %c1_i32_194 : i32 to vector<32x16xi32>
    %449 = arith.addi %447, %448 : vector<32x16xi32>
    %450 = arith.cmpi eq, %444, %449 : vector<32x16xi32>
    %cst_195 = arith.constant 1.000000e+00 : f32
    %cst_196 = arith.constant 0.000000e+00 : f32
    %451 = vector.broadcast %cst_195 : f32 to vector<32x16xf32>
    %452 = vector.broadcast %cst_196 : f32 to vector<32x16xf32>
    %453 = arith.select %450, %451, %452 : vector<32x16xi1>, vector<32x16xf32>
    %454 = arith.truncf %453 : vector<32x16xf32> to vector<32x16xbf16>
    %455 = arith.truncf %424 : vector<16x96xf32> to vector<16x96xbf16>
    %cst_197 = arith.constant dense<0.000000e+00> : vector<32x96xf32>
    %456 = tpu.matmul %443, %455, %cst_197 {dimension_numbers = #tpu.dot_dimension_numbers<[1], [0], [0], [1], [0, 0, 1, 1], [], []>} : vector<32x16xbf16>, vector<16x96xbf16>, vector<32x96xf32> -> vector<32x96xf32>
    %457 = arith.truncf %432 : vector<16x96xf32> to vector<16x96xbf16>
    %cst_198 = arith.constant dense<0.000000e+00> : vector<32x96xf32>
    %458 = tpu.matmul %454, %457, %cst_198 {dimension_numbers = #tpu.dot_dimension_numbers<[1], [0], [0], [1], [0, 0, 1, 1], [], []>} : vector<32x16xbf16>, vector<16x96xbf16>, vector<32x96xf32> -> vector<32x96xf32>
    %459 = arith.addf %456, %458 : vector<32x96xf32>
    %c0_199 = arith.constant 0 : index
    %c0_200 = arith.constant 0 : index
    %c0_201 = arith.constant 0 : index
    %460 = vector.load %arg22[%c0_199, %c0_200, %c0_201] : memref<1x32x96xf32, #tpu.memory_space<vmem>>, vector<1x32x96xf32>
    %461 = vector.shape_cast %460 : vector<1x32x96xf32> to vector<32x96xf32>
    %462 = vector.shape_cast %459 : vector<32x96xf32> to vector<1x32x96xf32>
    tpu.vector_store %arg22[%c0_199, %c0_200, %c0_201], %462 {strides = array<i32>} : memref<1x32x96xf32, #tpu.memory_space<vmem>>, vector<1x32x96xf32>,
    return
  }
  func.func @transform_0(%arg0: i32) -> (i32, i32, i32) {
    %c0_i32 = arith.constant 0 : i32
    %c0_i32_0 = arith.constant 0 : i32
    %c0_i32_1 = arith.constant 0 : i32
    return %arg0, %c0_i32, %c0_i32_0 : i32, i32, i32
  }
  func.func @transform_1(%arg0: i32) -> (i32, i32) {
    %c0_i32 = arith.constant 0 : i32
    %c0_i32_0 = arith.constant 0 : i32
    %c0_i32_1 = arith.constant 0 : i32
    return %c0_i32, %c0_i32_0 : i32, i32
  }
  func.func @transform_2(%arg0: i32) -> (i32, i32) {
    %c0_i32 = arith.constant 0 : i32
    %c0_i32_0 = arith.constant 0 : i32
    %c0_i32_1 = arith.constant 0 : i32
    return %c0_i32, %c0_i32_0 : i32, i32
  }
  func.func @transform_3(%arg0: i32) -> (i32, i32) {
    %c0_i32 = arith.constant 0 : i32
    %c0_i32_0 = arith.constant 0 : i32
    %c0_i32_1 = arith.constant 0 : i32
    return %c0_i32, %c0_i32_0 : i32, i32
  }
  func.func @transform_4(%arg0: i32) -> (i32, i32) {
    %c0_i32 = arith.constant 0 : i32
    %c0_i32_0 = arith.constant 0 : i32
    %c0_i32_1 = arith.constant 0 : i32
    return %c0_i32, %c0_i32_0 : i32, i32
  }
  func.func @transform_5(%arg0: i32) -> (i32, i32) {
    %c0_i32 = arith.constant 0 : i32
    %c0_i32_0 = arith.constant 0 : i32
    %c0_i32_1 = arith.constant 0 : i32
    return %c0_i32, %c0_i32_0 : i32, i32
  }
  func.func @transform_6(%arg0: i32) -> (i32, i32) {
    %c0_i32 = arith.constant 0 : i32
    %c0_i32_0 = arith.constant 0 : i32
    %c0_i32_1 = arith.constant 0 : i32
    return %c0_i32, %c0_i32_0 : i32, i32
  }
  func.func @transform_7(%arg0: i32) -> (i32, i32) {
    %c0_i32 = arith.constant 0 : i32
    %c0_i32_0 = arith.constant 0 : i32
    %c0_i32_1 = arith.constant 0 : i32
    return %c0_i32, %c0_i32_0 : i32, i32
  }
  func.func @transform_8(%arg0: i32) -> (i32, i32) {
    %c0_i32 = arith.constant 0 : i32
    %c0_i32_0 = arith.constant 0 : i32
    %c0_i32_1 = arith.constant 0 : i32
    return %c0_i32, %c0_i32_0 : i32, i32
  }
  func.func @transform_9(%arg0: i32) -> (i32, i32) {
    %c0_i32 = arith.constant 0 : i32
    %c0_i32_0 = arith.constant 0 : i32
    %c0_i32_1 = arith.constant 0 : i32
    return %c0_i32, %c0_i32_0 : i32, i32
  }
  func.func @transform_10(%arg0: i32) -> (i32, i32) {
    %c0_i32 = arith.constant 0 : i32
    %c0_i32_0 = arith.constant 0 : i32
    %c0_i32_1 = arith.constant 0 : i32
    return %c0_i32, %c0_i32_0 : i32, i32
  }
  func.func @transform_11(%arg0: i32) -> (i32, i32) {
    %c0_i32 = arith.constant 0 : i32
    %c0_i32_0 = arith.constant 0 : i32
    %c0_i32_1 = arith.constant 0 : i32
    return %c0_i32, %c0_i32_0 : i32, i32
  }
  func.func @transform_12(%arg0: i32) -> (i32, i32) {
    %c0_i32 = arith.constant 0 : i32
    %c0_i32_0 = arith.constant 0 : i32
    %c0_i32_1 = arith.constant 0 : i32
    return %c0_i32, %c0_i32_0 : i32, i32
  }
  func.func @transform_13(%arg0: i32) -> (i32, i32) {
    %c0_i32 = arith.constant 0 : i32
    %c0_i32_0 = arith.constant 0 : i32
    %c0_i32_1 = arith.constant 0 : i32
    return %c0_i32, %c0_i32_0 : i32, i32
  }
  func.func @transform_14(%arg0: i32) -> (i32, i32) {
    %c0_i32 = arith.constant 0 : i32
    %c0_i32_0 = arith.constant 0 : i32
    %c0_i32_1 = arith.constant 0 : i32
    return %c0_i32, %c0_i32_0 : i32, i32
  }
  func.func @transform_15(%arg0: i32) -> (i32, i32) {
    %c0_i32 = arith.constant 0 : i32
    %c0_i32_0 = arith.constant 0 : i32
    %c0_i32_1 = arith.constant 0 : i32
    return %c0_i32, %c0_i32_0 : i32, i32
  }
  func.func @transform_16(%arg0: i32) -> (i32, i32) {
    %c0_i32 = arith.constant 0 : i32
    %c0_i32_0 = arith.constant 0 : i32
    %c0_i32_1 = arith.constant 0 : i32
    return %c0_i32, %c0_i32_0 : i32, i32
  }
  func.func @transform_17(%arg0: i32) -> (i32, i32) {
    %c0_i32 = arith.constant 0 : i32
    %c0_i32_0 = arith.constant 0 : i32
    %c0_i32_1 = arith.constant 0 : i32
    return %c0_i32, %c0_i32_0 : i32, i32
  }
  func.func @transform_18(%arg0: i32) -> (i32, i32) {
    %c0_i32 = arith.constant 0 : i32
    %c0_i32_0 = arith.constant 0 : i32
    %c0_i32_1 = arith.constant 0 : i32
    return %c0_i32, %c0_i32_0 : i32, i32
  }
  func.func @transform_19(%arg0: i32) -> (i32, i32) {
    %c0_i32 = arith.constant 0 : i32
    %c0_i32_0 = arith.constant 0 : i32
    %c0_i32_1 = arith.constant 0 : i32
    return %c0_i32, %c0_i32_0 : i32, i32
  }
  func.func @transform_20(%arg0: i32) -> (i32, i32, i32) {
    %c0_i32 = arith.constant 0 : i32
    %c0_i32_0 = arith.constant 0 : i32
    %c0_i32_1 = arith.constant 0 : i32
    return %arg0, %c0_i32, %c0_i32_0 : i32, i32, i32
  }
  func.func @transform_21(%arg0: i32) -> (i32, i32, i32) {
    %c0_i32 = arith.constant 0 : i32
    %c0_i32_0 = arith.constant 0 : i32
    %c0_i32_1 = arith.constant 0 : i32
    return %arg0, %c0_i32, %c0_i32_0 : i32, i32, i32
  }
}

</mosaic_0001>

<bundles_post_ra>
// kernel: ae_cifar10_forward.1
= control target key start
LH: loop header
LB: loop body
LE: loop exit
PB: predicated region body
PF: predicated region fallthrough
CT: control target
= control target key end

     0   :  { %s11282_s0 = inlined_call_operand.vmem [shape: bf16[2,32,96], index: 0, kind: input, shape index: {}]   ;;  %s11283_s1 = inlined_call_operand.vmem [shape: bf16[384,192], index: 1, kind: input, shape index: {}]   ;;  %s11284_s2 = inlined_call_operand.vmem [shape: f32[1,192], index: 2, kind: input, shape index: {}]   ;;  %s11285_s3 = inlined_call_operand.vmem [shape: bf16[768,192], index: 3, kind: input, shape index: {}]   ;;  %s11286_s4 = inlined_call_operand.vmem [shape: f32[1,192], index: 4, kind: input, shape index: {}]   ;;  %s11287_s5 = inlined_call_operand.vmem [shape: bf16[768,192], index: 5, kind: input, shape index: {}]   ;;  %s11288_s6 = inlined_call_operand.vmem [shape: f32[1,192], index: 6, kind: input, shape index: {}]   ;;  %s11289_s7 = inlined_call_operand.vmem [shape: bf16[768,48], index: 7, kind: input, shape index: {}]   ;;  %s11290_s8 = inlined_call_operand.vmem [shape: f32[1,48], index: 8, kind: input, shape index: {}]   ;;  %s11291_s9 = inlined_call_operand.vmem [shape: bf16[48,768], index: 9, kind: input, shape index: {}]   ;;  %s11292_s10 = inlined_call_operand.vmem [shape: f32[1,768], index: 10, kind: input, shape index: {}]   ;;  %s11293_s11 = inlined_call_operand.vmem [shape: bf16[384,192], index: 11, kind: input, shape index: {}]   ;;  %s11294_s12 = inlined_call_operand.vmem [shape: bf16[384,192], index: 12, kind: input, shape index: {}]   ;;  %s11295_s13 = inlined_call_operand.vmem [shape: f32[1,192], index: 13, kind: input, shape index: {}]   ;;  %s11296_s14 = inlined_call_operand.vmem [shape: bf16[384,192], index: 14, kind: input, shape index: {}]   ;;  %s11297_s15 = inlined_call_operand.vmem [shape: bf16[384,192], index: 15, kind: input, shape index: {}]   ;;  %s11298_s16 = inlined_call_operand.vmem [shape: f32[1,192], index: 16, kind: input, shape index: {}]   ;;  %s11299_s17 = inlined_call_operand.vmem [shape: bf16[384,96], index: 17, kind: input, shape index: {}]   ;;  %s11300_s18 = inlined_call_operand.vmem [shape: bf16[384,96], index: 18, kind: input, shape index: {}]   ;;  %s11301_s19 = inlined_call_operand.vmem [shape: f32[1,96], index: 19, kind: input, shape index: {}]   ;;  %s11302_s20 = inlined_call_operand.hbm [shape: f32[2,1,48], index: 20, kind: output, shape index: {0}]   ;;  %s11303_s21 = inlined_call_operand.vmem [shape: f32[2,32,96], index: 21, kind: output, shape index: {1}]  }
   0x1   :  { %11318 = sst [smem:[#allocation11_spill]] %s11282_s0 }
   0x2   :  { %11319 = sst [smem:[#allocation12_spill]] %s11283_s1 }
   0x3   :  { %11320 = sst [smem:[#allocation13_spill]] %s11284_s2 }
   0x4   :  { %11321 = sst [smem:[#allocation14_spill]] %s11285_s3 }
   0x5   :  { %11322 = sst [smem:[#allocation15_spill]] %s11286_s4 }
   0x6   :  { %11323 = sst [smem:[#allocation16_spill]] %s11287_s5 }
   0x7   :  { %11324 = sst [smem:[#allocation17_spill]] %s11288_s6 }
   0x8   :  { %11325 = sst [smem:[#allocation18_spill]] %s11303_s21 }
   0x9   :  { %27 = vsyncpa [#allocation3], 0 }
   0xa   :  { %29 = vsyncpa [#allocation3 + $0x1], 0  ;;  %s9103_s2 = smov 0   ;;  %s9105_s25 = smov 0  }
   0xb   :  { %s9107_s26 = smov 0   ;;  %s9109_s27 = smov 0  }
   0xc LB: > { %11326 = sst [smem:[#allocation5_spill]] %s8972_s2  ;;  %s9124_s3 = sadd.s32 4294967295, %s8984_s27   ;;  %s8984_s27 = sphi %s9109_s27, %s11347_s27   ;;  %s8980_s26 = sphi %s9107_s26, %s11349_s26   ;;  %s8976_s25 = sphi %s9105_s25, %s11351_s25   ;;  %s8972_s2 = sphi %s9103_s2, %s11350_s2  }
   0xd   : > { %11327 = sst [smem:[#allocation6_spill]] %s8980_s26  ;;  %s7139_s28 = sadd.s32 4294967294, %s8984_s27  }
   0xe   : > { %11328 = sst [smem:[#allocation7_spill]] %s8984_s27  ;;  %s9128_s29 = sadd.s32 1, %s8984_s27  }
   0xf   : > { %11329 = sst [smem:[#allocation8_spill]] %s9128_s29  ;;  %s467_s0 = sadd.s32 1, %s8980_s26 }
  0x10   : > { %s464_s4 = ssub.s32 %s8984_s27, %s9128_s29  ;;  %p477_p0 = scmp.ne.s32.totalorder %s8980_s26, %s8976_s25 }
  0x11   : > { %p465_p1 = scmp.eq.s32.totalorder %s464_s4, 0  ;;  %p478_p2 = scmp.eq.s32.totalorder %s9124_s3, 1 }
  0x12   : > { %p483_p3 = scmp.ne.s32.totalorder %s8976_s25, %s8972_s2  ;;  %p484_p4 = scmp.eq.s32.totalorder %s7139_s28, 1 }
  0x13   : > { %s9139_s30 = scalar_select %p465_p1, %s8980_s26, %s467_s0  }
  0x14   : > { %p9141_p5 = por %p478_p2, %p477_p0  ;;  %p9145_p6 = por %p484_p4, %p483_p3 }
  0x15   : > { %11330 = sst [smem:[#allocation9_spill]] %s9139_s30  ;;  %p7142_p7 = scmp.ge.s32.totalorder %s8984_s27, 1 }
  0x16   : > { %s11332_s22 = scalar_select %p9145_p6, 1, 0 }
  0x17   : > { %p593_p8 = scmp.lt.s32.totalorder %s8984_s27, 3 }
  0x18   : > { %11333 = sst [smem:[#allocation10_spill]] %s11332_s22 }
  0x19   : > { %p594_p9 = pnand %p7142_p7, %p593_p8 }
  0x1a   : > { %p657_p10 = scmp.lt.s32.totalorder (!%p594_p9), %s9124_s3, 1  ;;  %v721_v0 = vlaneseq (!%p594_p9)  ;;  %v8986_v1 = vmov (!%p594_p9), 0.0   ;;  %vm8987_vm0 = vmmov (!%p594_p9), 0   ;;  %s11334_s0 = sld [smem:[#allocation11_spill]] (!%p594_p9)  ;;  %vm747_vm5 = vcmask (!%p594_p9), 261120  }
  0x1b   : > { %597 = sbr.rel (%p594_p9) target bundleno = 5465 (0x1559), region = 100  ;;  %7900 = vmatprep.subr.bf16.mxu1 (!%p594_p9), %v8986_v1  ;;  %7904 = vmatprep.mubr.msk.bf16.mxu1 (!%p594_p9), %vm8987_vm0, %v8986_v1  ;;  %s11335_s28 = sld [smem:[#allocation12_spill]] (!%p594_p9)  ;;  %vm967_vm10 = vcmask (!%p594_p9), 785408   ;;  %vm970_vm11 = vcmask (!%p594_p9), 523264   ;;  %vm1419_vm12 = vcmask (!%p594_p9), 130048   ;;  %vm2343_vm13 = vcmask (!%p594_p9), 1043456  }
  0x1c   : > { %v9158_v2 = vshrl.u32 (!%p594_p9), %v721_v0, 7  ;;  %7916 = vmatprep.subr.bf16.mxu0 (!%p594_p9), %v8986_v1  ;;  %7920 = vmatprep.mubr.msk.bf16.mxu0 (!%p594_p9), %vm8987_vm0, %v8986_v1  ;;  %v9173_v5 = vand.u32 (!%p594_p9), 127, %v721_v0  ;;  %s8988_s29 = smov (!%p594_p9), 96   ;;  %s11313_s22 = smov (!%p594_p9), 64   ;;  %vm2340_vm14 = vcmask (!%p594_p9), 64512   ;;  %vm3264_vm15 = vcmask (!%p594_p9), 1041408  }
  0x1d   : > { %s8990_s2 = smov (!%p594_p9), 32   ;;  %s11337_s30 = sld [smem:[#allocation14_spill]] (!%p594_p9) }
  0x1e   : > { %v9165_v3 = vadd.s32 (!%p594_p9), 8, %v9158_v2  ;;  %v9168_v4 = vmul.u32 (!%p594_p9), 2, %v9158_v2  ;;  %s11339_s27 = sld [smem:[#allocation15_spill]] (!%p594_p9)  ;;  %s11341_s6 = sld [smem:[#allocation17_spill]] (!%p594_p9) }
  0x20   : > { %v727_v7 = vmul.u32 (!%p594_p9), 2, %v9165_v3  ;;  %v728_v9 = vadd.s32 (!%p594_p9), 4294967295, %v9168_v4  ;;  %v841_v11 = vadd.s32 (!%p594_p9), 1, %v9168_v4  ;;  %vm792_vm6 = vcmp.eq.s32.totalorder (!%p594_p9), %v9173_v5, %v9168_v4 }
  0x21   : > { %v9203_v19 = vsel (!%p594_p9), %vm792_vm6, 1.0, %v8986_v1  ;;  %v892_v21 = vadd.s32 (!%p594_p9), 2, %v9168_v4  ;;  %v8135_v27 = vld [vmem:[%s11335_s28] ss:$8 sps:$4 sm:$0xff] (!%p594_p9)   ;;  %v8137_v28 = vld [vmem:[%s11335_s28 + $0x4] ss:$8 sps:$4 sm:$0xff] (!%p594_p9)  }
  0x22   : > { %s9156_s23 = scalar_select %p657_p10, %s9124_s3, 1  ;;  %v729_v10 = vadd.s32 4294967295, %v727_v7  ;;  %vm730_vm1 = vcmp.eq.s32.totalorder %v9173_v5, %v728_v9  ;;  %v842_v12 = vadd.s32 1, %v727_v7  ;;  %vm843_vm3 = vcmp.eq.s32.totalorder %v9173_v5, %v841_v11  ;;  %v8140_v29 = vld [vmem:[%s11335_s28 + $0x14] ss:$8 sps:$4 sm:$0xff]  }
  0x23   : > { %v9183_v13 = vsel %vm730_vm1, 1.0, %v8986_v1  ;;  %v9189_v15 = vsel %vm843_vm3, 1.0, %v8986_v1  ;;  %vm793_vm7 = vcmp.eq.s32.totalorder %v9173_v5, %v727_v7  ;;  %v893_v22 = vadd.s32 2, %v727_v7  ;;  %v8138_v30 = vld [vmem:[%s11335_s28 + $0x10] ss:$8 sps:$4 sm:$0xff]  }
  0x24   : > { %s7752_s1 = sshll.u32 %s9156_s23, 4  ;;  %vm731_vm2 = vcmp.eq.s32.totalorder %v9173_v5, %v729_v10  ;;  %vm844_vm4 = vcmp.eq.s32.totalorder %v9173_v5, %v842_v12  ;;  %v795_v20 = vsel %vm793_vm7, 1.0, %v8986_v1  ;;  %vm894_vm8 = vcmp.eq.s32.totalorder %v9173_v5, %v892_v21  ;;  %v8143_v31 = vld [vmem:[%s11335_s28 + $0x24] ss:$8 sps:$4 sm:$0xff]   ;;  %v8141_v32 = vld [vmem:[%s11335_s28 + $0x20] ss:$8 sps:$4 sm:$0xff]  }
  0x25   : > { %s661_s4 = scalar_lea.vmem %s11334_s0, %s7752_s1  ;;  %v733_v14 = vsel %vm731_vm2, 1.0, %v8986_v1  ;;  %v846_v17 = vsel %vm844_vm4, 1.0, %v8986_v1  ;;  %v796_v23 = vpack.c.bf16 %v795_v20, %v9203_v19  ;;  %vm895_vm9 = vcmp.eq.s32.totalorder %v9173_v5, %v893_v22  ;;  %v8146_v33 = vld [vmem:[%s11335_s28 + $0x34] ss:$8 sps:$4 sm:$0xff]   ;;  %v8144_v34 = vld [vmem:[%s11335_s28 + $0x30] ss:$8 sps:$4 sm:$0xff]  }
  0x26   : > { %v8133_v6 = vld [vmem:[%s661_s4] sm:$0xff]   ;;  %v8134_v8 = vld [vmem:[%s661_s4 + $0x8] sm:$0xff]   ;;  %v734_v16 = vpack.c.bf16 %v733_v14, %v9183_v13  ;;  %v847_v18 = vpack.c.bf16 %v846_v17, %v9189_v15  ;;  %v9216_v24 = vsel %vm894_vm8, 1.0, %v8986_v1  ;;  %v897_v25 = vsel %vm895_vm9, 1.0, %v8986_v1  ;;  %v8152_v37 = vld [vmem:[%s11335_s28 + $0x54] ss:$8 sps:$4 sm:$0xff]  }
  0x27   : > { %7901 = vmatpush3.bf16.msra.mxu1 %v8133_v6  ;;  %7917 = vmatpush3.bf16.msra.mxu0 %v8133_v6  ;;  %v898_v26 = vpack.c.bf16 %v897_v25, %v9216_v24  ;;  %v8149_v35 = vld [vmem:[%s11335_s28 + $0x44] ss:$8 sps:$4 sm:$0xff]   ;;  %v8147_v36 = vld [vmem:[%s11335_s28 + $0x40] ss:$8 sps:$4 sm:$0xff]   ;;  %v8150_v38 = vld [vmem:[%s11335_s28 + $0x50] ss:$8 sps:$4 sm:$0xff]  }
  0x28   : > { %7902 = vmatprep.subr.bf16.mxu1 %v8986_v1  ;;  %7918 = vmatprep.subr.bf16.mxu0 %v8986_v1  ;;  %v8155_v39 = vld [vmem:[%s11335_s28 + $0x64] ss:$8 sps:$4 sm:$0xff]   ;;  %v8153_v40 = vld [vmem:[%s11335_s28 + $0x60] ss:$8 sps:$4 sm:$0xff]   ;;  %v8158_v41 = vld [vmem:[%s11335_s28 + $0x74] ss:$8 sps:$4 sm:$0xff]  }
  0x29   : > { %v8156_v42 = vld [vmem:[%s11335_s28 + $0x70] ss:$8 sps:$4 sm:$0xff]   ;;  %v8161_v43 = vld [vmem:[%s11335_s28 + $0x84] ss:$8 sps:$4 sm:$0xff]   ;;  %v8159_v44 = vld [vmem:[%s11335_s28 + $0x80] ss:$8 sps:$4 sm:$0xff]  }
  0x2a   : > { %v8164_v45 = vld [vmem:[%s11335_s28 + $0x94] ss:$8 sps:$4 sm:$0xff]   ;;  %v8162_v46 = vld [vmem:[%s11335_s28 + $0x90] ss:$8 sps:$4 sm:$0xff]   ;;  %v8167_v47 = vld [vmem:[%s11335_s28 + $0xa4] ss:$8 sps:$4 sm:$0xff]  }
  0x2b   : > { %7903 = vmatpush3.bf16.msra.mxu1 %v8134_v8  ;;  %7919 = vmatpush3.bf16.msra.mxu0 %v8134_v8  ;;  %v8165_v48 = vld [vmem:[%s11335_s28 + $0xa0] ss:$8 sps:$4 sm:$0xff]   ;;  %v8170_v49 = vld [vmem:[%s11335_s28 + $0xb4] ss:$8 sps:$4 sm:$0xff]   ;;  %v8168_v50 = vld [vmem:[%s11335_s28 + $0xb0] ss:$8 sps:$4 sm:$0xff]  }
  0x2c   : > { %7908 = vmatprep.subr.bf16.mxu1 %v8986_v1  ;;  %1229 = vmatprep.subr.bf16.mxu0 %v8137_v28  ;;  %v8173_v51 = vld [vmem:[%s11335_s28 + $0xc4] ss:$8 sps:$4 sm:$0xff]   ;;  %v8171_v52 = vld [vmem:[%s11335_s28 + $0xc0] ss:$8 sps:$4 sm:$0xff]   ;;  %v8176_v53 = vld [vmem:[%s11335_s28 + $0xd4] ss:$8 sps:$4 sm:$0xff]  }
  0x2d   : > { %v8174_v54 = vld [vmem:[%s11335_s28 + $0xd0] ss:$8 sps:$4 sm:$0xff]   ;;  %v8179_v55 = vld [vmem:[%s11335_s28 + $0xe4] ss:$8 sps:$4 sm:$0xff]   ;;  %v8177_v58 = vld [vmem:[%s11335_s28 + $0xe0] ss:$8 sps:$4 sm:$0xff]  }
  0x2e   : > { %7905 = vmatmul.mubr.msk.bf16.vlgmr.msra.gmra.mrb[0].mxu1 %vm747_vm5, %v734_v16  ;;  %7921 = vmatmul.mubr.msk.bf16.vlgmr.msra.gmra.mrb[0].mxu0 %vm747_vm5, %v847_v18  ;;  %v8182_v7 = vld [vmem:[%s11335_s28 + $0xf4] ss:$8 sps:$4 sm:$0xff]   ;;  %v8185_v9 = vld [vmem:[%s11335_s28 + $0x104] ss:$8 sps:$4 sm:$0xff]   ;;  %s11336_s0 = sld [smem:[#allocation13_spill]]  ;;  %s11338_s1 = smov 64  }
  0x2f   : > { %7909 = vmatpush3.bf16.msra.mxu1 %v8133_v6  ;;  %7912 = vmatprep.mubr.msk.bf16.mxu1 %vm8987_vm0, %v8986_v1  ;;  %vm3261_vm1 = vcmask 31744   ;;  %vm3881_vm3 = vcmask 385024   ;;  %vm4024_vm4 = vcmask 392192   ;;  %vm4197_vm6 = vsmask.f32 256 }
  0x30   : > { %7910 = vmatprep.subr.bf16.mxu1 %v8986_v1  ;;  %1230 = vmatpush1.bf16.msra.mxu0 %v8135_v27  ;;  %vm4211_vm8 = vsmask.f32 1280 }
  0x31   : > { %1231 = vmatprep.subr.bf16.mxu0 %v8140_v29 }
  0x33   : > { %7911 = vmatpush3.bf16.msra.mxu1 %v8134_v8 }
  0x34   : > { %7924 = vmatprep.subr.bf16.mxu1 %v8986_v1  ;;  %1232 = vmatpush1.bf16.msra.mxu0 %v8138_v30 }
  0x35   : > { %1233 = vmatprep.subr.bf16.mxu0 %v8143_v31 }
  0x36   : > { %7913 = vmatmul.mubr.msk.bf16.vlgmr.msra.gmra.mrb[4].mxu1 %vm747_vm5, %v796_v23  ;;  %v8991_v23 = vmov 0  }
  0x37   : > { %7925 = vmatpush3.bf16.msra.mxu1 %v8133_v6  ;;  %7928 = vmatprep.mubr.msk.bf16.mxu1 %vm8987_vm0, %v8986_v1 }
  0x38   : > { %7926 = vmatprep.subr.bf16.mxu1 %v8986_v1  ;;  %1234 = vmatpush1.bf16.msra.mxu0 %v8141_v32 }
  0x39   : > { %1235 = vmatprep.subr.bf16.mxu0 %v8146_v33 }
  0x3b   : > { %7927 = vmatpush3.bf16.msra.mxu1 %v8134_v8  ;;  %v8180_v8 = vld [vmem:[%s11335_s28 + $0xf0] ss:$8 sps:$4 sm:$0xff]  }
  0x3c   : > { %1236 = vmatpush1.bf16.msra.mxu0 %v8144_v34 }
  0x3d   : > { %1237 = vmatprep.subr.bf16.mxu0 %v8149_v35 }
  0x3e   : > { %7929 = vmatmul.mubr.msk.bf16.vlgmr.msra.gmra.mrb[8].mxu1 %vm747_vm5, %v898_v26 }
  0x3f   : > { %1455 = vmatprep.mubr.bf16.mxu1 %v8991_v23 }
  0x40   : > { %1238 = vmatpush1.bf16.msra.mxu0 %v8147_v36 }
  0x41   : > { %1239 = vmatprep.subr.bf16.mxu0 %v8152_v37  ;;  %v8183_v37 = vld [vmem:[%s11335_s28 + $0x100] ss:$8 sps:$4 sm:$0xff]  }
  0x44   : > { %1240 = vmatpush1.bf16.msra.mxu0 %v8150_v38  ;;  %v8188_v38 = vld [vmem:[%s11335_s28 + $0x114] ss:$8 sps:$4 sm:$0xff]  }
  0x45   : > { %1241 = vmatprep.subr.bf16.mxu0 %v8155_v39  ;;  %v8186_v39 = vld [vmem:[%s11335_s28 + $0x110] ss:$8 sps:$4 sm:$0xff]  }
  0x48   : > { %1242 = vmatpush1.bf16.msra.mxu0 %v8153_v40  ;;  %v8191_v40 = vld [vmem:[%s11335_s28 + $0x124] ss:$8 sps:$4 sm:$0xff]  }
  0x49   : > { %1243 = vmatprep.subr.bf16.mxu0 %v8158_v41  ;;  %v8189_v41 = vld [vmem:[%s11335_s28 + $0x120] ss:$8 sps:$4 sm:$0xff]  }
  0x4c   : > { %1244 = vmatpush1.bf16.msra.mxu0 %v8156_v42  ;;  %v8194_v42 = vld [vmem:[%s11335_s28 + $0x134] ss:$8 sps:$4 sm:$0xff]  }
  0x4d   : > { %1245 = vmatprep.subr.bf16.mxu0 %v8161_v43  ;;  %v8192_v43 = vld [vmem:[%s11335_s28 + $0x130] ss:$8 sps:$4 sm:$0xff]  }
  0x50   : > { %1246 = vmatpush1.bf16.msra.mxu0 %v8159_v44  ;;  %v8197_v44 = vld [vmem:[%s11335_s28 + $0x144] ss:$8 sps:$4 sm:$0xff]  }
  0x51   : > { %1247 = vmatprep.subr.bf16.mxu0 %v8164_v45  ;;  %v8195_v45 = vld [vmem:[%s11335_s28 + $0x140] ss:$8 sps:$4 sm:$0xff]  }
  0x54   : > { %1248 = vmatpush1.bf16.msra.mxu0 %v8162_v46  ;;  %v8200_v46 = vld [vmem:[%s11335_s28 + $0x154] ss:$8 sps:$4 sm:$0xff]  }
  0x55   : > { %1249 = vmatprep.subr.bf16.mxu0 %v8167_v47  ;;  %v8198_v47 = vld [vmem:[%s11335_s28 + $0x150] ss:$8 sps:$4 sm:$0xff]  }
  0x58   : > { %1250 = vmatpush1.bf16.msra.mxu0 %v8165_v48  ;;  %v8203_v48 = vld [vmem:[%s11335_s28 + $0x164] ss:$8 sps:$4 sm:$0xff]  }
  0x59   : > { %1251 = vmatprep.subr.bf16.mxu0 %v8170_v49 }
  0x5c   : > { %1252 = vmatpush1.bf16.msra.mxu0 %v8168_v50  ;;  %v8201_v50 = vld [vmem:[%s11335_s28 + $0x160] ss:$8 sps:$4 sm:$0xff]  }
  0x5d   : > { %1253 = vmatprep.subr.bf16.mxu0 %v8173_v51  ;;  %v8206_v51 = vld [vmem:[%s11335_s28 + $0x174] ss:$8 sps:$4 sm:$0xff]  }
  0x60   : > { %1254 = vmatpush1.bf16.msra.mxu0 %v8171_v52 }
  0x61   : > { %1255 = vmatprep.subr.bf16.mxu0 %v8176_v53 }
  0x64   : > { %1256 = vmatpush1.bf16.msra.mxu0 %v8174_v54  ;;  %v8204_v54 = vld [vmem:[%s11335_s28 + $0x170] ss:$8 sps:$4 sm:$0xff]   ;;  %s11340_s28 = sld [smem:[#allocation16_spill]] }
  0x65   : > { %1257 = vmatprep.subr.bf16.mxu0 %v8179_v55 }
  0x68   : > { %1258 = vmatpush1.bf16.msra.mxu0 %v8177_v58  ;;  %v9377_v58 = vsub.s32 0, %v9158_v2 }
  0x69   : > { %1259 = vmatprep.subr.bf16.mxu0 %v8182_v7 }
  0x6c   : > { %1260 = vmatpush1.bf16.msra.mxu0 %v8180_v8 }
  0x6d   : > { %1272 = vmatprep.subr.bf16.mxu0 %v8185_v9 }
 0x101   : > { %v785_v56 = vpop.f32.mrb[0].mxu1  ;;  %v885_v57 = vpop.f32.mrb[0].mxu0 }
 0x102   : > { %v7906_v59 = vpop.f32.mrb[1].mxu1  ;;  %v7922_v60 = vpop.f32.mrb[1].mxu0 }
 0x103   : > { %v788_v61 = vpop.f32.mrb[2].mxu1  ;;  %v888_v62 = vpop.f32.mrb[2].mxu0  ;;  %v720_v59 = vld [vmem:[%s11336_s0] sm:$0x3]  ;;  %v9383_v60 = vsub.s32 1, %v9158_v2 }
 0x104   : > { %v7907_v63 = vpop.f32.mrb[3].mxu1  ;;  %v8098_v0 = vpack.i.bf16 %v888_v62, %v885_v57  ;;  %v7923_v6 = vpop.f32.mrb[3].mxu0 }
 0x105   : > { %v986_v62 = vrot.slane %v720_v59, %v9383_v60 }
 0x109   : > { %v834_v10 = vpop.f32.mrb[4].mxu1 }
 0x10a   : > { %v7914_v11 = vpop.f32.mrb[5].mxu1 }
 0x10b   : > { %v837_v12 = vpop.f32.mrb[6].mxu1 }
 0x10c   : > { %v8093_v14 = vpack.i.bf16 %v837_v12, %v834_v10  ;;  %v7915_v16 = vpop.f32.mrb[7].mxu1 }
 0x10e   : > { %8094 = vrot.lane.b32.xlu0 %v8093_v14, %s8988_s29  ;;  %s11317_s29 = sand.u32 1, %s8976_s25  }
 0x10f   : > { %s10251_s21 = scalar_lea.vmem [#allocation2], %s11317_s29  ;;  %s11342_s29 = sand.u32 1, %s8976_s25  }
 0x110   : > { %s7039_s0 = scalar_lea.sflag [#allocation3], %s11342_s29 }
 0x111   : > { %v936_v17 = vpop.f32.mrb[8].mxu1 }
 0x112   : > { %8099 = vrot.lane.b32.xlu0 %v8098_v0, %s11313_s22  ;;  %v7930_v18 = vpop.f32.mrb[9].mxu1 }
 0x113   : > { %v939_v20 = vpop.f32.mrb[10].mxu1 }
 0x114   : > { %v8103_v21 = vpack.i.bf16 %v939_v20, %v936_v17  ;;  %v7931_v22 = vpop.f32.mrb[11].mxu1 }
 0x115   : > { %v9396_v22 = vpack.c.bf16 %v9203_v19, %v9203_v19  ;;  %v9410_v19 = vpack.c.bf16 %v9216_v24, %v9216_v24  ;;  %v8210_v24 = vld [vmem:[%s11337_s30 + $0x10] ss:$8 sps:$4 sm:$0xff]  }
 0x116   : > { %8104 = vrot.lane.b32.xlu1 %v8103_v21, %s8990_s2  ;;  %v9389_v21 = vpack.c.bf16 %v9183_v13, %v9183_v13  ;;  %v9403_v13 = vpack.c.bf16 %v9189_v15, %v9189_v15  ;;  %v8209_v15 = vld [vmem:[%s11337_s30 + $0x4] ss:$8 sps:$4 sm:$0xff]   ;;  %s7749_s2 = sshll.u32 %s9124_s3, 4 }
 0x180   : > { %v8095_v25 = vpop.permute.xlu0 %8094 }
 0x181   : > { %v8097_v26 = vunpack.i.h.bf16 %v8095_v25  ;;  %v8096_v27 = vunpack.i.l.bf16 %v8095_v25  ;;  %v8207_v25 = vld [vmem:[%s11337_s30] ss:$8 sps:$4 sm:$0xff]  }
 0x183   : > { %v969_v28 = vsel %vm967_vm10, %v788_v61, %v8097_v26  ;;  %v968_v29 = vsel %vm967_vm10, %v785_v56, %v8096_v27  ;;  %v982_v61 = vrot.slane %v720_v59, %v9377_v58 }
 0x184   : > { %v975_v30 = vpack.c.bf16 %v969_v28, %v968_v29  ;;  %v8100_v31 = vpop.permute.xlu0 %8099  ;;  %v8213_v28 = vld [vmem:[%s11337_s30 + $0x20] ss:$8 sps:$4 sm:$0xff]   ;;  %v8218_v29 = vld [vmem:[%s11337_s30 + $0x34] ss:$8 sps:$4 sm:$0xff]  }
 0x185   : > { %v8102_v32 = vunpack.i.h.bf16 %v8100_v31  ;;  %v8101_v33 = vunpack.i.l.bf16 %v8100_v31  ;;  %v8221_v31 = vld [vmem:[%s11337_s30 + $0x44] ss:$8 sps:$4 sm:$0xff]  }
 0x187   : > { %v971_v34 = vsel %vm970_vm11, %v8096_v27, %v8101_v33  ;;  %v972_v35 = vsel %vm970_vm11, %v8097_v26, %v8102_v32  ;;  %v8212_v26 = vld [vmem:[%s11337_s30 + $0x14] ss:$8 sps:$4 sm:$0xff]   ;;  %v8215_v27 = vld [vmem:[%s11337_s30 + $0x24] ss:$8 sps:$4 sm:$0xff]  }
 0x188   : > { %v976_v36 = vpack.c.bf16 %v972_v35, %v971_v34  ;;  %v8105_v49 = vpop.permute.xlu1 %8104  ;;  %v8222_v34 = vld [vmem:[%s11337_s30 + $0x50] ss:$8 sps:$4 sm:$0xff]   ;;  %v8227_v35 = vld [vmem:[%s11337_s30 + $0x64] ss:$8 sps:$4 sm:$0xff]  }
 0x189   : > { %v8107_v52 = vunpack.i.h.bf16 %v8105_v49  ;;  %v8106_v53 = vunpack.i.l.bf16 %v8105_v49  ;;  %v8248_v49 = vld [vmem:[%s11337_s30 + $0xd4] ss:$8 sps:$4 sm:$0xff]  }
 0x18a   : > { %1261 = vmatprep.mubr.bf16.mxu0 %v976_v36  ;;  %v8225_v36 = vld [vmem:[%s11337_s30 + $0x60] ss:$8 sps:$4 sm:$0xff]  }
 0x18b   : > { %1262 = vmatmul.mubr.bf16.vlgmr.msra.gmra.mrb[4].mxu0 %v975_v30  ;;  %v974_v55 = vsel %vm747_vm5, %v8102_v32, %v8107_v52  ;;  %v973_v56 = vsel %vm747_vm5, %v8101_v33, %v8106_v53  ;;  %v8216_v30 = vld [vmem:[%s11337_s30 + $0x30] ss:$8 sps:$4 sm:$0xff]   ;;  %v8219_v32 = vld [vmem:[%s11337_s30 + $0x40] ss:$8 sps:$4 sm:$0xff]   ;;  %v8224_v33 = vld [vmem:[%s11337_s30 + $0x54] ss:$8 sps:$4 sm:$0xff]  }
 0x18c   : > { %1273 = vmatpush1.bf16.msra.mxu0 %v8183_v37  ;;  %1304 = vmatprep.mubr.bf16.mxu0 %v8991_v23  ;;  %v977_v57 = vpack.c.bf16 %v974_v55, %v973_v56  ;;  %v8230_v37 = vld [vmem:[%s11337_s30 + $0x74] ss:$8 sps:$4 sm:$0xff]   ;;  %v8249_v52 = vld [vmem:[%s11337_s30 + $0xe0] ss:$8 sps:$4 sm:$0xff]   ;;  %v8257_v55 = vld [vmem:[%s11337_s30 + $0x104] ss:$8 sps:$4 sm:$0xff]  }
 0x18d   : > { %1274 = vmatprep.subr.bf16.mxu0 %v8188_v38  ;;  %v8228_v38 = vld [vmem:[%s11337_s30 + $0x70] ss:$8 sps:$4 sm:$0xff]   ;;  %v8254_v53 = vld [vmem:[%s11337_s30 + $0xf4] ss:$8 sps:$4 sm:$0xff]   ;;  %vm4196_vm5 = vcmask 1040384  }
 0x18e   : > { %vm4198_vm7 = vmand %vm4196_vm5, %vm4197_vm6 }
 0x190   : > { %1275 = vmatpush1.bf16.msra.mxu0 %v8186_v39  ;;  %v8233_v39 = vld [vmem:[%s11337_s30 + $0x84] ss:$8 sps:$4 sm:$0xff]  }
 0x191   : > { %1276 = vmatprep.subr.bf16.mxu0 %v8191_v40  ;;  %v8231_v40 = vld [vmem:[%s11337_s30 + $0x80] ss:$8 sps:$4 sm:$0xff]  }
 0x194   : > { %1277 = vmatpush1.bf16.msra.mxu0 %v8189_v41  ;;  %v8236_v41 = vld [vmem:[%s11337_s30 + $0x94] ss:$8 sps:$4 sm:$0xff]  }
 0x195   : > { %1278 = vmatprep.subr.bf16.mxu0 %v8194_v42  ;;  %v8234_v42 = vld [vmem:[%s11337_s30 + $0x90] ss:$8 sps:$4 sm:$0xff]  }
 0x198   : > { %1279 = vmatpush1.bf16.msra.mxu0 %v8192_v43  ;;  %v8239_v43 = vld [vmem:[%s11337_s30 + $0xa4] ss:$8 sps:$4 sm:$0xff]  }
 0x199   : > { %1280 = vmatprep.subr.bf16.mxu0 %v8197_v44  ;;  %v8237_v44 = vld [vmem:[%s11337_s30 + $0xa0] ss:$8 sps:$4 sm:$0xff]  }
 0x19c   : > { %1281 = vmatpush1.bf16.msra.mxu0 %v8195_v45  ;;  %v8242_v45 = vld [vmem:[%s11337_s30 + $0xb4] ss:$8 sps:$4 sm:$0xff]  }
 0x19d   : > { %1282 = vmatprep.subr.bf16.mxu0 %v8200_v46  ;;  %v8240_v46 = vld [vmem:[%s11337_s30 + $0xb0] ss:$8 sps:$4 sm:$0xff]  }
 0x1a0   : > { %1283 = vmatpush1.bf16.msra.mxu0 %v8198_v47  ;;  %v8245_v47 = vld [vmem:[%s11337_s30 + $0xc4] ss:$8 sps:$4 sm:$0xff]  }
 0x1a1   : > { %1284 = vmatprep.subr.bf16.mxu0 %v8203_v48  ;;  %v8243_v48 = vld [vmem:[%s11337_s30 + $0xc0] ss:$8 sps:$4 sm:$0xff]  }
 0x1a4   : > { %1285 = vmatpush1.bf16.msra.mxu0 %v8201_v50  ;;  %v8246_v50 = vld [vmem:[%s11337_s30 + $0xd0] ss:$8 sps:$4 sm:$0xff]  }
 0x1a5   : > { %1286 = vmatprep.subr.bf16.mxu0 %v8206_v51  ;;  %v8251_v51 = vld [vmem:[%s11337_s30 + $0xe4] ss:$8 sps:$4 sm:$0xff]  }
 0x1a8   : > { %1287 = vmatpush1.bf16.msra.mxu0 %v8204_v54  ;;  %v8252_v54 = vld [vmem:[%s11337_s30 + $0xf0] ss:$8 sps:$4 sm:$0xff]  }
 0x1ab   : > { %1305 = vmatmul.mubr.bf16.vlgmr.msra.gmra.mrb[4].mxu0 %v977_v57 }
 0x1ac   : > { %2382 = vmatprep.mubr.bf16.mxu0 %v8991_v23 }
 0x27e   : > { %v1306_v63 = vpop.f32.mrb[4].mxu0 }
 0x27f   : > { %v7984_v0 = vadd.f32 %v1306_v63, %v982_v61  ;;  %v1308_v6 = vpop.f32.mrb[5].mxu0 }
 0x280   : > { %v7985_v7 = vadd.f32 %v1308_v6, %v986_v62  ;;  %v1310_v8 = vpop.f32.mrb[6].mxu0 }
 0x281   : > { %v7986_v9 = vadd.f32 %v1310_v8, %v982_v61  ;;  %v1312_v10 = vpop.f32.mrb[7].mxu0  ;;  %v1315_v12 = vmax.f32 %v7984_v0, 0.0 }
 0x282   : > { %v7987_v11 = vadd.f32 %v1312_v10, %v986_v62  ;;  %v1316_v16 = vmax.f32 %v7985_v7, 0.0 }
 0x283   : > { %v1317_v14 = vmax.f32 %v7986_v9, 0.0 }
 0x284   : > { %v1318_v17 = vmax.f32 %v7987_v11, 0.0 }
 0x285   : > { %v1319_v18 = vpack.c.bf16 %v1317_v14, %v1315_v12 }
 0x286   : > { %v1320_v20 = vpack.c.bf16 %v1318_v17, %v1316_v16 }
 0x288   : > { %1423 = vmatprep.subr.bf16.mxu1 %v1320_v20 }
 0x289   : > { %1424 = vmatpush1.bf16.msra.mxu1 %v1319_v18 }
 0x28a   : > { %1468 = vmatprep.subr.bf16.mxu1 %v1320_v20 }
 0x28c   : > { %7201 = vmatmul.mubr.msk.bf16.vlgmr.msra.gmra.mrb[12].mxu1 %vm1419_vm12, %v9389_v21 }
 0x28d   : > { %1469 = vmatpush1.bf16.msra.mxu1 %v1319_v18  ;;  %1500 = vmatprep.mubr.bf16.mxu1 %v8991_v23 }
 0x28e   : > { %1513 = vmatprep.subr.bf16.mxu1 %v1320_v20 }
 0x294   : > { %7202 = vmatmul.mubr.msk.bf16.vlgmr.msra.gmra.mrb[16].mxu1 %vm1419_vm12, %v9396_v22 }
 0x295   : > { %1514 = vmatpush1.bf16.msra.mxu1 %v1319_v18  ;;  %1545 = vmatprep.mubr.bf16.mxu1 %v8991_v23 }
 0x296   : > { %1558 = vmatprep.subr.bf16.mxu1 %v1320_v20 }
 0x29c   : > { %7203 = vmatmul.mubr.msk.bf16.vlgmr.msra.gmra.mrb[20].mxu1 %vm1419_vm12, %v9403_v13 }
 0x29d   : > { %1559 = vmatpush1.bf16.msra.mxu1 %v1319_v18  ;;  %1590 = vmatprep.mubr.bf16.mxu1 %v8991_v23 }
 0x29e   : > { %2116 = vmatprep.subr.bf16.mxu1 %v8209_v15  ;;  %v8255_v15 = vld [vmem:[%s11337_s30 + $0x100] ss:$8 sps:$4 sm:$0xff]  }
 0x2a4   : > { %7204 = vmatmul.mubr.msk.bf16.vlgmr.msra.gmra.mrb[24].mxu1 %vm1419_vm12, %v9410_v19 }
 0x2a5   : > { %2117 = vmatpush1.bf16.msra.mxu1 %v8207_v25 }
 0x2a6   : > { %2118 = vmatprep.subr.bf16.mxu1 %v8212_v26 }
 0x2a9   : > { %2119 = vmatpush1.bf16.msra.mxu1 %v8210_v24  ;;  %v8260_v24 = vld [vmem:[%s11337_s30 + $0x114] ss:$8 sps:$4 sm:$0xff]  }
 0x2aa   : > { %2120 = vmatprep.subr.bf16.mxu1 %v8215_v27 }
 0x2ad   : > { %2121 = vmatpush1.bf16.msra.mxu1 %v8213_v28  ;;  %v8258_v28 = vld [vmem:[%s11337_s30 + $0x110] ss:$8 sps:$4 sm:$0xff]  }
 0x2ae   : > { %2122 = vmatprep.subr.bf16.mxu1 %v8218_v29  ;;  %v8263_v29 = vld [vmem:[%s11337_s30 + $0x124] ss:$8 sps:$4 sm:$0xff]  }
 0x2b1   : > { %2123 = vmatpush1.bf16.msra.mxu1 %v8216_v30  ;;  %v8261_v30 = vld [vmem:[%s11337_s30 + $0x120] ss:$8 sps:$4 sm:$0xff]  }
 0x2b2   : > { %2124 = vmatprep.subr.bf16.mxu1 %v8221_v31  ;;  %v8266_v31 = vld [vmem:[%s11337_s30 + $0x134] ss:$8 sps:$4 sm:$0xff]  }
 0x2b5   : > { %2125 = vmatpush1.bf16.msra.mxu1 %v8219_v32  ;;  %v8264_v32 = vld [vmem:[%s11337_s30 + $0x130] ss:$8 sps:$4 sm:$0xff]  }
 0x2b6   : > { %2126 = vmatprep.subr.bf16.mxu1 %v8224_v33  ;;  %v8269_v33 = vld [vmem:[%s11337_s30 + $0x144] ss:$8 sps:$4 sm:$0xff]  }
 0x2b9   : > { %2127 = vmatpush1.bf16.msra.mxu1 %v8222_v34  ;;  %v8267_v34 = vld [vmem:[%s11337_s30 + $0x140] ss:$8 sps:$4 sm:$0xff]  }
 0x2ba   : > { %2128 = vmatprep.subr.bf16.mxu1 %v8227_v35 }
 0x2bd   : > { %2129 = vmatpush1.bf16.msra.mxu1 %v8225_v36  ;;  %v8272_v36 = vld [vmem:[%s11337_s30 + $0x154] ss:$8 sps:$4 sm:$0xff]  }
 0x2be   : > { %2130 = vmatprep.subr.bf16.mxu1 %v8230_v37 }
 0x2c1   : > { %2131 = vmatpush1.bf16.msra.mxu1 %v8228_v38 }
 0x2c2   : > { %2132 = vmatprep.subr.bf16.mxu1 %v8233_v39  ;;  %v8270_v39 = vld [vmem:[%s11337_s30 + $0x150] ss:$8 sps:$4 sm:$0xff]  }
 0x2c5   : > { %2133 = vmatpush1.bf16.msra.mxu1 %v8231_v40  ;;  %v8275_v40 = vld [vmem:[%s11337_s30 + $0x164] ss:$8 sps:$4 sm:$0xff]  }
 0x2c6   : > { %2134 = vmatprep.subr.bf16.mxu1 %v8236_v41  ;;  %v8273_v41 = vld [vmem:[%s11337_s30 + $0x160] ss:$8 sps:$4 sm:$0xff]  }
 0x2c9   : > { %2135 = vmatpush1.bf16.msra.mxu1 %v8234_v42  ;;  %v8278_v42 = vld [vmem:[%s11337_s30 + $0x174] ss:$8 sps:$4 sm:$0xff]  }
 0x2ca   : > { %2136 = vmatprep.subr.bf16.mxu1 %v8239_v43  ;;  %v8276_v43 = vld [vmem:[%s11337_s30 + $0x170] ss:$8 sps:$4 sm:$0xff]  }
 0x2cd   : > { %2137 = vmatpush1.bf16.msra.mxu1 %v8237_v44  ;;  %v8281_v44 = vld [vmem:[%s11337_s30 + $0x184] ss:$8 sps:$4 sm:$0xff]  }
 0x2ce   : > { %2138 = vmatprep.subr.bf16.mxu1 %v8242_v45  ;;  %v8279_v45 = vld [vmem:[%s11337_s30 + $0x180] ss:$8 sps:$4 sm:$0xff]  }
 0x2d1   : > { %2139 = vmatpush1.bf16.msra.mxu1 %v8240_v46  ;;  %v8284_v46 = vld [vmem:[%s11337_s30 + $0x194] ss:$8 sps:$4 sm:$0xff]  }
 0x2d2   : > { %2140 = vmatprep.subr.bf16.mxu1 %v8245_v47  ;;  %v8282_v47 = vld [vmem:[%s11337_s30 + $0x190] ss:$8 sps:$4 sm:$0xff]  }
 0x2d5   : > { %2141 = vmatpush1.bf16.msra.mxu1 %v8243_v48  ;;  %v8287_v48 = vld [vmem:[%s11337_s30 + $0x1a4] ss:$8 sps:$4 sm:$0xff]  }
 0x2d6   : > { %2142 = vmatprep.subr.bf16.mxu1 %v8248_v49  ;;  %v8285_v49 = vld [vmem:[%s11337_s30 + $0x1a0] ss:$8 sps:$4 sm:$0xff]  }
 0x2d9   : > { %2143 = vmatpush1.bf16.msra.mxu1 %v8246_v50  ;;  %v8290_v50 = vld [vmem:[%s11337_s30 + $0x1b4] ss:$8 sps:$4 sm:$0xff]  }
 0x2da   : > { %2144 = vmatprep.subr.bf16.mxu1 %v8251_v51  ;;  %v8288_v51 = vld [vmem:[%s11337_s30 + $0x1b0] ss:$8 sps:$4 sm:$0xff]  }
 0x2dd   : > { %2145 = vmatpush1.bf16.msra.mxu1 %v8249_v52  ;;  %v8293_v52 = vld [vmem:[%s11337_s30 + $0x1c4] ss:$8 sps:$4 sm:$0xff]  }
 0x2de   : > { %2146 = vmatprep.subr.bf16.mxu1 %v8254_v53  ;;  %v8291_v53 = vld [vmem:[%s11337_s30 + $0x1c0] ss:$8 sps:$4 sm:$0xff]  }
 0x2e1   : > { %2147 = vmatpush1.bf16.msra.mxu1 %v8252_v54  ;;  %v8296_v54 = vld [vmem:[%s11337_s30 + $0x1d4] ss:$8 sps:$4 sm:$0xff]  }
 0x2e2   : > { %2157 = vmatprep.subr.bf16.mxu1 %v8257_v55  ;;  %v8294_v55 = vld [vmem:[%s11337_s30 + $0x1d0] ss:$8 sps:$4 sm:$0xff]  }
 0x35f   : > { %v1457_v56 = vpop.f32.mrb[12].mxu1 }
 0x360   : > { %v1459_v57 = vpop.f32.mrb[13].mxu1  ;;  %v1619_v26 = vpack.c.bf16 %v1457_v56, %v1457_v56  ;;  %v8299_v56 = vld [vmem:[%s11337_s30 + $0x1e4] ss:$8 sps:$4 sm:$0xff]  }
 0x361   : > { %v1461_v59 = vpop.f32.mrb[14].mxu1 }
 0x362   : > { %v1462_v61 = vpop.f32.mrb[15].mxu1 }
 0x363   : > { %v8302_v61 = vld [vmem:[%s11337_s30 + $0x1f4] ss:$8 sps:$4 sm:$0xff]  }
 0x367   : > { %v1502_v62 = vpop.f32.mrb[16].mxu1 }
 0x368   : > { %1601 = vrot.lane.b32.xlu1 %v1502_v62, %s11338_s1  ;;  %v1504_v63 = vpop.f32.mrb[17].mxu1 }
 0x369   : > { %1603 = vrot.lane.b32.xlu0 %v1504_v63, %s11338_s1  ;;  %v1506_v0 = vpop.f32.mrb[18].mxu1  ;;  %v8300_v63 = vld [vmem:[%s11337_s30 + $0x1f0] ss:$8 sps:$4 sm:$0xff]  }
 0x36a   : > { %v1507_v6 = vpop.f32.mrb[19].mxu1  ;;  %v8305_v0 = vld [vmem:[%s11337_s30 + $0x204] ss:$8 sps:$4 sm:$0xff]  }
 0x36f   : > { %v1547_v7 = vpop.f32.mrb[20].mxu1 }
 0x370   : > { %v1549_v8 = vpop.f32.mrb[21].mxu1  ;;  %v1622_v27 = vpack.c.bf16 %v1547_v7, %v1547_v7 }
 0x371   : > { %v1551_v9 = vpop.f32.mrb[22].mxu1 }
 0x372   : > { %v1552_v10 = vpop.f32.mrb[23].mxu1 }
 0x377   : > { %v1592_v11 = vpop.f32.mrb[24].mxu1 }
 0x378   : > { %v1594_v12 = vpop.f32.mrb[25].mxu1 }
 0x379   : > { %v8108_v14 = vpack.i.bf16 %v1594_v12, %v1592_v11  ;;  %v1596_v16 = vpop.f32.mrb[26].mxu1  ;;  %v8308_v11 = vld [vmem:[%s11337_s30 + $0x214] ss:$8 sps:$4 sm:$0xff]   ;;  %v8306_v12 = vld [vmem:[%s11337_s30 + $0x210] ss:$8 sps:$4 sm:$0xff]  }
 0x37a   : > { %v1597_v17 = vpop.f32.mrb[27].mxu1  ;;  %v8309_v16 = vld [vmem:[%s11337_s30 + $0x220] ss:$8 sps:$4 sm:$0xff]  }
 0x37b   : > { %8109 = vrot.lane.b32.xlu1 %v8108_v14, %s11338_s1  ;;  %v8311_v14 = vld [vmem:[%s11337_s30 + $0x224] ss:$8 sps:$4 sm:$0xff]   ;;  %v8314_v17 = vld [vmem:[%s11337_s30 + $0x234] ss:$8 sps:$4 sm:$0xff]  }
 0x3da   : > { %v9516_v18 = vpop.permute.xlu1 %1601 }
 0x3db   : > { %v1617_v20 = vsel %vm970_vm11, %v1459_v57, %v9516_v18  ;;  %v8297_v57 = vld [vmem:[%s11337_s30 + $0x1e0] ss:$8 sps:$4 sm:$0xff]   ;;  %v1604_v62 = vpop.permute.xlu0 %1603 }
 0x3dc   : > { %v1620_v25 = vpack.c.bf16 %v1617_v20, %v1617_v20  ;;  %v1605_v7 = vsel %vm970_vm11, %v9516_v18, %v1604_v62  ;;  %v8312_v18 = vld [vmem:[%s11337_s30 + $0x230] ss:$8 sps:$4 sm:$0xff]   ;;  %v8317_v20 = vld [vmem:[%s11337_s30 + $0x244] ss:$8 sps:$4 sm:$0xff]  }
 0x3dd   : > { %v1621_v10 = vpack.c.bf16 %v1605_v7, %v1605_v7  ;;  %v8359_v7 = vld [vmem:[%s11340_s28 + $0x24] ss:$8 sps:$4 sm:$0xff]  }
 0x3de   : > { %2148 = vmatprep.mubr.bf16.mxu1 %v1620_v25  ;;  %v8315_v25 = vld [vmem:[%s11337_s30 + $0x240] ss:$8 sps:$4 sm:$0xff]  }
 0x3df   : > { %2149 = vmatmul.mubr.bf16.vlgmr.msra.gmra.mrb[28].mxu1 %v1619_v26  ;;  %v8318_v26 = vld [vmem:[%s11337_s30 + $0x250] ss:$8 sps:$4 sm:$0xff]  }
 0x3e0   : > { %2158 = vmatpush1.bf16.msra.mxu1 %v8255_v15  ;;  %2189 = vmatprep.mubr.bf16.mxu1 %v1622_v27  ;;  %v8320_v15 = vld [vmem:[%s11337_s30 + $0x254] ss:$8 sps:$4 sm:$0xff]   ;;  %v8321_v27 = vld [vmem:[%s11337_s30 + $0x260] ss:$8 sps:$4 sm:$0xff]  }
 0x3e1   : > { %2159 = vmatprep.subr.bf16.mxu1 %v8260_v24  ;;  %v8323_v24 = vld [vmem:[%s11337_s30 + $0x264] ss:$8 sps:$4 sm:$0xff]  }
 0x3e4   : > { %2160 = vmatpush1.bf16.msra.mxu1 %v8258_v28  ;;  %v8326_v28 = vld [vmem:[%s11337_s30 + $0x274] ss:$8 sps:$4 sm:$0xff]  }
 0x3e5   : > { %2161 = vmatprep.subr.bf16.mxu1 %v8263_v29  ;;  %v8324_v29 = vld [vmem:[%s11337_s30 + $0x270] ss:$8 sps:$4 sm:$0xff]  }
 0x3e8   : > { %2162 = vmatpush1.bf16.msra.mxu1 %v8261_v30  ;;  %v8329_v30 = vld [vmem:[%s11337_s30 + $0x284] ss:$8 sps:$4 sm:$0xff]  }
 0x3e9   : > { %2163 = vmatprep.subr.bf16.mxu1 %v8266_v31  ;;  %v8327_v31 = vld [vmem:[%s11337_s30 + $0x280] ss:$8 sps:$4 sm:$0xff]  }
 0x3ec   : > { %2164 = vmatpush1.bf16.msra.mxu1 %v8264_v32  ;;  %v8332_v32 = vld [vmem:[%s11337_s30 + $0x294] ss:$8 sps:$4 sm:$0xff]  }
 0x3ed   : > { %v8110_v35 = vpop.permute.xlu1 %8109  ;;  %2165 = vmatprep.subr.bf16.mxu1 %v8269_v33  ;;  %v8330_v33 = vld [vmem:[%s11337_s30 + $0x290] ss:$8 sps:$4 sm:$0xff]  }
 0x3ee   : > { %v8111_v37 = vunpack.i.l.bf16 %v8110_v35  ;;  %v8112_v59 = vunpack.i.h.bf16 %v8110_v35  ;;  %v8333_v35 = vld [vmem:[%s11337_s30 + $0x2a0] ss:$8 sps:$4 sm:$0xff]  }
 0x3f0   : > { %v9551_v38 = vsel %vm970_vm11, %v1549_v8, %v8111_v37  ;;  %2166 = vmatpush1.bf16.msra.mxu1 %v8267_v34  ;;  %v1614_v6 = vsel %vm970_vm11, %v8111_v37, %v8112_v59  ;;  %v8303_v8 = vld [vmem:[%s11337_s30 + $0x200] ss:$8 sps:$4 sm:$0xff]   ;;  %v8335_v34 = vld [vmem:[%s11337_s30 + $0x2a4] ss:$8 sps:$4 sm:$0xff]   ;;  %v8336_v37 = vld [vmem:[%s11337_s30 + $0x2b0] ss:$8 sps:$4 sm:$0xff]  }
 0x3f1   : > { %2167 = vmatprep.subr.bf16.mxu1 %v8272_v36  ;;  %v1624_v9 = vpack.c.bf16 %v1614_v6, %v1614_v6  ;;  %v8338_v36 = vld [vmem:[%s11337_s30 + $0x2b4] ss:$8 sps:$4 sm:$0xff]   ;;  %v8354_v6 = vld [vmem:[%s11340_s28 + $0x10] ss:$8 sps:$4 sm:$0xff]  }
 0x3f4   : > { %2168 = vmatpush1.bf16.msra.mxu1 %v8270_v39  ;;  %v8341_v39 = vld [vmem:[%s11337_s30 + $0x2c4] ss:$8 sps:$4 sm:$0xff]  }
 0x3f5   : > { %2169 = vmatprep.subr.bf16.mxu1 %v8275_v40  ;;  %v8339_v40 = vld [vmem:[%s11337_s30 + $0x2c0] ss:$8 sps:$4 sm:$0xff]  }
 0x3f8   : > { %2170 = vmatpush1.bf16.msra.mxu1 %v8273_v41  ;;  %v8344_v41 = vld [vmem:[%s11337_s30 + $0x2d4] ss:$8 sps:$4 sm:$0xff]  }
 0x3f9   : > { %2171 = vmatprep.subr.bf16.mxu1 %v8278_v42  ;;  %v8342_v42 = vld [vmem:[%s11337_s30 + $0x2d0] ss:$8 sps:$4 sm:$0xff]  }
 0x3fc   : > { %2172 = vmatpush1.bf16.msra.mxu1 %v8276_v43  ;;  %v8347_v43 = vld [vmem:[%s11337_s30 + $0x2e4] ss:$8 sps:$4 sm:$0xff]  }
 0x3fd   : > { %2173 = vmatprep.subr.bf16.mxu1 %v8281_v44  ;;  %v8345_v44 = vld [vmem:[%s11337_s30 + $0x2e0] ss:$8 sps:$4 sm:$0xff]  }
 0x400   : > { %2174 = vmatpush1.bf16.msra.mxu1 %v8279_v45  ;;  %v8350_v45 = vld [vmem:[%s11337_s30 + $0x2f4] ss:$8 sps:$4 sm:$0xff]  }
 0x401   : > { %2175 = vmatprep.subr.bf16.mxu1 %v8284_v46  ;;  %v8348_v46 = vld [vmem:[%s11337_s30 + $0x2f0] ss:$8 sps:$4 sm:$0xff]   ;;  %s7056_s30 = sshll.u32 %s10251_s21, 4  ;;  %s7057_s30 = int_to_ptr.vmem [resolvable:$true] %s7056_s30 }
 0x402   : > { %s8922_s26 = scalar_lea.vmem %s7057_s30, 16 }
 0x403   : > { %p8923_p11 = scmp.ne.s32.totalorder %s7057_s30, %s8922_s26 }
 0x404   : > { %2176 = vmatpush1.bf16.msra.mxu1 %v8282_v47  ;;  %v1623_v47 = vpack.c.bf16 %v9551_v38, %v9551_v38 }
 0x405   : > { %2177 = vmatprep.subr.bf16.mxu1 %v8287_v48  ;;  %v1417_v48 = vld [vmem:[%s11339_s27] sm:$0x3]  ;;  %p8924_p12 = pnand %p8923_p11, %p9141_p5 }
 0x407   : > { %p8925_p13 = pneg %p8924_p12 }
 0x408   : > { %2178 = vmatpush1.bf16.msra.mxu1 %v8285_v49  ;;  %v1629_v49 = vrot.slane %v1417_v48, %v9377_v58 }
 0x409   : > { %2179 = vmatprep.subr.bf16.mxu1 %v8290_v50  ;;  %v1633_v50 = vrot.slane %v1417_v48, %v9383_v60 }
 0x40c   : > { %2180 = vmatpush1.bf16.msra.mxu1 %v8288_v51 }
 0x40d   : > { %2181 = vmatprep.subr.bf16.mxu1 %v8293_v52 }
 0x410   : > { %2182 = vmatpush1.bf16.msra.mxu1 %v8291_v53 }
 0x411   : > { %2183 = vmatprep.subr.bf16.mxu1 %v8296_v54 }
 0x414   : > { %2184 = vmatpush1.bf16.msra.mxu1 %v8294_v55 }
 0x415   : > { %2185 = vmatprep.subr.bf16.mxu1 %v8299_v56 }
 0x418   : > { %2186 = vmatpush1.bf16.msra.mxu1 %v8297_v57 }
 0x419   : > { %2187 = vmatprep.subr.bf16.mxu1 %v8302_v61 }
 0x41c   : > { %2188 = vmatpush1.bf16.msra.mxu1 %v8300_v63  ;;  %v8353_v63 = vld [vmem:[%s11340_s28 + $0x4] ss:$8 sps:$4 sm:$0xff]  }
 0x41d   : > { %2198 = vmatprep.subr.bf16.mxu1 %v8305_v0  ;;  %v8356_v0 = vld [vmem:[%s11340_s28 + $0x14] ss:$8 sps:$4 sm:$0xff]  }
 0x41f   : > { %2190 = vmatmul.mubr.bf16.vlgmr.msra.gmra.mrb[28].mxu1 %v1621_v10  ;;  %v8360_v10 = vld [vmem:[%s11340_s28 + $0x30] ss:$8 sps:$4 sm:$0xff]  }
 0x420   : > { %2199 = vmatpush1.bf16.msra.mxu1 %v8303_v8  ;;  %2230 = vmatprep.mubr.bf16.mxu1 %v1624_v9  ;;  %v8357_v8 = vld [vmem:[%s11340_s28 + $0x20] ss:$8 sps:$4 sm:$0xff]   ;;  %v8362_v9 = vld [vmem:[%s11340_s28 + $0x34] ss:$8 sps:$4 sm:$0xff]  }
 0x421   : > { %2200 = vmatprep.subr.bf16.mxu1 %v8308_v11  ;;  %v8365_v11 = vld [vmem:[%s11340_s28 + $0x44] ss:$8 sps:$4 sm:$0xff]  }
 0x424   : > { %2201 = vmatpush1.bf16.msra.mxu1 %v8306_v12  ;;  %v8363_v12 = vld [vmem:[%s11340_s28 + $0x40] ss:$8 sps:$4 sm:$0xff]  }
 0x425   : > { %2202 = vmatprep.subr.bf16.mxu1 %v8311_v14  ;;  %v8368_v14 = vld [vmem:[%s11340_s28 + $0x54] ss:$8 sps:$4 sm:$0xff]  }
 0x428   : > { %2203 = vmatpush1.bf16.msra.mxu1 %v8309_v16  ;;  %v8366_v16 = vld [vmem:[%s11340_s28 + $0x50] ss:$8 sps:$4 sm:$0xff]  }
 0x429   : > { %2204 = vmatprep.subr.bf16.mxu1 %v8314_v17  ;;  %v8371_v17 = vld [vmem:[%s11340_s28 + $0x64] ss:$8 sps:$4 sm:$0xff]  }
 0x42c   : > { %2205 = vmatpush1.bf16.msra.mxu1 %v8312_v18  ;;  %v8369_v18 = vld [vmem:[%s11340_s28 + $0x60] ss:$8 sps:$4 sm:$0xff]  }
 0x42d   : > { %2206 = vmatprep.subr.bf16.mxu1 %v8317_v20  ;;  %v8374_v20 = vld [vmem:[%s11340_s28 + $0x74] ss:$8 sps:$4 sm:$0xff]  }
 0x430   : > { %2207 = vmatpush1.bf16.msra.mxu1 %v8315_v25  ;;  %v8372_v25 = vld [vmem:[%s11340_s28 + $0x70] ss:$8 sps:$4 sm:$0xff]  }
 0x431   : > { %2208 = vmatprep.subr.bf16.mxu1 %v8320_v15  ;;  %v8377_v15 = vld [vmem:[%s11340_s28 + $0x84] ss:$8 sps:$4 sm:$0xff]  }
 0x434   : > { %2209 = vmatpush1.bf16.msra.mxu1 %v8318_v26  ;;  %v8375_v26 = vld [vmem:[%s11340_s28 + $0x80] ss:$8 sps:$4 sm:$0xff]  }
 0x435   : > { %2210 = vmatprep.subr.bf16.mxu1 %v8323_v24  ;;  %v8380_v24 = vld [vmem:[%s11340_s28 + $0x94] ss:$8 sps:$4 sm:$0xff]  }
 0x438   : > { %2211 = vmatpush1.bf16.msra.mxu1 %v8321_v27  ;;  %v8378_v27 = vld [vmem:[%s11340_s28 + $0x90] ss:$8 sps:$4 sm:$0xff]  }
 0x439   : > { %2212 = vmatprep.subr.bf16.mxu1 %v8326_v28  ;;  %v8383_v28 = vld [vmem:[%s11340_s28 + $0xa4] ss:$8 sps:$4 sm:$0xff]  }
 0x43c   : > { %2213 = vmatpush1.bf16.msra.mxu1 %v8324_v29  ;;  %v8381_v29 = vld [vmem:[%s11340_s28 + $0xa0] ss:$8 sps:$4 sm:$0xff]  }
 0x43d   : > { %2214 = vmatprep.subr.bf16.mxu1 %v8329_v30  ;;  %v8386_v30 = vld [vmem:[%s11340_s28 + $0xb4] ss:$8 sps:$4 sm:$0xff]  }
 0x440   : > { %2215 = vmatpush1.bf16.msra.mxu1 %v8327_v31  ;;  %v8384_v31 = vld [vmem:[%s11340_s28 + $0xb0] ss:$8 sps:$4 sm:$0xff]  }
 0x441   : > { %2216 = vmatprep.subr.bf16.mxu1 %v8332_v32  ;;  %v8389_v32 = vld [vmem:[%s11340_s28 + $0xc4] ss:$8 sps:$4 sm:$0xff]  }
 0x444   : > { %2217 = vmatpush1.bf16.msra.mxu1 %v8330_v33  ;;  %v8387_v33 = vld [vmem:[%s11340_s28 + $0xc0] ss:$8 sps:$4 sm:$0xff]  }
 0x445   : > { %2218 = vmatprep.subr.bf16.mxu1 %v8335_v34  ;;  %v8392_v34 = vld [vmem:[%s11340_s28 + $0xd4] ss:$8 sps:$4 sm:$0xff]  }
 0x448   : > { %2219 = vmatpush1.bf16.msra.mxu1 %v8333_v35  ;;  %v8390_v35 = vld [vmem:[%s11340_s28 + $0xd0] ss:$8 sps:$4 sm:$0xff]  }
 0x449   : > { %2220 = vmatprep.subr.bf16.mxu1 %v8338_v36  ;;  %v8395_v36 = vld [vmem:[%s11340_s28 + $0xe4] ss:$8 sps:$4 sm:$0xff]  }
 0x44c   : > { %2221 = vmatpush1.bf16.msra.mxu1 %v8336_v37  ;;  %v8393_v37 = vld [vmem:[%s11340_s28 + $0xe0] ss:$8 sps:$4 sm:$0xff]  }
 0x44d   : > { %2222 = vmatprep.subr.bf16.mxu1 %v8341_v39  ;;  %v8398_v39 = vld [vmem:[%s11340_s28 + $0xf4] ss:$8 sps:$4 sm:$0xff]  }
 0x450   : > { %2223 = vmatpush1.bf16.msra.mxu1 %v8339_v40  ;;  %v8396_v40 = vld [vmem:[%s11340_s28 + $0xf0] ss:$8 sps:$4 sm:$0xff]  }
 0x451   : > { %2224 = vmatprep.subr.bf16.mxu1 %v8344_v41  ;;  %v8401_v41 = vld [vmem:[%s11340_s28 + $0x104] ss:$8 sps:$4 sm:$0xff]  }
 0x454   : > { %2225 = vmatpush1.bf16.msra.mxu1 %v8342_v42 }
 0x455   : > { %2226 = vmatprep.subr.bf16.mxu1 %v8347_v43 }
 0x458   : > { %2227 = vmatpush1.bf16.msra.mxu1 %v8345_v44 }
 0x459   : > { %2228 = vmatprep.subr.bf16.mxu1 %v8350_v45 }
 0x45c   : > { %2229 = vmatpush1.bf16.msra.mxu1 %v8348_v46 }
 0x45f   : > { %2231 = vmatmul.mubr.bf16.vlgmr.msra.gmra.mrb[28].mxu1 %v1623_v47 }
 0x460   : > { %3303 = vmatprep.mubr.bf16.mxu1 %v8991_v23 }
 0x532   : > { %v2232_v51 = vpop.f32.mrb[28].mxu1 }
 0x533   : > { %v7988_v52 = vadd.f32 %v2232_v51, %v1629_v49  ;;  %v2234_v53 = vpop.f32.mrb[29].mxu1 }
 0x534   : > { %v7989_v54 = vadd.f32 %v2234_v53, %v1633_v50  ;;  %v2236_v55 = vpop.f32.mrb[30].mxu1 }
 0x535   : > { %v2239_v56 = vmax.f32 %v7988_v52, 0.0  ;;  %v2237_v57 = vpop.f32.mrb[31].mxu1 }
 0x536   : > { %v2240_v59 = vmax.f32 %v7989_v54, 0.0 }
 0x537   : > { %v2241_v38 = vpack.c.bf16 %v2239_v56, %v2239_v56 }
 0x538   : > { %v2242_v61 = vpack.c.bf16 %v2240_v59, %v2240_v59 }
 0x539   : > { %v2345_v62 = vsel %vm2343_vm13, %v2241_v38, 0 }
 0x53a   : > { %7301 = vmatprep.subr.msk.bf16.mxu0 %vm2343_vm13, %v2242_v61 }
 0x53b   : > { %2351 = vmatpush1.bf16.msra.mxu0 %v2345_v62 }
 0x53c   : > { %7303 = vmatprep.subr.msk.bf16.mxu0 %vm2343_vm13, %v2242_v61 }
 0x53e   : > { %7302 = vmatmul.mubr.msk.bf16.vlgmr.msra.gmra.mrb[8].mxu0 %vm2340_vm14, %v9389_v21  ;;  %v8351_v21 = vld [vmem:[%s11340_s28] ss:$8 sps:$4 sm:$0xff]  }
 0x53f   : > { %2394 = vmatpush1.bf16.msra.mxu0 %v2345_v62  ;;  %2425 = vmatprep.mubr.bf16.mxu0 %v8991_v23 }
 0x540   : > { %7305 = vmatprep.subr.msk.bf16.mxu0 %vm2343_vm13, %v2242_v61 }
 0x546   : > { %7304 = vmatmul.mubr.msk.bf16.vlgmr.msra.gmra.mrb[12].mxu0 %vm2340_vm14, %v9396_v22 }
 0x547   : > { %2437 = vmatpush1.bf16.msra.mxu0 %v2345_v62  ;;  %2468 = vmatprep.mubr.bf16.mxu0 %v8991_v23 }
 0x548   : > { %7307 = vmatprep.subr.msk.bf16.mxu0 %vm2343_vm13, %v2242_v61 }
 0x54e   : > { %7306 = vmatmul.mubr.msk.bf16.vlgmr.msra.gmra.mrb[16].mxu0 %vm2340_vm14, %v9403_v13 }
 0x54f   : > { %2480 = vmatpush1.bf16.msra.mxu0 %v2345_v62  ;;  %2511 = vmatprep.mubr.bf16.mxu0 %v8991_v23 }
 0x550   : > { %3037 = vmatprep.subr.bf16.mxu0 %v8353_v63 }
 0x556   : > { %7308 = vmatmul.mubr.msk.bf16.vlgmr.msra.gmra.mrb[20].mxu0 %vm2340_vm14, %v9410_v19 }
 0x557   : > { %3038 = vmatpush1.bf16.msra.mxu0 %v8351_v21  ;;  %v8399_v21 = vld [vmem:[%s11340_s28 + $0x100] ss:$8 sps:$4 sm:$0xff]  }
 0x558   : > { %3039 = vmatprep.subr.bf16.mxu0 %v8356_v0  ;;  %v8404_v0 = vld [vmem:[%s11340_s28 + $0x114] ss:$8 sps:$4 sm:$0xff]  }
 0x55b   : > { %3040 = vmatpush1.bf16.msra.mxu0 %v8354_v6 }
 0x55c   : > { %3041 = vmatprep.subr.bf16.mxu0 %v8359_v7  ;;  %v8402_v7 = vld [vmem:[%s11340_s28 + $0x110] ss:$8 sps:$4 sm:$0xff]  }
 0x55f   : > { %3042 = vmatpush1.bf16.msra.mxu0 %v8357_v8  ;;  %v8407_v8 = vld [vmem:[%s11340_s28 + $0x124] ss:$8 sps:$4 sm:$0xff]  }
 0x560   : > { %3043 = vmatprep.subr.bf16.mxu0 %v8362_v9  ;;  %v8405_v9 = vld [vmem:[%s11340_s28 + $0x120] ss:$8 sps:$4 sm:$0xff]  }
 0x563   : > { %3044 = vmatpush1.bf16.msra.mxu0 %v8360_v10  ;;  %v8410_v10 = vld [vmem:[%s11340_s28 + $0x134] ss:$8 sps:$4 sm:$0xff]  }
 0x564   : > { %3045 = vmatprep.subr.bf16.mxu0 %v8365_v11  ;;  %v8408_v11 = vld [vmem:[%s11340_s28 + $0x130] ss:$8 sps:$4 sm:$0xff]  }
 0x567   : > { %3046 = vmatpush1.bf16.msra.mxu0 %v8363_v12  ;;  %v8413_v12 = vld [vmem:[%s11340_s28 + $0x144] ss:$8 sps:$4 sm:$0xff]  }
 0x568   : > { %3047 = vmatprep.subr.bf16.mxu0 %v8368_v14  ;;  %v8411_v14 = vld [vmem:[%s11340_s28 + $0x140] ss:$8 sps:$4 sm:$0xff]  }
 0x56b   : > { %3048 = vmatpush1.bf16.msra.mxu0 %v8366_v16 }
 0x56c   : > { %3049 = vmatprep.subr.bf16.mxu0 %v8371_v17  ;;  %v8416_v17 = vld [vmem:[%s11340_s28 + $0x154] ss:$8 sps:$4 sm:$0xff]  }
 0x56f   : > { %3050 = vmatpush1.bf16.msra.mxu0 %v8369_v18 }
 0x570   : > { %3051 = vmatprep.subr.bf16.mxu0 %v8374_v20 }
 0x573   : > { %3052 = vmatpush1.bf16.msra.mxu0 %v8372_v25  ;;  %v8414_v25 = vld [vmem:[%s11340_s28 + $0x150] ss:$8 sps:$4 sm:$0xff]  }
 0x574   : > { %3053 = vmatprep.subr.bf16.mxu0 %v8377_v15  ;;  %v8419_v15 = vld [vmem:[%s11340_s28 + $0x164] ss:$8 sps:$4 sm:$0xff]  }
 0x577   : > { %3054 = vmatpush1.bf16.msra.mxu0 %v8375_v26  ;;  %v8417_v26 = vld [vmem:[%s11340_s28 + $0x160] ss:$8 sps:$4 sm:$0xff]  }
 0x578   : > { %3055 = vmatprep.subr.bf16.mxu0 %v8380_v24  ;;  %v8422_v24 = vld [vmem:[%s11340_s28 + $0x174] ss:$8 sps:$4 sm:$0xff]  }
 0x57b   : > { %3056 = vmatpush1.bf16.msra.mxu0 %v8378_v27  ;;  %v8420_v27 = vld [vmem:[%s11340_s28 + $0x170] ss:$8 sps:$4 sm:$0xff]  }
 0x57c   : > { %3057 = vmatprep.subr.bf16.mxu0 %v8383_v28  ;;  %v8425_v28 = vld [vmem:[%s11340_s28 + $0x184] ss:$8 sps:$4 sm:$0xff]  }
 0x57f   : > { %3058 = vmatpush1.bf16.msra.mxu0 %v8381_v29  ;;  %v8423_v29 = vld [vmem:[%s11340_s28 + $0x180] ss:$8 sps:$4 sm:$0xff]  }
 0x580   : > { %3059 = vmatprep.subr.bf16.mxu0 %v8386_v30  ;;  %v8428_v30 = vld [vmem:[%s11340_s28 + $0x194] ss:$8 sps:$4 sm:$0xff]  }
 0x583   : > { %3060 = vmatpush1.bf16.msra.mxu0 %v8384_v31  ;;  %v8426_v31 = vld [vmem:[%s11340_s28 + $0x190] ss:$8 sps:$4 sm:$0xff]  }
 0x584   : > { %3061 = vmatprep.subr.bf16.mxu0 %v8389_v32  ;;  %v8431_v32 = vld [vmem:[%s11340_s28 + $0x1a4] ss:$8 sps:$4 sm:$0xff]  }
 0x587   : > { %3062 = vmatpush1.bf16.msra.mxu0 %v8387_v33  ;;  %v8429_v33 = vld [vmem:[%s11340_s28 + $0x1a0] ss:$8 sps:$4 sm:$0xff]  }
 0x588   : > { %3063 = vmatprep.subr.bf16.mxu0 %v8392_v34  ;;  %v8434_v34 = vld [vmem:[%s11340_s28 + $0x1b4] ss:$8 sps:$4 sm:$0xff]  }
 0x58b   : > { %3064 = vmatpush1.bf16.msra.mxu0 %v8390_v35  ;;  %v8432_v35 = vld [vmem:[%s11340_s28 + $0x1b0] ss:$8 sps:$4 sm:$0xff]  }
 0x58c   : > { %3065 = vmatprep.subr.bf16.mxu0 %v8395_v36  ;;  %v8437_v36 = vld [vmem:[%s11340_s28 + $0x1c4] ss:$8 sps:$4 sm:$0xff]  }
 0x58f   : > { %3066 = vmatpush1.bf16.msra.mxu0 %v8393_v37  ;;  %v8435_v37 = vld [vmem:[%s11340_s28 + $0x1c0] ss:$8 sps:$4 sm:$0xff]  }
 0x590   : > { %3067 = vmatprep.subr.bf16.mxu0 %v8398_v39  ;;  %v8440_v39 = vld [vmem:[%s11340_s28 + $0x1d4] ss:$8 sps:$4 sm:$0xff]  }
 0x593   : > { %3068 = vmatpush1.bf16.msra.mxu0 %v8396_v40  ;;  %v8438_v40 = vld [vmem:[%s11340_s28 + $0x1d0] ss:$8 sps:$4 sm:$0xff]  }
 0x594   : > { %3078 = vmatprep.subr.bf16.mxu0 %v8401_v41  ;;  %v8443_v41 = vld [vmem:[%s11340_s28 + $0x1e4] ss:$8 sps:$4 sm:$0xff]  }
 0x611   : > { %v2384_v42 = vpop.f32.mrb[8].mxu0 }
 0x612   : > { %v2386_v43 = vpop.f32.mrb[9].mxu0  ;;  %v2540_v63 = vpack.c.bf16 %v2384_v42, %v2384_v42  ;;  %v8441_v42 = vld [vmem:[%s11340_s28 + $0x1e0] ss:$8 sps:$4 sm:$0xff]  }
 0x613   : > { %v2388_v44 = vpop.f32.mrb[10].mxu0 }
 0x614   : > { %v2389_v45 = vpop.f32.mrb[11].mxu0  ;;  %v8446_v44 = vld [vmem:[%s11340_s28 + $0x1f4] ss:$8 sps:$4 sm:$0xff]  }
 0x619   : > { %v2427_v46 = vpop.f32.mrb[12].mxu0 }
 0x61a   : > { %2522 = vrot.lane.b32.xlu0 %v2427_v46, %s11338_s1  ;;  %v2429_v47 = vpop.f32.mrb[13].mxu0  ;;  %v8444_v46 = vld [vmem:[%s11340_s28 + $0x1f0] ss:$8 sps:$4 sm:$0xff]  }
 0x61b   : > { %2524 = vrot.lane.b32.xlu1 %v2429_v47, %s11338_s1  ;;  %v2431_v48 = vpop.f32.mrb[14].mxu0  ;;  %v8449_v47 = vld [vmem:[%s11340_s28 + $0x204] ss:$8 sps:$4 sm:$0xff]  }
 0x61c   : > { %v2432_v49 = vpop.f32.mrb[15].mxu0 }
 0x621   : > { %v2470_v50 = vpop.f32.mrb[16].mxu0 }
 0x622   : > { %v2472_v51 = vpop.f32.mrb[17].mxu0  ;;  %v2543_v6 = vpack.c.bf16 %v2470_v50, %v2470_v50  ;;  %v8447_v50 = vld [vmem:[%s11340_s28 + $0x200] ss:$8 sps:$4 sm:$0xff]  }
 0x623   : > { %v2474_v52 = vpop.f32.mrb[18].mxu0 }
 0x624   : > { %v2475_v53 = vpop.f32.mrb[19].mxu0 }
 0x625   : > { %v8452_v53 = vld [vmem:[%s11340_s28 + $0x214] ss:$8 sps:$4 sm:$0xff]  }
 0x629   : > { %v2513_v54 = vpop.f32.mrb[20].mxu0 }
 0x62a   : > { %v2515_v55 = vpop.f32.mrb[21].mxu0 }
 0x62b   : > { %v8113_v56 = vpack.i.bf16 %v2515_v55, %v2513_v54  ;;  %v2517_v57 = vpop.f32.mrb[22].mxu0  ;;  %v8450_v54 = vld [vmem:[%s11340_s28 + $0x210] ss:$8 sps:$4 sm:$0xff]   ;;  %v8455_v55 = vld [vmem:[%s11340_s28 + $0x224] ss:$8 sps:$4 sm:$0xff]  }
 0x62c   : > { %v2518_v59 = vpop.f32.mrb[23].mxu0  ;;  %v8458_v57 = vld [vmem:[%s11340_s28 + $0x234] ss:$8 sps:$4 sm:$0xff]  }
 0x62d   : > { %8114 = vrot.lane.b32.xlu0 %v8113_v56, %s11338_s1  ;;  %v8453_v56 = vld [vmem:[%s11340_s28 + $0x220] ss:$8 sps:$4 sm:$0xff]   ;;  %v8456_v59 = vld [vmem:[%s11340_s28 + $0x230] ss:$8 sps:$4 sm:$0xff]  }
 0x68c   : > { %v9841_v38 = vpop.permute.xlu0 %2522 }
 0x68d   : > { %v2538_v61 = vsel %vm970_vm11, %v2386_v43, %v9841_v38  ;;  %v2525_v45 = vpop.permute.xlu1 %2524 }
 0x68e   : > { %v2541_v62 = vpack.c.bf16 %v2538_v61, %v2538_v61  ;;  %v2526_v49 = vsel %vm970_vm11, %v9841_v38, %v2525_v45  ;;  %v8461_v38 = vld [vmem:[%s11340_s28 + $0x244] ss:$8 sps:$4 sm:$0xff]   ;;  %v8459_v61 = vld [vmem:[%s11340_s28 + $0x240] ss:$8 sps:$4 sm:$0xff]   ;;  %v3398_v45 = vadd.s32 3, %v9168_v4 }
 0x68f   : > { %v2542_v52 = vpack.c.bf16 %v2526_v49, %v2526_v49  ;;  %v8496_v4 = vld [vmem:[%s11289_s7] sm:$0xff]  }
 0x690   : > { %3069 = vmatprep.mubr.bf16.mxu0 %v2541_v62  ;;  %v8464_v62 = vld [vmem:[%s11340_s28 + $0x254] ss:$8 sps:$4 sm:$0xff]   ;;  %vm3399_vm2 = vcmp.eq.s32.totalorder %v9173_v5, %v3398_v45  ;;  %v8507_v49 = vld [vmem:[%s11289_s7 + $0x140] sm:$0xff]  }
 0x691   : > { %3070 = vmatmul.mubr.bf16.vlgmr.msra.gmra.mrb[24].mxu0 %v2540_v63  ;;  %v8467_v63 = vld [vmem:[%s11340_s28 + $0x264] ss:$8 sps:$4 sm:$0xff]  }
 0x692   : > { %3079 = vmatpush1.bf16.msra.mxu0 %v8399_v21  ;;  %3110 = vmatprep.mubr.bf16.mxu0 %v2543_v6  ;;  %v8462_v21 = vld [vmem:[%s11340_s28 + $0x250] ss:$8 sps:$4 sm:$0xff]   ;;  %v8470_v6 = vld [vmem:[%s11340_s28 + $0x274] ss:$8 sps:$4 sm:$0xff]  }
 0x693   : > { %3080 = vmatprep.subr.bf16.mxu0 %v8404_v0  ;;  %v8465_v0 = vld [vmem:[%s11340_s28 + $0x260] ss:$8 sps:$4 sm:$0xff]  }
 0x696   : > { %3081 = vmatpush1.bf16.msra.mxu0 %v8402_v7  ;;  %v8468_v7 = vld [vmem:[%s11340_s28 + $0x270] ss:$8 sps:$4 sm:$0xff]  }
 0x697   : > { %3082 = vmatprep.subr.bf16.mxu0 %v8407_v8  ;;  %v8473_v8 = vld [vmem:[%s11340_s28 + $0x284] ss:$8 sps:$4 sm:$0xff]  }
 0x69a   : > { %3083 = vmatpush1.bf16.msra.mxu0 %v8405_v9  ;;  %v8471_v9 = vld [vmem:[%s11340_s28 + $0x280] ss:$8 sps:$4 sm:$0xff]  }
 0x69b   : > { %3084 = vmatprep.subr.bf16.mxu0 %v8410_v10  ;;  %v8476_v10 = vld [vmem:[%s11340_s28 + $0x294] ss:$8 sps:$4 sm:$0xff]  }
 0x69e   : > { %3085 = vmatpush1.bf16.msra.mxu0 %v8408_v11  ;;  %v8474_v11 = vld [vmem:[%s11340_s28 + $0x290] ss:$8 sps:$4 sm:$0xff]  }
 0x69f   : > { %v8115_v16 = vpop.permute.xlu0 %8114  ;;  %3086 = vmatprep.subr.bf16.mxu0 %v8413_v12  ;;  %v8479_v12 = vld [vmem:[%s11340_s28 + $0x2a4] ss:$8 sps:$4 sm:$0xff]  }
 0x6a0   : > { %v8116_v18 = vunpack.i.l.bf16 %v8115_v16  ;;  %v8117_v43 = vunpack.i.h.bf16 %v8115_v16  ;;  %v8482_v16 = vld [vmem:[%s11340_s28 + $0x2b4] ss:$8 sps:$4 sm:$0xff]  }
 0x6a2   : > { %v9876_v20 = vsel %vm970_vm11, %v2472_v51, %v8116_v18  ;;  %3087 = vmatpush1.bf16.msra.mxu0 %v8411_v14  ;;  %v2535_v48 = vsel %vm970_vm11, %v8116_v18, %v8117_v43  ;;  %v8477_v14 = vld [vmem:[%s11340_s28 + $0x2a0] ss:$8 sps:$4 sm:$0xff]   ;;  %v8485_v18 = vld [vmem:[%s11340_s28 + $0x2c4] ss:$8 sps:$4 sm:$0xff]  }
 0x6a3   : > { %3088 = vmatprep.subr.bf16.mxu0 %v8416_v17  ;;  %v2545_v51 = vpack.c.bf16 %v2535_v48, %v2535_v48  ;;  %v8480_v17 = vld [vmem:[%s11340_s28 + $0x2b0] ss:$8 sps:$4 sm:$0xff]  }
 0x6a4   : > { %v8499_v48 = vld [vmem:[%s11289_s7 + $0x50] sm:$0xff]  }
 0x6a6   : > { %3089 = vmatpush1.bf16.msra.mxu0 %v8414_v25  ;;  %v8483_v25 = vld [vmem:[%s11340_s28 + $0x2c0] ss:$8 sps:$4 sm:$0xff]  }
 0x6a7   : > { %3090 = vmatprep.subr.bf16.mxu0 %v8419_v15  ;;  %v8488_v15 = vld [vmem:[%s11340_s28 + $0x2d4] ss:$8 sps:$4 sm:$0xff]  }
 0x6aa   : > { %3091 = vmatpush1.bf16.msra.mxu0 %v8417_v26  ;;  %v8486_v26 = vld [vmem:[%s11340_s28 + $0x2d0] ss:$8 sps:$4 sm:$0xff]  }
 0x6ab   : > { %3092 = vmatprep.subr.bf16.mxu0 %v8422_v24  ;;  %v8491_v24 = vld [vmem:[%s11340_s28 + $0x2e4] ss:$8 sps:$4 sm:$0xff]  }
 0x6ae   : > { %3093 = vmatpush1.bf16.msra.mxu0 %v8420_v27  ;;  %v8489_v27 = vld [vmem:[%s11340_s28 + $0x2e0] ss:$8 sps:$4 sm:$0xff]  }
 0x6af   : > { %3094 = vmatprep.subr.bf16.mxu0 %v8425_v28  ;;  %v8494_v28 = vld [vmem:[%s11340_s28 + $0x2f4] ss:$8 sps:$4 sm:$0xff]  }
 0x6b2   : > { %3095 = vmatpush1.bf16.msra.mxu0 %v8423_v29  ;;  %v8492_v29 = vld [vmem:[%s11340_s28 + $0x2f0] ss:$8 sps:$4 sm:$0xff]  }
 0x6b3   : > { %3096 = vmatprep.subr.bf16.mxu0 %v8428_v30  ;;  %v2544_v30 = vpack.c.bf16 %v9876_v20, %v9876_v20 }
 0x6b6   : > { %3097 = vmatpush1.bf16.msra.mxu0 %v8426_v31  ;;  %v2339_v31 = vld [vmem:[%s11341_s6] sm:$0x3]  ;;  %s11236_s6 = scalar_lea.hbm %s11302_s20, %s7749_s2 }
 0x6b7   : > { %3098 = vmatprep.subr.bf16.mxu0 %v8431_v32  ;;  %v2550_v32 = vrot.slane %v2339_v31, %v9377_v58 }
 0x6ba   : > { %3099 = vmatpush1.bf16.msra.mxu0 %v8429_v33  ;;  %v2554_v33 = vrot.slane %v2339_v31, %v9383_v60 }
 0x6bb   : > { %3100 = vmatprep.subr.bf16.mxu0 %v8434_v34 }
 0x6be   : > { %3101 = vmatpush1.bf16.msra.mxu0 %v8432_v35 }
 0x6bf   : > { %3102 = vmatprep.subr.bf16.mxu0 %v8437_v36 }
 0x6c2   : > { %3103 = vmatpush1.bf16.msra.mxu0 %v8435_v37 }
 0x6c3   : > { %3104 = vmatprep.subr.bf16.mxu0 %v8440_v39 }
 0x6c6   : > { %3105 = vmatpush1.bf16.msra.mxu0 %v8438_v40 }
 0x6c7   : > { %3106 = vmatprep.subr.bf16.mxu0 %v8443_v41 }
 0x6ca   : > { %3107 = vmatpush1.bf16.msra.mxu0 %v8441_v42 }
 0x6cb   : > { %3108 = vmatprep.subr.bf16.mxu0 %v8446_v44 }
 0x6ce   : > { %3109 = vmatpush1.bf16.msra.mxu0 %v8444_v46 }
 0x6cf   : > { %3119 = vmatprep.subr.bf16.mxu0 %v8449_v47  ;;  %v8498_v47 = vld [vmem:[%s11289_s7 + $0x8] sm:$0xff]  }
 0x6d1   : > { %3111 = vmatmul.mubr.bf16.vlgmr.msra.gmra.mrb[24].mxu0 %v2542_v52  ;;  %v8500_v52 = vld [vmem:[%s11289_s7 + $0x10] sm:$0xff]  }
 0x6d2   : > { %3120 = vmatpush1.bf16.msra.mxu0 %v8447_v50  ;;  %3151 = vmatprep.mubr.bf16.mxu0 %v2545_v51  ;;  %v8508_v50 = vld [vmem:[%s11289_s7 + $0x100] sm:$0xff]   ;;  %v8511_v51 = vld [vmem:[%s11289_s7 + $0x148] sm:$0xff]  }
 0x6d3   : > { %3121 = vmatprep.subr.bf16.mxu0 %v8452_v53  ;;  %v8512_v53 = vld [vmem:[%s11289_s7 + $0x108] sm:$0xff]  }
 0x6d6   : > { %3122 = vmatpush1.bf16.msra.mxu0 %v8450_v54  ;;  %v8501_v54 = vld [vmem:[%s11289_s7 + $0x58] sm:$0xff]  }
 0x6d7   : > { %3123 = vmatprep.subr.bf16.mxu0 %v8455_v55  ;;  %v8502_v55 = vld [vmem:[%s11289_s7 + $0x18] sm:$0xff]  }
 0x6da   : > { %3124 = vmatpush1.bf16.msra.mxu0 %v8453_v56  ;;  %v8503_v56 = vld [vmem:[%s11289_s7 + $0x60] sm:$0xff]  }
 0x6db   : > { %3125 = vmatprep.subr.bf16.mxu0 %v8458_v57  ;;  %v8504_v57 = vld [vmem:[%s11289_s7 + $0x20] sm:$0xff]  }
 0x6de   : > { %3126 = vmatpush1.bf16.msra.mxu0 %v8456_v59  ;;  %v8505_v59 = vld [vmem:[%s11289_s7 + $0x68] sm:$0xff]  }
 0x6df   : > { %3127 = vmatprep.subr.bf16.mxu0 %v8461_v38  ;;  %v8506_v38 = vld [vmem:[%s11289_s7 + $0x28] sm:$0xff]  }
 0x6e2   : > { %3128 = vmatpush1.bf16.msra.mxu0 %v8459_v61  ;;  %v8509_v61 = vld [vmem:[%s11289_s7 + $0x70] sm:$0xff]  }
 0x6e3   : > { %3129 = vmatprep.subr.bf16.mxu0 %v8464_v62  ;;  %v8510_v62 = vld [vmem:[%s11289_s7 + $0x30] sm:$0xff]  }
 0x6e6   : > { %3130 = vmatpush1.bf16.msra.mxu0 %v8462_v21  ;;  %v8513_v21 = vld [vmem:[%s11289_s7 + $0x78] sm:$0xff]  }
 0x6e7   : > { %3131 = vmatprep.subr.bf16.mxu0 %v8467_v63  ;;  %v8514_v63 = vld [vmem:[%s11289_s7 + $0x38] sm:$0xff]  }
 0x6ea   : > { %3132 = vmatpush1.bf16.msra.mxu0 %v8465_v0  ;;  %v8515_v0 = vld [vmem:[%s11289_s7 + $0x150] sm:$0xff]  }
 0x6eb   : > { %3133 = vmatprep.subr.bf16.mxu0 %v8470_v6  ;;  %v8516_v6 = vld [vmem:[%s11289_s7 + $0x110] sm:$0xff]  }
 0x6ee   : > { %3134 = vmatpush1.bf16.msra.mxu0 %v8468_v7  ;;  %v8517_v7 = vld [vmem:[%s11289_s7 + $0xc0] sm:$0xff]  }
 0x6ef   : > { %3135 = vmatprep.subr.bf16.mxu0 %v8473_v8  ;;  %v8519_v8 = vld [vmem:[%s11289_s7 + $0x158] sm:$0xff]  }
 0x6f2   : > { %3136 = vmatpush1.bf16.msra.mxu0 %v8471_v9 }
 0x6f3   : > { %3137 = vmatprep.subr.bf16.mxu0 %v8476_v10  ;;  %v8520_v10 = vld [vmem:[%s11289_s7 + $0x118] sm:$0xff]  }
 0x6f6   : > { %3138 = vmatpush1.bf16.msra.mxu0 %v8474_v11 }
 0x6f7   : > { %3139 = vmatprep.subr.bf16.mxu0 %v8479_v12 }
 0x6fa   : > { %3140 = vmatpush1.bf16.msra.mxu0 %v8477_v14 }
 0x6fb   : > { %3141 = vmatprep.subr.bf16.mxu0 %v8482_v16  ;;  %v8523_v16 = vld [vmem:[%s11289_s7 + $0x160] sm:$0xff]  }
 0x6fe   : > { %3142 = vmatpush1.bf16.msra.mxu0 %v8480_v17  ;;  %v8524_v17 = vld [vmem:[%s11289_s7 + $0x120] sm:$0xff]  }
 0x6ff   : > { %3143 = vmatprep.subr.bf16.mxu0 %v8485_v18  ;;  %v8527_v18 = vld [vmem:[%s11289_s7 + $0x168] sm:$0xff]  }
 0x702   : > { %3144 = vmatpush1.bf16.msra.mxu0 %v8483_v25 }
 0x703   : > { %3145 = vmatprep.subr.bf16.mxu0 %v8488_v15  ;;  %v8528_v15 = vld [vmem:[%s11289_s7 + $0x128] sm:$0xff]  }
 0x706   : > { %3146 = vmatpush1.bf16.msra.mxu0 %v8486_v26 }
 0x707   : > { %3147 = vmatprep.subr.bf16.mxu0 %v8491_v24 }
 0x70a   : > { %3148 = vmatpush1.bf16.msra.mxu0 %v8489_v27 }
 0x70b   : > { %3149 = vmatprep.subr.bf16.mxu0 %v8494_v28  ;;  %v8531_v28 = vld [vmem:[%s11289_s7 + $0x170] sm:$0xff]  }
 0x70e   : > { %3150 = vmatpush1.bf16.msra.mxu0 %v8492_v29  ;;  %v8532_v29 = vld [vmem:[%s11289_s7 + $0x130] sm:$0xff]  }
 0x70f   : > { %7810 = vmatprep.subr.bf16.mxu0 %v8507_v49  ;;  %v8533_v49 = vld [vmem:[%s11289_s7 + $0xe0] sm:$0xff]  }
 0x711   : > { %3152 = vmatmul.mubr.bf16.vlgmr.msra.gmra.mrb[24].mxu0 %v2544_v30  ;;  %v8535_v30 = vld [vmem:[%s11289_s7 + $0x178] sm:$0xff]  }
 0x712   : > { %7811 = vmatpush3.bf16.msra.mxu0 %v8508_v50 }
 0x713   : > { %7812 = vmatprep.subr.bf16.mxu0 %v8511_v51 }
 0x716   : > { %7813 = vmatpush3.bf16.msra.mxu0 %v8512_v53 }
 0x717   : > { %7814 = vmatprep.subr.bf16.mxu0 %v8515_v0  ;;  %v8542_v0 = vld [vmem:[%s11289_s7 + $0xb8] sm:$0xff]  }
 0x71a   : > { %7815 = vmatpush3.bf16.msra.mxu0 %v8516_v6 }
 0x71b   : > { %7816 = vmatprep.subr.bf16.mxu0 %v8519_v8  ;;  %v8543_v8 = vld [vmem:[%s11291_s9] ss:$24 sps:$4 sm:$0xff]  }
 0x71e   : > { %7817 = vmatpush3.bf16.msra.mxu0 %v8520_v10  ;;  %v8548_v10 = vld [vmem:[%s11291_s9 + $0x34] ss:$24 sps:$4 sm:$0xff]  }
 0x71f   : > { %7818 = vmatprep.subr.bf16.mxu0 %v8523_v16  ;;  %v8554_v16 = vld [vmem:[%s11291_s9 + $0xc] ss:$24 sps:$4 sm:$0xff]  }
 0x722   : > { %7819 = vmatpush3.bf16.msra.mxu0 %v8524_v17 }
 0x723   : > { %7820 = vmatprep.subr.bf16.mxu0 %v8527_v18 }
 0x726   : > { %7821 = vmatpush3.bf16.msra.mxu0 %v8528_v15 }
 0x727   : > { %7822 = vmatprep.subr.bf16.mxu0 %v8531_v28 }
 0x72a   : > { %7823 = vmatpush3.bf16.msra.mxu0 %v8532_v29 }
 0x72b   : > { %7824 = vmatprep.subr.bf16.mxu0 %v8535_v30 }
 0x7e4   : > { %v3153_v34 = vpop.f32.mrb[24].mxu0 }
 0x7e5   : > { %v7990_v35 = vadd.f32 %v3153_v34, %v2550_v32  ;;  %v3155_v36 = vpop.f32.mrb[25].mxu0  ;;  %v8536_v32 = vld [vmem:[%s11289_s7 + $0x138] sm:$0xff]  }
 0x7e6   : > { %v7991_v37 = vadd.f32 %v3155_v36, %v2554_v33  ;;  %v3157_v39 = vpop.f32.mrb[26].mxu0  ;;  %7825 = vmatpush3.bf16.msra.mxu0 %v8536_v32 }
 0x7e7   : > { %v3160_v40 = vmax.f32 %v7990_v35, 0.0  ;;  %v3158_v41 = vpop.f32.mrb[27].mxu0 }
 0x7e8   : > { %v3161_v42 = vmax.f32 %v7991_v37, 0.0 }
 0x7e9   : > { %v3162_v43 = vpack.c.bf16 %v3160_v40, %v3160_v40 }
 0x7ea   : > { %v3163_v20 = vpack.c.bf16 %v3161_v42, %v3161_v42 }
 0x7eb   : > { %v3266_v44 = vsel %vm3264_vm15, %v3162_v43, 0 }
 0x7ec   : > { %7405 = vmatprep.subr.msk.bf16.mxu1 %vm3264_vm15, %v3163_v20 }
 0x7ed   : > { %3272 = vmatpush1.bf16.msra.mxu1 %v3266_v44 }
 0x7ee   : > { %7407 = vmatprep.subr.msk.bf16.mxu1 %vm3264_vm15, %v3163_v20 }
 0x7f0   : > { %7406 = vmatmul.mubr.msk.bf16.vlgmr.msra.gmra.mrb[32].mxu1 %vm3261_vm1, %v9396_v22  ;;  %v3400_v22 = vsel %vm3399_vm2, 1.0, %v8986_v1  ;;  %vm4212_vm2 = vmand %vm3264_vm15, %vm4211_vm8 }
 0x7f1   : > { %3315 = vmatpush1.bf16.msra.mxu1 %v3266_v44  ;;  %3346 = vmatprep.mubr.bf16.mxu1 %v8991_v23  ;;  %v3401_v46 = vpack.c.bf16 %v3400_v22, %v3400_v22  ;;  %v8521_v22 = vld [vmem:[%s11289_s7 + $0xc8] sm:$0xff]  }
 0x7f2   : > { %7409 = vmatprep.subr.msk.bf16.mxu1 %vm3264_vm15, %v3163_v20 }
 0x7f8   : > { %7408 = vmatmul.mubr.msk.bf16.vlgmr.msra.gmra.mrb[36].mxu1 %vm3261_vm1, %v9403_v13  ;;  %v8495_v13 = vld [vmem:[%s11289_s7 + $0x40] sm:$0xff]  }
 0x7f9   : > { %3358 = vmatpush1.bf16.msra.mxu1 %v3266_v44  ;;  %3389 = vmatprep.mubr.bf16.mxu1 %v8991_v23 }
 0x7fa   : > { %7411 = vmatprep.subr.msk.bf16.mxu1 %vm3264_vm15, %v3163_v20 }
 0x800   : > { %7410 = vmatmul.mubr.msk.bf16.vlgmr.msra.gmra.mrb[40].mxu1 %vm3261_vm1, %v9410_v19  ;;  %v8497_v19 = vld [vmem:[%s11289_s7 + $0x48] sm:$0xff]  }
 0x801   : > { %3406 = vmatpush1.bf16.msra.mxu1 %v3266_v44  ;;  %3437 = vmatprep.mubr.bf16.mxu1 %v8991_v23  ;;  %v8518_v44 = vld [vmem:[%s11289_s7 + $0x80] sm:$0xff]  }
 0x802   : > { %7766 = vmatprep.subr.bf16.mxu1 %v8495_v13  ;;  %v8522_v13 = vld [vmem:[%s11289_s7 + $0x88] sm:$0xff]  }
 0x808   : > { %7412 = vmatmul.mubr.msk.bf16.vlgmr.msra.gmra.mrb[44].mxu1 %vm3261_vm1, %v3401_v46 }
 0x809   : > { %7767 = vmatpush3.bf16.msra.mxu1 %v8496_v4  ;;  %v8525_v4 = vld [vmem:[%s11289_s7 + $0xd0] sm:$0xff]  }
 0x80a   : > { %7768 = vmatprep.subr.bf16.mxu1 %v8497_v19  ;;  %v8526_v19 = vld [vmem:[%s11289_s7 + $0x90] sm:$0xff]  }
 0x80d   : > { %7769 = vmatpush3.bf16.msra.mxu1 %v8498_v47  ;;  %v8529_v47 = vld [vmem:[%s11289_s7 + $0xd8] sm:$0xff]  }
 0x80e   : > { %7770 = vmatprep.subr.bf16.mxu1 %v8499_v48  ;;  %v8530_v48 = vld [vmem:[%s11289_s7 + $0x98] sm:$0xff]  }
 0x811   : > { %7771 = vmatpush3.bf16.msra.mxu1 %v8500_v52  ;;  %v8534_v52 = vld [vmem:[%s11289_s7 + $0xa0] sm:$0xff]  }
 0x812   : > { %7772 = vmatprep.subr.bf16.mxu1 %v8501_v54  ;;  %v8537_v54 = vld [vmem:[%s11289_s7 + $0xe8] sm:$0xff]  }
 0x815   : > { %7773 = vmatpush3.bf16.msra.mxu1 %v8502_v55 }
 0x816   : > { %7774 = vmatprep.subr.bf16.mxu1 %v8503_v56 }
 0x819   : > { %7775 = vmatpush3.bf16.msra.mxu1 %v8504_v57 }
 0x81a   : > { %7776 = vmatprep.subr.bf16.mxu1 %v8505_v59 }
 0x81d   : > { %7777 = vmatpush3.bf16.msra.mxu1 %v8506_v38  ;;  %v8538_v38 = vld [vmem:[%s11289_s7 + $0xa8] sm:$0xff]  }
 0x81e   : > { %7778 = vmatprep.subr.bf16.mxu1 %v8509_v61  ;;  %v8539_v61 = vld [vmem:[%s11289_s7 + $0xf0] sm:$0xff]  }
 0x821   : > { %7779 = vmatpush3.bf16.msra.mxu1 %v8510_v62  ;;  %v8540_v62 = vld [vmem:[%s11289_s7 + $0xb0] sm:$0xff]  }
 0x822   : > { %7780 = vmatprep.subr.bf16.mxu1 %v8513_v21  ;;  %v8541_v21 = vld [vmem:[%s11289_s7 + $0xf8] sm:$0xff]  }
 0x825   : > { %7781 = vmatpush3.bf16.msra.mxu1 %v8514_v63 }
 0x826   : > { %7788 = vmatprep.subr.bf16.mxu1 %v8517_v7 }
 0x8c3   : > { %v3305_v9 = vpop.f32.mrb[32].mxu1 }
 0x8c4   : > { %v3307_v11 = vpop.f32.mrb[33].mxu1  ;;  %v3466_v45 = vpack.c.bf16 %v3305_v9, %v3305_v9  ;;  %v8545_v9 = vld [vmem:[%s11291_s9 + $0x4] ss:$24 sps:$4 sm:$0xff]  }
 0x8c5   : > { %v3309_v12 = vpop.f32.mrb[34].mxu1 }
 0x8c6   : > { %v3310_v14 = vpop.f32.mrb[35].mxu1  ;;  %v8551_v12 = vld [vmem:[%s11291_s9 + $0x64] ss:$24 sps:$4 sm:$0xff]  }
 0x8c7   : > { %v8549_v14 = vld [vmem:[%s11291_s9 + $0x60] ss:$24 sps:$4 sm:$0xff]  }
 0x8cb   : > { %v3348_v25 = vpop.f32.mrb[36].mxu1 }
 0x8cc   : > { %3448 = vrot.lane.b32.xlu1 %v3348_v25, %s11338_s1  ;;  %v3350_v26 = vpop.f32.mrb[37].mxu1 }
 0x8cd   : > { %v3352_v24 = vpop.f32.mrb[38].mxu1 }
 0x8ce   : > { %v3353_v27 = vpop.f32.mrb[39].mxu1 }
 0x8d3   : > { %v3391_v31 = vpop.f32.mrb[40].mxu1 }
 0x8d4   : > { %v3393_v33 = vpop.f32.mrb[41].mxu1  ;;  %v3469_v46 = vpack.c.bf16 %v3391_v31, %v3391_v31  ;;  %v3260_v31 = vld [vmem:[%s11290_s8] sm:$0x1] }
 0x8d5   : > { %v3395_v34 = vpop.f32.mrb[42].mxu1 }
 0x8d6   : > { %v3396_v35 = vpop.f32.mrb[43].mxu1 }
 0x8db   : > { %v3439_v36 = vpop.f32.mrb[44].mxu1 }
 0x8dc   : > { %v8118_v37 = vpack.i.bf16 %v3439_v36, %v3350_v26  ;;  %v3441_v39 = vpop.f32.mrb[45].mxu1 }
 0x8dd   : > { %3459 = vrot.lane.b32.xlu1 %v3441_v39, %s11338_s1  ;;  %v3443_v40 = vpop.f32.mrb[46].mxu1 }
 0x8de   : > { %8119 = vrot.lane.b32.xlu0 %v8118_v37, %s11338_s1  ;;  %v3444_v41 = vpop.f32.mrb[47].mxu1 }
 0x93e   : > { %v3449_v42 = vpop.permute.xlu1 %3448 }
 0x93f   : > { %v3464_v43 = vsel %vm970_vm11, %v3307_v11, %v3449_v42  ;;  %v8546_v11 = vld [vmem:[%s11291_s9 + $0x30] ss:$24 sps:$4 sm:$0xff]  }
 0x940   : > { %v3467_v20 = vpack.c.bf16 %v3464_v43, %v3464_v43 }
 0x942   : > { %3792 = vmatprep.mubr.bf16.mxu1 %v3467_v20  ;;  %v8557_v20 = vld [vmem:[%s11291_s9 + $0x3c] ss:$24 sps:$4 sm:$0xff]  }
 0x943   : > { %3793 = vmatmul.mubr.bf16.vlgmr.msra.gmra.mrb[48].mxu1 %v3466_v45  ;;  %v8560_v45 = vld [vmem:[%s11291_s9 + $0x6c] ss:$24 sps:$4 sm:$0xff]  }
 0x944   : > { %7789 = vmatpush3.bf16.msra.mxu1 %v8518_v44  ;;  %3832 = vmatprep.mubr.bf16.mxu1 %v3469_v46  ;;  %v8555_v44 = vld [vmem:[%s11291_s9 + $0x38] ss:$24 sps:$4 sm:$0xff]   ;;  %v8563_v46 = vld [vmem:[%s11291_s9 + $0x14] ss:$24 sps:$4 sm:$0xff]  }
 0x945   : > { %7790 = vmatprep.subr.bf16.mxu1 %v8521_v22  ;;  %v8558_v22 = vld [vmem:[%s11291_s9 + $0x68] ss:$24 sps:$4 sm:$0xff]  }
 0x948   : > { %7791 = vmatpush3.bf16.msra.mxu1 %v8522_v13  ;;  %v8561_v13 = vld [vmem:[%s11291_s9 + $0x10] ss:$24 sps:$4 sm:$0xff]  }
 0x949   : > { %7792 = vmatprep.subr.bf16.mxu1 %v8525_v4  ;;  %v8566_v4 = vld [vmem:[%s11291_s9 + $0x44] ss:$24 sps:$4 sm:$0xff]  }
 0x94c   : > { %7793 = vmatpush3.bf16.msra.mxu1 %v8526_v19  ;;  %v8564_v19 = vld [vmem:[%s11291_s9 + $0x40] ss:$24 sps:$4 sm:$0xff]  }
 0x94d   : > { %7794 = vmatprep.subr.bf16.mxu1 %v8529_v47  ;;  %v8569_v47 = vld [vmem:[%s11291_s9 + $0x74] ss:$24 sps:$4 sm:$0xff]  }
 0x94f   : > { %v3460_v51 = vpop.permute.xlu1 %3459 }
 0x950   : > { %7795 = vmatpush3.bf16.msra.mxu1 %v8530_v48  ;;  %v8120_v50 = vpop.permute.xlu0 %8119  ;;  %v8567_v48 = vld [vmem:[%s11291_s9 + $0x70] ss:$24 sps:$4 sm:$0xff]  }
 0x951   : > { %v8122_v53 = vunpack.i.h.bf16 %v8120_v50  ;;  %7796 = vmatprep.subr.bf16.mxu1 %v8533_v49  ;;  %v8121_v63 = vunpack.i.l.bf16 %v8120_v50  ;;  %v3902_v49 = vld [vmem:[%s11292_s10] sm:$0x3f] }
 0x953   : > { %v3465_v55 = vsel %vm970_vm11, %v3393_v33, %v8122_v53  ;;  %v3461_v56 = vsel %vm970_vm11, %v8122_v53, %v3460_v51  ;;  %v3452_v6 = vsel %vm970_vm11, %v3449_v42, %v8121_v63  ;;  %v8552_v42 = vld [vmem:[%s11291_s9 + $0x8] ss:$24 sps:$4 sm:$0xff]   ;;  %v4001_v53 = vrot.slane %v3902_v49, %v9383_v60 }
 0x954   : > { %v3470_v57 = vpack.c.bf16 %v3465_v55, %v3465_v55  ;;  %v3471_v59 = vpack.c.bf16 %v3461_v56, %v3461_v56  ;;  %7797 = vmatpush3.bf16.msra.mxu1 %v8534_v52  ;;  %v3468_v7 = vpack.c.bf16 %v3452_v6, %v3452_v6  ;;  %v4004_v55 = vsub.s32 2, %v9158_v2 }
 0x955   : > { %7798 = vmatprep.subr.bf16.mxu1 %v8537_v54 }
 0x956   : > { %3872 = vmatprep.mubr.bf16.mxu0 %v3471_v59 }
 0x957   : > { %3873 = vmatmul.mubr.bf16.vlgmr.msra.gmra.mrb[28].mxu0 %v3470_v57  ;;  %v4005_v57 = vrot.slane %v3902_v49, %v4004_v55 }
 0x958   : > { %7799 = vmatpush3.bf16.msra.mxu1 %v8538_v38  ;;  %4357 = vmatprep.mubr.bf16.mxu0 %v8991_v23 }
 0x959   : > { %7800 = vmatprep.subr.bf16.mxu1 %v8539_v61 }
 0x95c   : > { %7801 = vmatpush3.bf16.msra.mxu1 %v8540_v62 }
 0x95d   : > { %7802 = vmatprep.subr.bf16.mxu1 %v8541_v21 }
 0x960   : > { %7803 = vmatpush3.bf16.msra.mxu1 %v8542_v0 }
 0x961   : > { %4028 = vmatprep.subr.bf16.mxu1 %v8545_v9  ;;  %v4016_v9 = vsub.s32 5, %v9158_v2 }
 0x963   : > { %3833 = vmatmul.mubr.bf16.vlgmr.msra.gmra.mrb[52].mxu1 %v3468_v7 }
 0x964   : > { %4060 = vmatprep.mubr.bf16.mxu1 %v8991_v23  ;;  %4029 = vmatpush1.bf16.msra.mxu1 %v8543_v8  ;;  %v4012_v8 = vsub.s32 4, %v9158_v2 }
 0x965   : > { %4030 = vmatprep.subr.bf16.mxu1 %v8548_v10 }
 0x968   : > { %4031 = vmatpush1.bf16.msra.mxu1 %v8546_v11 }
 0x969   : > { %4032 = vmatprep.subr.bf16.mxu1 %v8551_v12 }
 0x96c   : > { %4033 = vmatpush1.bf16.msra.mxu1 %v8549_v14  ;;  %v4013_v14 = vrot.slane %v3902_v49, %v4012_v8  ;;  %v8573_v8 = vld [vmem:[%s11293_s11 + $0x10] ss:$8 sps:$4 sm:$0xff]  }
 0x96d   : > { %4069 = vmatprep.subr.bf16.mxu1 %v8554_v16  ;;  %v4017_v16 = vrot.slane %v3902_v49, %v4016_v9  ;;  %v8578_v9 = vld [vmem:[%s11293_s11 + $0x24] ss:$8 sps:$4 sm:$0xff]  }
 0xa16   : > { %v7782_v17 = vpop.f32.mrb[48].mxu1 }
 0xa17   : > { %v7783_v18 = vpop.f32.mrb[49].mxu1 }
 0xa18   : > { %v7784_v25 = vadd.f32 %v7783_v18, %v7782_v17  ;;  %v7785_v15 = vpop.f32.mrb[50].mxu1 }
 0xa19   : > { %v7786_v26 = vpop.f32.mrb[51].mxu1 }
 0xa1a   : > { %v3795_v34 = vadd.f32 %v7784_v25, %v3260_v31 }
 0xa2a   : > { %v7826_v24 = vpop.f32.mrb[28].mxu0 }
 0xa2b   : > { %v7827_v27 = vpop.f32.mrb[29].mxu0 }
 0xa2c   : > { %v7828_v28 = vadd.f32 %v7827_v27, %v7826_v24  ;;  %v7829_v29 = vpop.f32.mrb[30].mxu0 }
 0xa2d   : > { %v7830_v30 = vpop.f32.mrb[31].mxu0 }
 0xa36   : > { %v7804_v32 = vpop.f32.mrb[52].mxu1 }
 0xa37   : > { %v7805_v33 = vpop.f32.mrb[53].mxu1 }
 0xa38   : > { %v7806_v35 = vadd.f32 %v7805_v33, %v7804_v32  ;;  %v7807_v36 = vpop.f32.mrb[54].mxu1 }
 0xa39   : > { %v7808_v37 = vpop.f32.mrb[55].mxu1  ;;  %v4008_v36 = vsub.s32 3, %v9158_v2 }
 0xa3a   : > { %v3835_v39 = vadd.f32 %v7806_v35, %v3795_v34 }
 0xa3b   : > { %v4009_v37 = vrot.slane %v3902_v49, %v4008_v36  ;;  %v8606_v36 = vld [vmem:[%s11293_s11 + $0xc0] ss:$8 sps:$4 sm:$0xff]  }
 0xa3c   : > { %v3875_v40 = vadd.f32 %v7828_v28, %v3835_v39  ;;  %v3997_v39 = vrot.slane %v3902_v49, %v9377_v58  ;;  %v4368_v49 = vadd.s32 1, %v9158_v2 }
 0xa3e   : > { %v3880_v41 = vmax.f32 %v3875_v40, 0.0 }
 0xa40   : > { %v3883_v43 = vpack.c.bf16 %v3880_v41, %v3880_v41  ;;  %3882 = vst.msk [vmem:[%s10251_s21] sm:$0x1] %vm3881_vm3, %v3880_v41  ;;  %vm4369_vm3 = vcmp.eq.s32.totalorder %v9173_v5, %v4368_v49  ;;  %v8654_v49 = vld [vmem:[%s11294_s12 + $0x40] ss:$8 sps:$4 sm:$0xff]  }
 0xa42   : > { %7479 = vmatmul.mubr.msk.bf16.vlgmr.msra.gmra.mrb[56].mxu1 %vm4024_vm4, %v3883_v43 }
 0xa43   : > { %4070 = vmatpush1.bf16.msra.mxu1 %v8552_v42  ;;  %4101 = vmatprep.mubr.bf16.mxu1 %v8991_v23 }
 0xa44   : > { %4071 = vmatprep.subr.bf16.mxu1 %v8557_v20 }
 0xa47   : > { %4072 = vmatpush1.bf16.msra.mxu1 %v8555_v44 }
 0xa48   : > { %4073 = vmatprep.subr.bf16.mxu1 %v8560_v45 }
 0xa4b   : > { %4074 = vmatpush1.bf16.msra.mxu1 %v8558_v22 }
 0xa4c   : > { %4110 = vmatprep.subr.bf16.mxu1 %v8563_v46 }
 0xa4e   : > { %7480 = vmatmul.mubr.msk.bf16.vlgmr.msra.gmra.mrb[60].mxu1 %vm4024_vm4, %v3883_v43 }
 0xa4f   : > { %4111 = vmatpush1.bf16.msra.mxu1 %v8561_v13  ;;  %4142 = vmatprep.mubr.bf16.mxu1 %v8991_v23 }
 0xa50   : > { %4112 = vmatprep.subr.bf16.mxu1 %v8566_v4 }
 0xa53   : > { %4113 = vmatpush1.bf16.msra.mxu1 %v8564_v19 }
 0xa54   : > { %4114 = vmatprep.subr.bf16.mxu1 %v8569_v47 }
 0xa57   : > { %4115 = vmatpush1.bf16.msra.mxu1 %v8567_v48  ;;  %v4312_v48 = vadd.s32 4294967295, %v9158_v2 }
 0xa59   : > { %vm4313_vm9 = vcmp.eq.s32.totalorder %v9173_v5, %v4312_v48  ;;  %v8656_v48 = vld [vmem:[%s11294_s12 + $0x44] ss:$8 sps:$4 sm:$0xff]  }
 0xa5a   : > { %7481 = vmatmul.mubr.msk.bf16.vlgmr.msra.gmra.mrb[64].mxu1 %vm4024_vm4, %v3883_v43 }
 0xa5b   : > { %4407 = vmatprep.mubr.bf16.mxu1 %v8991_v23 }
 0xb15   : > { %v4062_v50 = vpop.f32.mrb[56].mxu1 }
 0xb16   : > { %v4064_v51 = vpop.f32.mrb[57].mxu1  ;;  %v4063_v41 = vadd.f32 %v4062_v50, %v3997_v39  ;;  %v8609_v39 = vld [vmem:[%s11293_s11 + $0xd0] ss:$8 sps:$4 sm:$0xff]  }
 0xb17   : > { %v4066_v52 = vpop.f32.mrb[58].mxu1  ;;  %v4065_v56 = vadd.f32 %v4064_v51, %v4001_v53 }
 0xb18   : > { %v4067_v54 = vpop.f32.mrb[59].mxu1  ;;  %v4151_v43 = vmax.f32 %v4063_v41, 0.0  ;;  %v8612_v41 = vld [vmem:[%s11293_s11 + $0xe0] ss:$8 sps:$4 sm:$0xff]  }
 0xb19   : > { %v4152_v59 = vmax.f32 %v4065_v56, 0.0  ;;  %v10308_v56 = vsel %vm4313_vm9, 1.0, %v8986_v1 }
 0xb1a   : > { %v4157_v46 = vpack.c.bf16 %v4151_v43, %v4151_v43  ;;  %v8615_v43 = vld [vmem:[%s11293_s11 + $0xf0] ss:$8 sps:$4 sm:$0xff]  }
 0xb1b   : > { %v4158_v63 = vpack.c.bf16 %v4152_v59, %v4152_v59 }
 0xb1d   : > { %v4164_v10 = vshll.u32 %v4158_v63, 16 }
 0xb21   : > { %v4103_v38 = vpop.f32.mrb[60].mxu1 }
 0xb22   : > { %v4104_v61 = vadd.f32 %v4103_v38, %v4005_v57  ;;  %v4105_v62 = vpop.f32.mrb[61].mxu1  ;;  %v10314_v38 = vsel %vm4369_vm3, 1.0, %v8986_v1 }
 0xb23   : > { %v4107_v21 = vpop.f32.mrb[62].mxu1  ;;  %v4106_v40 = vadd.f32 %v4105_v62, %v4009_v37  ;;  %v8611_v37 = vld [vmem:[%s11293_s11 + $0xd4] ss:$8 sps:$4 sm:$0xff]  }
 0xb24   : > { %v4153_v0 = vmax.f32 %v4104_v61, 0.0  ;;  %v4108_v6 = vpop.f32.mrb[63].mxu1  ;;  %v8572_v61 = vld [vmem:[%s11293_s11 + $0x4] ss:$8 sps:$4 sm:$0xff]  }
 0xb25   : > { %v4154_v42 = vmax.f32 %v4106_v40, 0.0  ;;  %v8570_v6 = vld [vmem:[%s11293_s11] ss:$8 sps:$4 sm:$0xff]   ;;  %v8614_v40 = vld [vmem:[%s11293_s11 + $0xe4] ss:$8 sps:$4 sm:$0xff]  }
 0xb26   : > { %v4159_v7 = vpack.c.bf16 %v4153_v0, %v4153_v0  ;;  %v10335_v0 = vpack.c.bf16 %v10314_v38, %v10314_v38 }
 0xb27   : > { %v4160_v20 = vpack.c.bf16 %v4154_v42, %v4154_v42  ;;  %v8617_v42 = vld [vmem:[%s11293_s11 + $0xf4] ss:$8 sps:$4 sm:$0xff]  }
 0xb28   : > { %v4167_v11 = vshll.u32 %v4159_v7, 16  ;;  %v8575_v7 = vld [vmem:[%s11293_s11 + $0x14] ss:$8 sps:$4 sm:$0xff]  }
 0xb29   : > { %v4179_v13 = vrot.slane %v4160_v20, 7  ;;  %v8620_v20 = vld [vmem:[%s11293_s11 + $0x104] ss:$8 sps:$4 sm:$0xff]  }
 0xb2a   : > { %v8123_v12 = vpack.i.bf16 %v4167_v11, %v4164_v10  ;;  %v8576_v10 = vld [vmem:[%s11293_s11 + $0x20] ss:$8 sps:$4 sm:$0xff]   ;;  %v8581_v11 = vld [vmem:[%s11293_s11 + $0x34] ss:$8 sps:$4 sm:$0xff]  }
 0xb2c   : > { %8124 = vrot.lane.b32.xlu0 %v8123_v12, %s11338_s1  ;;  %v8579_v12 = vld [vmem:[%s11293_s11 + $0x30] ss:$8 sps:$4 sm:$0xff]  }
 0xb2d   : > { %v4144_v17 = vpop.f32.mrb[64].mxu1 }
 0xb2e   : > { %v4145_v18 = vadd.f32 %v4144_v17, %v4013_v14  ;;  %v4146_v25 = vpop.f32.mrb[65].mxu1  ;;  %v8584_v14 = vld [vmem:[%s11293_s11 + $0x44] ss:$8 sps:$4 sm:$0xff]   ;;  %v8587_v17 = vld [vmem:[%s11293_s11 + $0x54] ss:$8 sps:$4 sm:$0xff]  }
 0xb2f   : > { %v4147_v15 = vadd.f32 %v4146_v25, %v4017_v16  ;;  %v4148_v26 = vpop.f32.mrb[66].mxu1  ;;  %v8582_v16 = vld [vmem:[%s11293_s11 + $0x40] ss:$8 sps:$4 sm:$0xff]   ;;  %v8590_v25 = vld [vmem:[%s11293_s11 + $0x64] ss:$8 sps:$4 sm:$0xff]  }
 0xb30   : > { %v4155_v24 = vmax.f32 %v4145_v18, 0.0  ;;  %v4149_v27 = vpop.f32.mrb[67].mxu1  ;;  %v8585_v18 = vld [vmem:[%s11293_s11 + $0x50] ss:$8 sps:$4 sm:$0xff]   ;;  %v8593_v26 = vld [vmem:[%s11293_s11 + $0x74] ss:$8 sps:$4 sm:$0xff]  }
 0xb31   : > { %v4156_v28 = vmax.f32 %v4147_v15, 0.0  ;;  %v8588_v15 = vld [vmem:[%s11293_s11 + $0x60] ss:$8 sps:$4 sm:$0xff]   ;;  %v8596_v27 = vld [vmem:[%s11293_s11 + $0x84] ss:$8 sps:$4 sm:$0xff]  }
 0xb32   : > { %v4161_v29 = vpack.c.bf16 %v4155_v24, %v4155_v24  ;;  %v8591_v24 = vld [vmem:[%s11293_s11 + $0x70] ss:$8 sps:$4 sm:$0xff]  }
 0xb33   : > { %v4162_v30 = vpack.c.bf16 %v4156_v28, %v4156_v28  ;;  %v8594_v28 = vld [vmem:[%s11293_s11 + $0x80] ss:$8 sps:$4 sm:$0xff]  }
 0xb34   : > { %v4182_v31 = vshll.u32 %v4161_v29, 16  ;;  %v4180_v51 = vrot.slane %v4161_v29, 7  ;;  %v8599_v29 = vld [vmem:[%s11293_s11 + $0x94] ss:$8 sps:$4 sm:$0xff]  }
 0xb35   : > { %v4186_v32 = vshll.u32 %v4162_v30, 16  ;;  %v8597_v30 = vld [vmem:[%s11293_s11 + $0x90] ss:$8 sps:$4 sm:$0xff]  }
 0xb36   : > { %v4184_v33 = vrot.slane %v4182_v31, 7  ;;  %v8602_v31 = vld [vmem:[%s11293_s11 + $0xa4] ss:$8 sps:$4 sm:$0xff]  }
 0xb37   : > { %v4188_v34 = vrot.slane %v4186_v32, 7  ;;  %v8600_v32 = vld [vmem:[%s11293_s11 + $0xa0] ss:$8 sps:$4 sm:$0xff]  }
 0xb39   : > { %v8128_v35 = vpack.i.bf16 %v4188_v34, %v4184_v33  ;;  %v8605_v33 = vld [vmem:[%s11293_s11 + $0xb4] ss:$8 sps:$4 sm:$0xff]   ;;  %v8603_v34 = vld [vmem:[%s11293_s11 + $0xb0] ss:$8 sps:$4 sm:$0xff]  }
 0xb3b   : > { %8129 = vrot.lane.b32.xlu1 %v8128_v35, %s11338_s1  ;;  %v8608_v35 = vld [vmem:[%s11293_s11 + $0xc4] ss:$8 sps:$4 sm:$0xff]  }
 0xb9e   : > { %v8125_v44 = vpop.permute.xlu0 %8124 }
 0xb9f   : > { %v8127_v45 = vunpack.i.h.bf16 %v8125_v44  ;;  %v8126_v22 = vunpack.i.l.bf16 %v8125_v44  ;;  %v8642_v44 = vld [vmem:[%s11294_s12] ss:$8 sps:$4 sm:$0xff]  }
 0xba1   : > { %v4174_v4 = vsel %vm970_vm11, %v8126_v22, %v8127_v45  ;;  %v4200_v50 = vsel %vm4198_vm7, %v4158_v63, %v8127_v45  ;;  %v10331_v63 = vpack.c.bf16 %v10308_v56, %v10308_v56  ;;  %v8644_v45 = vld [vmem:[%s11294_s12 + $0x4] ss:$8 sps:$4 sm:$0xff]   ;;  %v8647_v22 = vld [vmem:[%s11294_s12 + $0x14] ss:$8 sps:$4 sm:$0xff]  }
 0xba2   : > { %v4199_v19 = vsel %vm4198_vm7, %v4157_v46, %v4174_v4  ;;  %v4208_v55 = vsel %vm4196_vm5, %v4200_v50, %v4180_v51  ;;  %v8645_v46 = vld [vmem:[%s11294_s12 + $0x10] ss:$8 sps:$4 sm:$0xff]   ;;  %v8648_v4 = vld [vmem:[%s11294_s12 + $0x20] ss:$8 sps:$4 sm:$0xff]   ;;  %v8659_v50 = vld [vmem:[%s11294_s12 + $0x54] ss:$8 sps:$4 sm:$0xff]  }
 0xba3   : > { %v4204_v47 = vsel %vm4196_vm5, %v4199_v19, %v4179_v13  ;;  %v8650_v13 = vld [vmem:[%s11294_s12 + $0x24] ss:$8 sps:$4 sm:$0xff]   ;;  %v8653_v19 = vld [vmem:[%s11294_s12 + $0x34] ss:$8 sps:$4 sm:$0xff]   ;;  %v8657_v51 = vld [vmem:[%s11294_s12 + $0x50] ss:$8 sps:$4 sm:$0xff]  }
 0xbad   : > { %v8130_v52 = vpop.permute.xlu1 %8129 }
 0xbae   : > { %v8132_v53 = vunpack.i.h.bf16 %v8130_v52  ;;  %v8131_v54 = vunpack.i.l.bf16 %v8130_v52  ;;  %v8662_v52 = vld [vmem:[%s11294_s12 + $0x64] ss:$8 sps:$4 sm:$0xff]  }
 0xbb0   : > { %v10310_v57 = vsel %vm4212_vm2, %v4208_v55, %v8132_v53  ;;  %v4193_v59 = vsel %vm970_vm11, %v8131_v54, %v8132_v53  ;;  %v8660_v53 = vld [vmem:[%s11294_s12 + $0x60] ss:$8 sps:$4 sm:$0xff]   ;;  %v8665_v54 = vld [vmem:[%s11294_s12 + $0x74] ss:$8 sps:$4 sm:$0xff]   ;;  %v8663_v55 = vld [vmem:[%s11294_s12 + $0x70] ss:$8 sps:$4 sm:$0xff]  }
 0xbb1   : > { %7482 = vmatprep.subr.msk.bf16.mxu0 %vm3264_vm15, %v10310_v57  ;;  %7484 = vmatprep.subr.msk.bf16.mxu1 %vm3264_vm15, %v10310_v57  ;;  %v10323_v62 = vsel %vm4212_vm2, %v4204_v47, %v4193_v59  ;;  %v8651_v47 = vld [vmem:[%s11294_s12 + $0x30] ss:$8 sps:$4 sm:$0xff]   ;;  %v8668_v59 = vld [vmem:[%s11294_s12 + $0x84] ss:$8 sps:$4 sm:$0xff]  }
 0xbb2   : > { %4420 = vrot.lane.b32.xlu1 %v10323_v62, %s11338_s1  ;;  %v4320_v21 = vsel %vm3264_vm15, %v10323_v62, 0 }
 0xbb3   : > { %4326 = vmatpush1.bf16.msra.mxu0 %v4320_v21  ;;  %4376 = vmatpush1.bf16.msra.mxu1 %v4320_v21  ;;  %v8671_v21 = vld [vmem:[%s11294_s12 + $0x94] ss:$8 sps:$4 sm:$0xff]  }
 0xbb4   : > { %4692 = vmatprep.subr.bf16.mxu0 %v8572_v61  ;;  %5016 = vmatprep.subr.bf16.mxu1 %v8644_v45  ;;  %v8666_v61 = vld [vmem:[%s11294_s12 + $0x80] ss:$8 sps:$4 sm:$0xff]   ;;  %v8629_v45 = vld [vmem:[%s11293_s11 + $0x134] ss:$8 sps:$4 sm:$0xff]  }
 0xbb6   : > { %4422 = vrot.lane.b32.xlu1 %v10310_v57, %s11338_s1  ;;  %7483 = vmatmul.mubr.msk.bf16.vlgmr.msra.gmra.mrb[32].mxu0 %vm3261_vm1, %v10331_v63 }
 0xbb7   : > { %7485 = vmatmul.mubr.msk.bf16.vlgmr.msra.gmra.mrb[68].mxu1 %vm3261_vm1, %v10335_v0  ;;  %4693 = vmatpush1.bf16.msra.mxu0 %v8570_v6  ;;  %v8669_v6 = vld [vmem:[%s11294_s12 + $0x90] ss:$8 sps:$4 sm:$0xff]  }
 0xbb8   : > { %4694 = vmatprep.subr.bf16.mxu0 %v8575_v7  ;;  %5017 = vmatpush1.bf16.msra.mxu1 %v8642_v44  ;;  %v8674_v7 = vld [vmem:[%s11294_s12 + $0xa4] ss:$8 sps:$4 sm:$0xff]   ;;  %v8624_v44 = vld [vmem:[%s11293_s11 + $0x120] ss:$8 sps:$4 sm:$0xff]  }
 0xbb9   : > { %5018 = vmatprep.subr.bf16.mxu1 %v8647_v22  ;;  %v8627_v22 = vld [vmem:[%s11293_s11 + $0x130] ss:$8 sps:$4 sm:$0xff]  }
 0xbbb   : > { %4695 = vmatpush1.bf16.msra.mxu0 %v8573_v8  ;;  %v8672_v8 = vld [vmem:[%s11294_s12 + $0xa0] ss:$8 sps:$4 sm:$0xff]  }
 0xbbc   : > { %4696 = vmatprep.subr.bf16.mxu0 %v8578_v9  ;;  %5019 = vmatpush1.bf16.msra.mxu1 %v8645_v46  ;;  %v8677_v9 = vld [vmem:[%s11294_s12 + $0xb4] ss:$8 sps:$4 sm:$0xff]   ;;  %v8632_v46 = vld [vmem:[%s11293_s11 + $0x144] ss:$8 sps:$4 sm:$0xff]  }
 0xbbd   : > { %5020 = vmatprep.subr.bf16.mxu1 %v8650_v13  ;;  %v8630_v13 = vld [vmem:[%s11293_s11 + $0x140] ss:$8 sps:$4 sm:$0xff]  }
 0xbbf   : > { %4697 = vmatpush1.bf16.msra.mxu0 %v8576_v10  ;;  %v8675_v10 = vld [vmem:[%s11294_s12 + $0xb0] ss:$8 sps:$4 sm:$0xff]  }
 0xbc0   : > { %4698 = vmatprep.subr.bf16.mxu0 %v8581_v11  ;;  %5021 = vmatpush1.bf16.msra.mxu1 %v8648_v4  ;;  %v8680_v11 = vld [vmem:[%s11294_s12 + $0xc4] ss:$8 sps:$4 sm:$0xff]   ;;  %v8635_v4 = vld [vmem:[%s11293_s11 + $0x154] ss:$8 sps:$4 sm:$0xff]  }
 0xbc1   : > { %5022 = vmatprep.subr.bf16.mxu1 %v8653_v19  ;;  %v8633_v19 = vld [vmem:[%s11293_s11 + $0x150] ss:$8 sps:$4 sm:$0xff]  }
 0xbc3   : > { %4699 = vmatpush1.bf16.msra.mxu0 %v8579_v12  ;;  %v8678_v12 = vld [vmem:[%s11294_s12 + $0xc0] ss:$8 sps:$4 sm:$0xff]  }
 0xbc4   : > { %4700 = vmatprep.subr.bf16.mxu0 %v8584_v14  ;;  %5023 = vmatpush1.bf16.msra.mxu1 %v8651_v47  ;;  %v8683_v14 = vld [vmem:[%s11294_s12 + $0xd4] ss:$8 sps:$4 sm:$0xff]   ;;  %v8638_v47 = vld [vmem:[%s11293_s11 + $0x164] ss:$8 sps:$4 sm:$0xff]  }
 0xbc5   : > { %5024 = vmatprep.subr.bf16.mxu1 %v8656_v48  ;;  %v8636_v48 = vld [vmem:[%s11293_s11 + $0x160] ss:$8 sps:$4 sm:$0xff]  }
 0xbc7   : > { %4701 = vmatpush1.bf16.msra.mxu0 %v8582_v16  ;;  %v8681_v16 = vld [vmem:[%s11294_s12 + $0xd0] ss:$8 sps:$4 sm:$0xff]  }
 0xbc8   : > { %4702 = vmatprep.subr.bf16.mxu0 %v8587_v17  ;;  %5025 = vmatpush1.bf16.msra.mxu1 %v8654_v49  ;;  %v8686_v17 = vld [vmem:[%s11294_s12 + $0xe4] ss:$8 sps:$4 sm:$0xff]   ;;  %v8641_v49 = vld [vmem:[%s11293_s11 + $0x174] ss:$8 sps:$4 sm:$0xff]  }
 0xbc9   : > { %5026 = vmatprep.subr.bf16.mxu1 %v8659_v50  ;;  %v8639_v50 = vld [vmem:[%s11293_s11 + $0x170] ss:$8 sps:$4 sm:$0xff]  }
 0xbcb   : > { %4703 = vmatpush1.bf16.msra.mxu0 %v8585_v18  ;;  %v8684_v18 = vld [vmem:[%s11294_s12 + $0xe0] ss:$8 sps:$4 sm:$0xff]  }
 0xbcc   : > { %4704 = vmatprep.subr.bf16.mxu0 %v8590_v25  ;;  %5027 = vmatpush1.bf16.msra.mxu1 %v8657_v51  ;;  %v8689_v25 = vld [vmem:[%s11294_s12 + $0xf4] ss:$8 sps:$4 sm:$0xff]  }
 0xbcd   : > { %5028 = vmatprep.subr.bf16.mxu1 %v8662_v52 }
 0xbcf   : > { %4705 = vmatpush1.bf16.msra.mxu0 %v8588_v15  ;;  %v8687_v15 = vld [vmem:[%s11294_s12 + $0xf0] ss:$8 sps:$4 sm:$0xff]  }
 0xbd0   : > { %4706 = vmatprep.subr.bf16.mxu0 %v8593_v26  ;;  %5029 = vmatpush1.bf16.msra.mxu1 %v8660_v53  ;;  %v8692_v26 = vld [vmem:[%s11294_s12 + $0x104] ss:$8 sps:$4 sm:$0xff]  }
 0xbd1   : > { %5030 = vmatprep.subr.bf16.mxu1 %v8665_v54  ;;  %v8690_v54 = vld [vmem:[%s11294_s12 + $0x100] ss:$8 sps:$4 sm:$0xff]  }
 0xbd3   : > { %4707 = vmatpush1.bf16.msra.mxu0 %v8591_v24 }
 0xbd4   : > { %4708 = vmatprep.subr.bf16.mxu0 %v8596_v27  ;;  %5031 = vmatpush1.bf16.msra.mxu1 %v8663_v55 }
 0xbd5   : > { %5032 = vmatprep.subr.bf16.mxu1 %v8668_v59  ;;  %v8695_v59 = vld [vmem:[%s11294_s12 + $0x114] ss:$8 sps:$4 sm:$0xff]  }
 0xbd7   : > { %4709 = vmatpush1.bf16.msra.mxu0 %v8594_v28 }
 0xbd8   : > { %4710 = vmatprep.subr.bf16.mxu0 %v8599_v29  ;;  %5033 = vmatpush1.bf16.msra.mxu1 %v8666_v61  ;;  %v8693_v61 = vld [vmem:[%s11294_s12 + $0x110] ss:$8 sps:$4 sm:$0xff]  }
 0xbd9   : > { %5034 = vmatprep.subr.bf16.mxu1 %v8671_v21  ;;  %v8698_v21 = vld [vmem:[%s11294_s12 + $0x124] ss:$8 sps:$4 sm:$0xff]  }
 0xbdb   : > { %4711 = vmatpush1.bf16.msra.mxu0 %v8597_v30 }
 0xbdc   : > { %4712 = vmatprep.subr.bf16.mxu0 %v8602_v31  ;;  %5035 = vmatpush1.bf16.msra.mxu1 %v8669_v6  ;;  %v8699_v6 = vld [vmem:[%s11294_s12 + $0x130] ss:$8 sps:$4 sm:$0xff]  }
 0xbdd   : > { %5036 = vmatprep.subr.bf16.mxu1 %v8674_v7  ;;  %v8704_v7 = vld [vmem:[%s11294_s12 + $0x144] ss:$8 sps:$4 sm:$0xff]  }
 0xbdf   : > { %4713 = vmatpush1.bf16.msra.mxu0 %v8600_v32 }
 0xbe0   : > { %4714 = vmatprep.subr.bf16.mxu0 %v8605_v33  ;;  %5037 = vmatpush1.bf16.msra.mxu1 %v8672_v8  ;;  %v8702_v8 = vld [vmem:[%s11294_s12 + $0x140] ss:$8 sps:$4 sm:$0xff]  }
 0xbe1   : > { %5038 = vmatprep.subr.bf16.mxu1 %v8677_v9  ;;  %v8707_v9 = vld [vmem:[%s11294_s12 + $0x154] ss:$8 sps:$4 sm:$0xff]  }
 0xbe3   : > { %4715 = vmatpush1.bf16.msra.mxu0 %v8603_v34 }
 0xbe4   : > { %4716 = vmatprep.subr.bf16.mxu0 %v8608_v35  ;;  %5039 = vmatpush1.bf16.msra.mxu1 %v8675_v10  ;;  %v8705_v10 = vld [vmem:[%s11294_s12 + $0x150] ss:$8 sps:$4 sm:$0xff]  }
 0xbe5   : > { %5040 = vmatprep.subr.bf16.mxu1 %v8680_v11  ;;  %v8710_v11 = vld [vmem:[%s11294_s12 + $0x164] ss:$8 sps:$4 sm:$0xff]  }
 0xbe7   : > { %4717 = vmatpush1.bf16.msra.mxu0 %v8606_v36  ;;  %v8618_v36 = vld [vmem:[%s11293_s11 + $0x100] ss:$8 sps:$4 sm:$0xff]  }
 0xbe8   : > { %4718 = vmatprep.subr.bf16.mxu0 %v8611_v37  ;;  %5041 = vmatpush1.bf16.msra.mxu1 %v8678_v12  ;;  %v8708_v12 = vld [vmem:[%s11294_s12 + $0x160] ss:$8 sps:$4 sm:$0xff]  }
 0xbe9   : > { %5042 = vmatprep.subr.bf16.mxu1 %v8683_v14  ;;  %v8713_v14 = vld [vmem:[%s11294_s12 + $0x174] ss:$8 sps:$4 sm:$0xff]  }
 0xbeb   : > { %4719 = vmatpush1.bf16.msra.mxu0 %v8609_v39 }
 0xbec   : > { %4720 = vmatprep.subr.bf16.mxu0 %v8614_v40  ;;  %5043 = vmatpush1.bf16.msra.mxu1 %v8681_v16  ;;  %v8711_v16 = vld [vmem:[%s11294_s12 + $0x170] ss:$8 sps:$4 sm:$0xff]  }
 0xbed   : > { %5044 = vmatprep.subr.bf16.mxu1 %v8686_v17 }
 0xbef   : > { %4721 = vmatpush1.bf16.msra.mxu0 %v8612_v41  ;;  %v8623_v41 = vld [vmem:[%s11293_s11 + $0x114] ss:$8 sps:$4 sm:$0xff]  }
 0xbf0   : > { %4722 = vmatprep.subr.bf16.mxu0 %v8617_v42  ;;  %5045 = vmatpush1.bf16.msra.mxu1 %v8684_v18 }
 0xbf1   : > { %5046 = vmatprep.subr.bf16.mxu1 %v8689_v25 }
 0xbf3   : > { %4723 = vmatpush1.bf16.msra.mxu0 %v8615_v43  ;;  %v8621_v43 = vld [vmem:[%s11293_s11 + $0x110] ss:$8 sps:$4 sm:$0xff]  }
 0xbf4   : > { %4733 = vmatprep.subr.bf16.mxu0 %v8620_v20  ;;  %5047 = vmatpush1.bf16.msra.mxu1 %v8687_v15  ;;  %v8626_v20 = vld [vmem:[%s11293_s11 + $0x124] ss:$8 sps:$4 sm:$0xff]  }
 0xbf5   : > { %5057 = vmatprep.subr.bf16.mxu1 %v8692_v26 }
 0xc24   : > { %v4421_v24 = vpop.permute.xlu1 %4420 }
 0xc28   : > { %v4423_v51 = vpop.permute.xlu1 %4422 }
 0xc29   : > { %v4424_v52 = vsel %vm970_vm11, %v4421_v24, %v4423_v51  ;;  %v8716_v51 = vld [vmem:[%s11296_s14 + $0x4] ss:$8 sps:$4 sm:$0xff]  }
 0xc89   : > { %v4359_v27 = vpop.f32.mrb[32].mxu0 }
 0xc8a   : > { %v4409_v28 = vpop.f32.mrb[68].mxu1  ;;  %v4361_v29 = vpop.f32.mrb[33].mxu0  ;;  %v4366_v30 = vpack.c.bf16 %v4359_v27, %v4359_v27  ;;  %v4311_v27 = vld [vmem:[%s11295_s13] sm:$0x3] }
 0xc8b   : > { %v4416_v31 = vpack.c.bf16 %v4409_v28, %v4409_v28  ;;  %v4367_v32 = vpack.c.bf16 %v4361_v29, %v4361_v29  ;;  %v4411_v33 = vpop.f32.mrb[69].mxu1  ;;  %v4363_v34 = vpop.f32.mrb[34].mxu0  ;;  %v10644_v28 = vmul.u32 2, %v9173_v5  ;;  %v4445_v29 = vrot.slane %v4311_v27, %v9377_v58 }
 0xc8c   : > { %v4413_v35 = vpop.f32.mrb[70].mxu1  ;;  %v4364_v37 = vpop.f32.mrb[35].mxu0  ;;  %v4417_v42 = vpack.c.bf16 %v4411_v33, %v4411_v33 }
 0xc8d   : > { %4432 = vrot.lane.b32.xlu0 %v4416_v31, %s11338_s1  ;;  %v4414_v39 = vpop.f32.mrb[71].mxu1  ;;  %v4428_v40 = vsel %vm970_vm11, %v4367_v32, %v4421_v24  ;;  %v10649_v31 = vadd.s32 1, %v10644_v28  ;;  %vm5101_vm5 = vcmp.eq.s32.totalorder %v9158_v2, %v10644_v28 }
 0xc8e   : > { %4724 = vmatprep.mubr.bf16.mxu0 %v4428_v40 }
 0xc8f   : > { %4725 = vmatmul.mubr.bf16.vlgmr.msra.gmra.mrb[36].mxu0 %v4366_v30  ;;  %v4449_v30 = vrot.slane %v4311_v27, %v9383_v60  ;;  %vm5105_vm4 = vcmp.eq.s32.totalorder %v9158_v2, %v10649_v31  ;;  %v8744_v27 = vld [vmem:[%s11296_s14 + $0xa0] ss:$8 sps:$4 sm:$0xff]  }
 0xc90   : > { %4734 = vmatpush1.bf16.msra.mxu0 %v8618_v36  ;;  %4765 = vmatprep.mubr.bf16.mxu0 %v8991_v23 }
 0xc91   : > { %4434 = vrot.lane.b32.xlu0 %v4417_v42, %s11338_s1  ;;  %4735 = vmatprep.subr.bf16.mxu0 %v8623_v41 }
 0xc94   : > { %4736 = vmatpush1.bf16.msra.mxu0 %v8621_v43 }
 0xc95   : > { %4737 = vmatprep.subr.bf16.mxu0 %v8626_v20 }
 0xc98   : > { %4738 = vmatpush1.bf16.msra.mxu0 %v8624_v44 }
 0xc99   : > { %4739 = vmatprep.subr.bf16.mxu0 %v8629_v45  ;;  %v10654_v45 = vsel %vm5105_vm4, 1.0, %v8986_v1 }
 0xc9c   : > { %4740 = vmatpush1.bf16.msra.mxu0 %v8627_v22 }
 0xc9d   : > { %4741 = vmatprep.subr.bf16.mxu0 %v8632_v46 }
 0xca0   : > { %4742 = vmatpush1.bf16.msra.mxu0 %v8630_v13 }
 0xca1   : > { %4743 = vmatprep.subr.bf16.mxu0 %v8635_v4 }
 0xca4   : > { %4744 = vmatpush1.bf16.msra.mxu0 %v8633_v19  ;;  %v5107_v19 = vpack.c.bf16 %v10654_v45, %v10654_v45 }
 0xca5   : > { %4745 = vmatprep.subr.bf16.mxu0 %v8638_v47 }
 0xca8   : > { %4746 = vmatpush1.bf16.msra.mxu0 %v8636_v48  ;;  %v10667_v48 = vsel %vm5101_vm5, 1.0, %v8986_v1 }
 0xca9   : > { %4747 = vmatprep.subr.bf16.mxu0 %v8641_v49  ;;  %v5103_v49 = vpack.c.bf16 %v10667_v48, %v10667_v48 }
 0xcac   : > { %4748 = vmatpush1.bf16.msra.mxu0 %v8639_v50  ;;  %v8714_v50 = vld [vmem:[%s11296_s14] ss:$8 sps:$4 sm:$0xff]  }
 0xcaf   : > { %4766 = vmatmul.mubr.bf16.vlgmr.msra.gmra.mrb[36].mxu0 %v4424_v52  ;;  %v8719_v52 = vld [vmem:[%s11296_s14 + $0x14] ss:$8 sps:$4 sm:$0xff]  }
 0xcb0   : > { %5153 = vmatprep.mubr.bf16.mxu0 %v8991_v23 }
 0xcff   : > { %v4433_v53 = vpop.permute.xlu0 %4432 }
 0xd00   : > { %v4439_v55 = vsel %vm970_vm11, %v10310_v57, %v4433_v53  ;;  %v8696_v57 = vld [vmem:[%s11294_s12 + $0x120] ss:$8 sps:$4 sm:$0xff]  }
 0xd01   : > { %5048 = vmatprep.mubr.bf16.mxu1 %v4439_v55 }
 0xd02   : > { %5049 = vmatmul.mubr.bf16.vlgmr.msra.gmra.mrb[72].mxu1 %v10323_v62  ;;  %v8701_v62 = vld [vmem:[%s11294_s12 + $0x134] ss:$8 sps:$4 sm:$0xff]  }
 0xd03   : > { %5058 = vmatpush1.bf16.msra.mxu1 %v8690_v54  ;;  %5089 = vmatprep.mubr.bf16.mxu1 %v8991_v23  ;;  %v4435_v17 = vpop.permute.xlu0 %4434  ;;  %v8722_v54 = vld [vmem:[%s11296_s14 + $0x24] ss:$8 sps:$4 sm:$0xff]  }
 0xd04   : > { %5059 = vmatprep.subr.bf16.mxu1 %v8695_v59  ;;  %v4436_v18 = vsel %vm970_vm11, %v4433_v53, %v4435_v17  ;;  %v8717_v53 = vld [vmem:[%s11296_s14 + $0x10] ss:$8 sps:$4 sm:$0xff]   ;;  %v8737_v17 = vld [vmem:[%s11296_s14 + $0x74] ss:$8 sps:$4 sm:$0xff]  }
 0xd07   : > { %5060 = vmatpush1.bf16.msra.mxu1 %v8693_v61 }
 0xd08   : > { %5061 = vmatprep.subr.bf16.mxu1 %v8698_v21  ;;  %v8720_v21 = vld [vmem:[%s11296_s14 + $0x20] ss:$8 sps:$4 sm:$0xff]  }
 0xd0b   : > { %5062 = vmatpush1.bf16.msra.mxu1 %v8696_v57 }
 0xd0c   : > { %5063 = vmatprep.subr.bf16.mxu1 %v8701_v62 }
 0xd0f   : > { %5064 = vmatpush1.bf16.msra.mxu1 %v8699_v6  ;;  %v8725_v6 = vld [vmem:[%s11296_s14 + $0x34] ss:$8 sps:$4 sm:$0xff]  }
 0xd10   : > { %5065 = vmatprep.subr.bf16.mxu1 %v8704_v7 }
 0xd13   : > { %5066 = vmatpush1.bf16.msra.mxu1 %v8702_v8 }
 0xd14   : > { %5067 = vmatprep.subr.bf16.mxu1 %v8707_v9  ;;  %v8723_v9 = vld [vmem:[%s11296_s14 + $0x30] ss:$8 sps:$4 sm:$0xff]  }
 0xd17   : > { %5068 = vmatpush1.bf16.msra.mxu1 %v8705_v10  ;;  %v8728_v10 = vld [vmem:[%s11296_s14 + $0x44] ss:$8 sps:$4 sm:$0xff]  }
 0xd18   : > { %5069 = vmatprep.subr.bf16.mxu1 %v8710_v11  ;;  %v8726_v11 = vld [vmem:[%s11296_s14 + $0x40] ss:$8 sps:$4 sm:$0xff]  }
 0xd1b   : > { %5070 = vmatpush1.bf16.msra.mxu1 %v8708_v12  ;;  %v8731_v12 = vld [vmem:[%s11296_s14 + $0x54] ss:$8 sps:$4 sm:$0xff]  }
 0xd1c   : > { %5071 = vmatprep.subr.bf16.mxu1 %v8713_v14  ;;  %v8729_v14 = vld [vmem:[%s11296_s14 + $0x50] ss:$8 sps:$4 sm:$0xff]  }
 0xd1f   : > { %5072 = vmatpush1.bf16.msra.mxu1 %v8711_v16  ;;  %v8732_v16 = vld [vmem:[%s11296_s14 + $0x60] ss:$8 sps:$4 sm:$0xff]  }
 0xd22   : > { %5090 = vmatmul.mubr.bf16.vlgmr.msra.gmra.mrb[72].mxu1 %v4436_v18  ;;  %v8735_v18 = vld [vmem:[%s11296_s14 + $0x70] ss:$8 sps:$4 sm:$0xff]  }
 0xd23   : > { %5351 = vmatprep.mubr.bf16.mxu1 %v8991_v23 }
 0xd82   : > { %v4767_v25 = vpop.f32.mrb[36].mxu0 }
 0xd83   : > { %v4769_v15 = vpop.f32.mrb[37].mxu0  ;;  %v7992_v32 = vadd.f32 %v4767_v25, %v4445_v29  ;;  %v8738_v25 = vld [vmem:[%s11296_s14 + $0x80] ss:$8 sps:$4 sm:$0xff]  }
 0xd84   : > { %v4771_v26 = vpop.f32.mrb[38].mxu0  ;;  %v7993_v33 = vadd.f32 %v4769_v15, %v4449_v30  ;;  %v8743_v15 = vld [vmem:[%s11296_s14 + $0x94] ss:$8 sps:$4 sm:$0xff]  }
 0xd85   : > { %v4772_v24 = vpop.f32.mrb[39].mxu0  ;;  %v4774_v42 = vmax.f32 %v7992_v32, 0.0  ;;  %v8741_v26 = vld [vmem:[%s11296_s14 + $0x90] ss:$8 sps:$4 sm:$0xff]   ;;  %v8752_v32 = vld [vmem:[%s11296_s14 + $0xc4] ss:$8 sps:$4 sm:$0xff]  }
 0xd86   : > { %v4775_v43 = vmax.f32 %v7993_v33, 0.0  ;;  %v8746_v24 = vld [vmem:[%s11296_s14 + $0xa4] ss:$8 sps:$4 sm:$0xff]   ;;  %v8750_v33 = vld [vmem:[%s11296_s14 + $0xc0] ss:$8 sps:$4 sm:$0xff]  }
 0xd87   : > { %v5108_v13 = vpack.c.bf16 %v4774_v42, %v4774_v42  ;;  %v8786_v42 = vld [vmem:[%s11297_s15] ss:$8 sps:$4 sm:$0xff]  }
 0xd88   : > { %v5109_v4 = vpack.c.bf16 %v4775_v43, %v4775_v43  ;;  %v8788_v43 = vld [vmem:[%s11297_s15 + $0x4] ss:$8 sps:$4 sm:$0xff]  }
 0xd89   : > { %v5166_v47 = vsel %vm3264_vm15, %v5108_v13, 0  ;;  %v8797_v13 = vld [vmem:[%s11297_s15 + $0x34] ss:$8 sps:$4 sm:$0xff]  }
 0xdf5   : > { %v5091_v34 = vpop.f32.mrb[72].mxu1 }
 0xdf6   : > { %v7994_v35 = vadd.f32 %v5091_v34, %v4445_v29  ;;  %v5093_v36 = vpop.f32.mrb[73].mxu1  ;;  %v8749_v29 = vld [vmem:[%s11296_s14 + $0xb4] ss:$8 sps:$4 sm:$0xff]  }
 0xdf7   : > { %v7995_v37 = vadd.f32 %v5093_v36, %v4449_v30  ;;  %v5095_v39 = vpop.f32.mrb[74].mxu1  ;;  %v8747_v30 = vld [vmem:[%s11296_s14 + $0xb0] ss:$8 sps:$4 sm:$0xff]   ;;  %v8755_v34 = vld [vmem:[%s11296_s14 + $0xd4] ss:$8 sps:$4 sm:$0xff]  }
 0xdf8   : > { %v5098_v40 = vmax.f32 %v7994_v35, 0.0  ;;  %v5096_v41 = vpop.f32.mrb[75].mxu1  ;;  %v8753_v35 = vld [vmem:[%s11296_s14 + $0xd0] ss:$8 sps:$4 sm:$0xff]   ;;  %v8758_v36 = vld [vmem:[%s11296_s14 + $0xe4] ss:$8 sps:$4 sm:$0xff]  }
 0xdf9   : > { %v5099_v20 = vmax.f32 %v7995_v37, 0.0  ;;  %v8756_v37 = vld [vmem:[%s11296_s14 + $0xe0] ss:$8 sps:$4 sm:$0xff]   ;;  %v8761_v39 = vld [vmem:[%s11296_s14 + $0xf4] ss:$8 sps:$4 sm:$0xff]  }
 0xdfa   : > { %v5110_v44 = vpack.c.bf16 %v5098_v40, %v5098_v40  ;;  %v8759_v40 = vld [vmem:[%s11296_s14 + $0xf0] ss:$8 sps:$4 sm:$0xff]   ;;  %v8764_v41 = vld [vmem:[%s11296_s14 + $0x104] ss:$8 sps:$4 sm:$0xff]  }
 0xdfb   : > { %v5111_v22 = vpack.c.bf16 %v5099_v20, %v5099_v20  ;;  %v8791_v20 = vld [vmem:[%s11297_s15 + $0x14] ss:$8 sps:$4 sm:$0xff]  }
 0xdfc   : > { %v5116_v46 = vsel %vm3264_vm15, %v5110_v44, 0  ;;  %v8789_v44 = vld [vmem:[%s11297_s15 + $0x10] ss:$8 sps:$4 sm:$0xff]  }
 0xdfd   : > { %7582 = vmatprep.subr.msk.bf16.mxu0 %vm3264_vm15, %v5111_v22  ;;  %v8794_v22 = vld [vmem:[%s11297_s15 + $0x24] ss:$8 sps:$4 sm:$0xff]  }
 0xdfe   : > { %5122 = vmatpush1.bf16.msra.mxu0 %v5116_v46  ;;  %v8792_v46 = vld [vmem:[%s11297_s15 + $0x20] ss:$8 sps:$4 sm:$0xff]  }
 0xdff   : > { %7584 = vmatprep.subr.msk.bf16.mxu0 %vm3264_vm15, %v5109_v4  ;;  %v8795_v4 = vld [vmem:[%s11297_s15 + $0x30] ss:$8 sps:$4 sm:$0xff]   ;;  %vm6092_vm15 = vcmp.eq.s32.totalorder %v9165_v3, %v10649_v31 }
 0xe01   : > { %7583 = vmatmul.mubr.msk.bf16.vlgmr.msra.gmra.mrb[40].mxu0 %vm3261_vm1, %v5107_v19  ;;  %v8800_v19 = vld [vmem:[%s11297_s15 + $0x44] ss:$8 sps:$4 sm:$0xff]  }
 0xe02   : > { %5172 = vmatpush1.bf16.msra.mxu0 %v5166_v47  ;;  %5203 = vmatprep.mubr.bf16.mxu0 %v8991_v23  ;;  %v8798_v47 = vld [vmem:[%s11297_s15 + $0x40] ss:$8 sps:$4 sm:$0xff]  }
 0xe03   : > { %5681 = vmatprep.subr.bf16.mxu0 %v8716_v51  ;;  %v8806_v51 = vld [vmem:[%s11297_s15 + $0x64] ss:$8 sps:$4 sm:$0xff]  }
 0xe0d   : > { %7585 = vmatmul.mubr.msk.bf16.vlgmr.msra.gmra.mrb[40].mxu0 %vm3261_vm1, %v5103_v49  ;;  %v8803_v49 = vld [vmem:[%s11297_s15 + $0x54] ss:$8 sps:$4 sm:$0xff]   ;;  %vm6089_vm1 = vcmp.eq.s32.totalorder %v9165_v3, %v10644_v28 }
 0xe0e   : > { %5682 = vmatpush1.bf16.msra.mxu0 %v8714_v50  ;;  %v8801_v50 = vld [vmem:[%s11297_s15 + $0x50] ss:$8 sps:$4 sm:$0xff]  }
 0xe0f   : > { %5683 = vmatprep.subr.bf16.mxu0 %v8719_v52  ;;  %v8804_v52 = vld [vmem:[%s11297_s15 + $0x60] ss:$8 sps:$4 sm:$0xff]  }
 0xe12   : > { %5684 = vmatpush1.bf16.msra.mxu0 %v8717_v53  ;;  %v8809_v53 = vld [vmem:[%s11297_s15 + $0x74] ss:$8 sps:$4 sm:$0xff]  }
 0xe13   : > { %5685 = vmatprep.subr.bf16.mxu0 %v8722_v54  ;;  %v8807_v54 = vld [vmem:[%s11297_s15 + $0x70] ss:$8 sps:$4 sm:$0xff]  }
 0xe16   : > { %5686 = vmatpush1.bf16.msra.mxu0 %v8720_v21  ;;  %v8815_v21 = vld [vmem:[%s11297_s15 + $0x94] ss:$8 sps:$4 sm:$0xff]  }
 0xe17   : > { %5687 = vmatprep.subr.bf16.mxu0 %v8725_v6  ;;  %v8818_v6 = vld [vmem:[%s11297_s15 + $0xa4] ss:$8 sps:$4 sm:$0xff]  }
 0xe1a   : > { %5688 = vmatpush1.bf16.msra.mxu0 %v8723_v9  ;;  %v8819_v9 = vld [vmem:[%s11297_s15 + $0xb0] ss:$8 sps:$4 sm:$0xff]  }
 0xe1b   : > { %5689 = vmatprep.subr.bf16.mxu0 %v8728_v10  ;;  %v8824_v10 = vld [vmem:[%s11297_s15 + $0xc4] ss:$8 sps:$4 sm:$0xff]  }
 0xe1e   : > { %5690 = vmatpush1.bf16.msra.mxu0 %v8726_v11  ;;  %v8822_v11 = vld [vmem:[%s11297_s15 + $0xc0] ss:$8 sps:$4 sm:$0xff]  }
 0xe1f   : > { %5691 = vmatprep.subr.bf16.mxu0 %v8731_v12  ;;  %v8827_v12 = vld [vmem:[%s11297_s15 + $0xd4] ss:$8 sps:$4 sm:$0xff]  }
 0xe22   : > { %5692 = vmatpush1.bf16.msra.mxu0 %v8729_v14  ;;  %v8825_v14 = vld [vmem:[%s11297_s15 + $0xd0] ss:$8 sps:$4 sm:$0xff]  }
 0xee0   : > { %v5205_v55 = vpop.f32.mrb[40].mxu0 }
 0xee1   : > { %v10687_v59 = vpack.c.bf16 %v5205_v55, %v5205_v55  ;;  %v5207_v61 = vpop.f32.mrb[41].mxu0  ;;  %v8812_v55 = vld [vmem:[%s11297_s15 + $0x84] ss:$8 sps:$4 sm:$0xff]  }
 0xee2   : > { %v10692_v57 = vpack.c.bf16 %v5207_v61, %v5207_v61  ;;  %v5209_v62 = vpop.f32.mrb[42].mxu0  ;;  %v8810_v61 = vld [vmem:[%s11297_s15 + $0x80] ss:$8 sps:$4 sm:$0xff]  }
 0xee3   : > { %5409 = vrot.lane.b32.xlu1 %v10687_v59, %s11338_s1  ;;  %v5210_v7 = vpop.f32.mrb[43].mxu0  ;;  %v5314_v8 = vsel %vm2343_vm13, %v10687_v59, 0  ;;  %v8813_v62 = vld [vmem:[%s11297_s15 + $0x90] ss:$8 sps:$4 sm:$0xff]  }
 0xee4   : > { %7586 = vmatprep.subr.msk.bf16.mxu1 %vm2343_vm13, %v10692_v57  ;;  %v8816_v7 = vld [vmem:[%s11297_s15 + $0xa0] ss:$8 sps:$4 sm:$0xff]  }
 0xee5   : > { %5320 = vmatpush1.bf16.msra.mxu1 %v5314_v8 }
 0xee6   : > { %7588 = vmatprep.subr.msk.bf16.mxu1 %vm2343_vm13, %v10692_v57 }
 0xee7   : > { %5411 = vrot.lane.b32.xlu1 %v10692_v57, %s11338_s1 }
 0xee8   : > { %7587 = vmatmul.mubr.msk.bf16.vlgmr.msra.gmra.mrb[76].mxu1 %vm2340_vm14, %v10331_v63  ;;  %v8734_v63 = vld [vmem:[%s11296_s14 + $0x64] ss:$8 sps:$4 sm:$0xff]  }
 0xee9   : > { %5365 = vmatpush1.bf16.msra.mxu1 %v5314_v8  ;;  %5396 = vmatprep.mubr.bf16.mxu1 %v8991_v23  ;;  %v8821_v8 = vld [vmem:[%s11297_s15 + $0xb4] ss:$8 sps:$4 sm:$0xff]  }
 0xeea   : > { %5693 = vmatprep.subr.bf16.mxu0 %v8734_v63  ;;  %6005 = vmatprep.subr.bf16.mxu1 %v8788_v43  ;;  %v8830_v63 = vld [vmem:[%s11297_s15 + $0xe4] ss:$8 sps:$4 sm:$0xff]   ;;  %v8768_v43 = vld [vmem:[%s11296_s14 + $0x120] ss:$8 sps:$4 sm:$0xff]  }
 0xeeb   : > { %5694 = vmatpush1.bf16.msra.mxu0 %v8732_v16  ;;  %v8828_v16 = vld [vmem:[%s11297_s15 + $0xe0] ss:$8 sps:$4 sm:$0xff]  }
 0xeec   : > { %5695 = vmatprep.subr.bf16.mxu0 %v8737_v17  ;;  %v8833_v17 = vld [vmem:[%s11297_s15 + $0xf4] ss:$8 sps:$4 sm:$0xff]  }
 0xeef   : > { %5696 = vmatpush1.bf16.msra.mxu0 %v8735_v18  ;;  %v8831_v18 = vld [vmem:[%s11297_s15 + $0xf0] ss:$8 sps:$4 sm:$0xff]  }
 0xef0   : > { %7589 = vmatmul.mubr.msk.bf16.vlgmr.msra.gmra.mrb[80].mxu1 %vm2340_vm14, %v10335_v0  ;;  %v8740_v0 = vld [vmem:[%s11296_s14 + $0x84] ss:$8 sps:$4 sm:$0xff]  }
 0xef1   : > { %5697 = vmatprep.subr.bf16.mxu0 %v8740_v0  ;;  %6006 = vmatpush1.bf16.msra.mxu1 %v8786_v42  ;;  %v8836_v0 = vld [vmem:[%s11297_s15 + $0x104] ss:$8 sps:$4 sm:$0xff]  }
 0xef2   : > { %6007 = vmatprep.subr.bf16.mxu1 %v8791_v20  ;;  %v8773_v20 = vld [vmem:[%s11296_s14 + $0x134] ss:$8 sps:$4 sm:$0xff]  }
 0xef3   : > { %5698 = vmatpush1.bf16.msra.mxu0 %v8738_v25 }
 0xef4   : > { %5699 = vmatprep.subr.bf16.mxu0 %v8743_v15 }
 0xef5   : > { %6008 = vmatpush1.bf16.msra.mxu1 %v8789_v44 }
 0xef6   : > { %6009 = vmatprep.subr.bf16.mxu1 %v8794_v22  ;;  %v8771_v22 = vld [vmem:[%s11296_s14 + $0x130] ss:$8 sps:$4 sm:$0xff]  }
 0xef7   : > { %5700 = vmatpush1.bf16.msra.mxu0 %v8741_v26 }
 0xef8   : > { %5701 = vmatprep.subr.bf16.mxu0 %v8746_v24 }
 0xef9   : > { %6010 = vmatpush1.bf16.msra.mxu1 %v8792_v46  ;;  %v8776_v46 = vld [vmem:[%s11296_s14 + $0x144] ss:$8 sps:$4 sm:$0xff]  }
 0xefa   : > { %6011 = vmatprep.subr.bf16.mxu1 %v8797_v13  ;;  %v8774_v13 = vld [vmem:[%s11296_s14 + $0x140] ss:$8 sps:$4 sm:$0xff]  }
 0xefb   : > { %5702 = vmatpush1.bf16.msra.mxu0 %v8744_v27 }
 0xefc   : > { %5703 = vmatprep.subr.bf16.mxu0 %v8749_v29 }
 0xefd   : > { %6012 = vmatpush1.bf16.msra.mxu1 %v8795_v4  ;;  %v8779_v4 = vld [vmem:[%s11296_s14 + $0x154] ss:$8 sps:$4 sm:$0xff]  }
 0xefe   : > { %6013 = vmatprep.subr.bf16.mxu1 %v8800_v19  ;;  %v8777_v19 = vld [vmem:[%s11296_s14 + $0x150] ss:$8 sps:$4 sm:$0xff]  }
 0xeff   : > { %5704 = vmatpush1.bf16.msra.mxu0 %v8747_v30  ;;  %v8762_v30 = vld [vmem:[%s11296_s14 + $0x100] ss:$8 sps:$4 sm:$0xff]  }
 0xf00   : > { %5705 = vmatprep.subr.bf16.mxu0 %v8752_v32 }
 0xf01   : > { %6014 = vmatpush1.bf16.msra.mxu1 %v8798_v47  ;;  %v8782_v47 = vld [vmem:[%s11296_s14 + $0x164] ss:$8 sps:$4 sm:$0xff]  }
 0xf02   : > { %6015 = vmatprep.subr.bf16.mxu1 %v8803_v49  ;;  %v8780_v49 = vld [vmem:[%s11296_s14 + $0x160] ss:$8 sps:$4 sm:$0xff]  }
 0xf03   : > { %5706 = vmatpush1.bf16.msra.mxu0 %v8750_v33 }
 0xf04   : > { %5707 = vmatprep.subr.bf16.mxu0 %v8755_v34  ;;  %v8767_v34 = vld [vmem:[%s11296_s14 + $0x114] ss:$8 sps:$4 sm:$0xff]  }
 0xf05   : > { %6016 = vmatpush1.bf16.msra.mxu1 %v8801_v50  ;;  %v8785_v50 = vld [vmem:[%s11296_s14 + $0x174] ss:$8 sps:$4 sm:$0xff]  }
 0xf06   : > { %6017 = vmatprep.subr.bf16.mxu1 %v8806_v51  ;;  %v8783_v51 = vld [vmem:[%s11296_s14 + $0x170] ss:$8 sps:$4 sm:$0xff]  }
 0xf07   : > { %5708 = vmatpush1.bf16.msra.mxu0 %v8753_v35  ;;  %v8765_v35 = vld [vmem:[%s11296_s14 + $0x110] ss:$8 sps:$4 sm:$0xff]  }
 0xf08   : > { %5709 = vmatprep.subr.bf16.mxu0 %v8758_v36 }
 0xf09   : > { %6018 = vmatpush1.bf16.msra.mxu1 %v8804_v52 }
 0xf0a   : > { %6019 = vmatprep.subr.bf16.mxu1 %v8809_v53 }
 0xf0b   : > { %5710 = vmatpush1.bf16.msra.mxu0 %v8756_v37  ;;  %v8770_v37 = vld [vmem:[%s11296_s14 + $0x124] ss:$8 sps:$4 sm:$0xff]  }
 0xf0c   : > { %5711 = vmatprep.subr.bf16.mxu0 %v8761_v39 }
 0xf0d   : > { %6020 = vmatpush1.bf16.msra.mxu1 %v8807_v54 }
 0xf0e   : > { %6021 = vmatprep.subr.bf16.mxu1 %v8812_v55  ;;  %v8834_v55 = vld [vmem:[%s11297_s15 + $0x100] ss:$8 sps:$4 sm:$0xff]  }
 0xf0f   : > { %5712 = vmatpush1.bf16.msra.mxu0 %v8759_v40 }
 0xf10   : > { %5722 = vmatprep.subr.bf16.mxu0 %v8764_v41 }
 0xf11   : > { %6022 = vmatpush1.bf16.msra.mxu1 %v8810_v61 }
 0xf12   : > { %6023 = vmatprep.subr.bf16.mxu1 %v8815_v21  ;;  %v8839_v21 = vld [vmem:[%s11297_s15 + $0x114] ss:$8 sps:$4 sm:$0xff]  }
 0xf15   : > { %6024 = vmatpush1.bf16.msra.mxu1 %v8813_v62  ;;  %v8837_v62 = vld [vmem:[%s11297_s15 + $0x110] ss:$8 sps:$4 sm:$0xff]  }
 0xf16   : > { %6025 = vmatprep.subr.bf16.mxu1 %v8818_v6  ;;  %v8842_v6 = vld [vmem:[%s11297_s15 + $0x124] ss:$8 sps:$4 sm:$0xff]  }
 0xf19   : > { %6026 = vmatpush1.bf16.msra.mxu1 %v8816_v7  ;;  %v8843_v7 = vld [vmem:[%s11297_s15 + $0x130] ss:$8 sps:$4 sm:$0xff]  }
 0xf1a   : > { %6027 = vmatprep.subr.bf16.mxu1 %v8821_v8  ;;  %v8848_v8 = vld [vmem:[%s11297_s15 + $0x144] ss:$8 sps:$4 sm:$0xff]  }
 0xf1d   : > { %6028 = vmatpush1.bf16.msra.mxu1 %v8819_v9  ;;  %v8846_v9 = vld [vmem:[%s11297_s15 + $0x140] ss:$8 sps:$4 sm:$0xff]  }
 0xf1e   : > { %6029 = vmatprep.subr.bf16.mxu1 %v8824_v10  ;;  %v8851_v10 = vld [vmem:[%s11297_s15 + $0x154] ss:$8 sps:$4 sm:$0xff]  }
 0xf21   : > { %6030 = vmatpush1.bf16.msra.mxu1 %v8822_v11  ;;  %v8849_v11 = vld [vmem:[%s11297_s15 + $0x150] ss:$8 sps:$4 sm:$0xff]  }
 0xf22   : > { %6031 = vmatprep.subr.bf16.mxu1 %v8827_v12  ;;  %v8854_v12 = vld [vmem:[%s11297_s15 + $0x164] ss:$8 sps:$4 sm:$0xff]  }
 0xf25   : > { %6032 = vmatpush1.bf16.msra.mxu1 %v8825_v14  ;;  %v8852_v14 = vld [vmem:[%s11297_s15 + $0x160] ss:$8 sps:$4 sm:$0xff]  }
 0xf26   : > { %6033 = vmatprep.subr.bf16.mxu1 %v8830_v63  ;;  %v8857_v63 = vld [vmem:[%s11297_s15 + $0x174] ss:$8 sps:$4 sm:$0xff]  }
 0xf29   : > { %6034 = vmatpush1.bf16.msra.mxu1 %v8828_v16  ;;  %v8855_v16 = vld [vmem:[%s11297_s15 + $0x170] ss:$8 sps:$4 sm:$0xff]  }
 0xf2a   : > { %6035 = vmatprep.subr.bf16.mxu1 %v8833_v17 }
 0xf2d   : > { %6036 = vmatpush1.bf16.msra.mxu1 %v8831_v18 }
 0xf2e   : > { %6046 = vmatprep.subr.bf16.mxu1 %v8836_v0 }
 0xf55   : > { %v5410_v27 = vpop.permute.xlu1 %5409 }
 0xf59   : > { %v5412_v52 = vpop.permute.xlu1 %5411 }
 0xf5a   : > { %v5413_v53 = vsel %vm970_vm11, %v5410_v27, %v5412_v52  ;;  %v8870_v52 = vld [vmem:[%s11299_s17 + $0x50] sm:$0xff]  }
 0xfbb   : > { %v5353_v25 = vpop.f32.mrb[76].mxu1 }
 0xfbc   : > { %v5355_v15 = vpop.f32.mrb[77].mxu1  ;;  %v5360_v32 = vpack.c.bf16 %v5353_v25, %v5353_v25 }
 0xfbd   : > { %v5361_v26 = vpack.c.bf16 %v5355_v15, %v5355_v15  ;;  %v5357_v24 = vpop.f32.mrb[78].mxu1 }
 0xfbe   : > { %v5358_v29 = vpop.f32.mrb[79].mxu1  ;;  %v5310_v24 = vld [vmem:[%s11298_s16] sm:$0x3] }
 0xfbf   : > { %v5417_v33 = vsel %vm970_vm11, %v5361_v26, %v5410_v27  ;;  %v5434_v27 = vrot.slane %v5310_v24, %v9377_v58  ;;  %v5438_v29 = vrot.slane %v5310_v24, %v9383_v60  ;;  %v6093_v58 = vsel %vm6092_vm15, 1.0, %v8986_v1  ;;  %v8881_v24 = vld [vmem:[%s11299_s17 + $0x38] sm:$0xff]  }
 0xfc0   : > { %5713 = vmatprep.mubr.bf16.mxu0 %v5417_v33 }
 0xfc1   : > { %5714 = vmatmul.mubr.bf16.vlgmr.msra.gmra.mrb[44].mxu0 %v5360_v32 }
 0xfc2   : > { %5723 = vmatpush1.bf16.msra.mxu0 %v8762_v30  ;;  %5754 = vmatprep.mubr.bf16.mxu0 %v8991_v23 }
 0xfc3   : > { %v5398_v36 = vpop.f32.mrb[80].mxu1  ;;  %5724 = vmatprep.subr.bf16.mxu0 %v8767_v34 }
 0xfc4   : > { %v5405_v39 = vpack.c.bf16 %v5398_v36, %v5398_v36  ;;  %v5400_v40 = vpop.f32.mrb[81].mxu1 }
 0xfc5   : > { %v5402_v41 = vpop.f32.mrb[82].mxu1  ;;  %v5406_v44 = vpack.c.bf16 %v5400_v40, %v5400_v40 }
 0xfc6   : > { %5725 = vmatpush1.bf16.msra.mxu0 %v8765_v35  ;;  %5421 = vrot.lane.b32.xlu0 %v5405_v39, %s11338_s1  ;;  %v5403_v42 = vpop.f32.mrb[83].mxu1 }
 0xfc7   : > { %5726 = vmatprep.subr.bf16.mxu0 %v8770_v37 }
 0xfca   : > { %5727 = vmatpush1.bf16.msra.mxu0 %v8768_v43  ;;  %5423 = vrot.lane.b32.xlu0 %v5406_v44, %s11338_s1 }
 0xfcb   : > { %5728 = vmatprep.subr.bf16.mxu0 %v8773_v20 }
 0xfce   : > { %5729 = vmatpush1.bf16.msra.mxu0 %v8771_v22 }
 0xfcf   : > { %5730 = vmatprep.subr.bf16.mxu0 %v8776_v46 }
 0xfd2   : > { %5731 = vmatpush1.bf16.msra.mxu0 %v8774_v13  ;;  %v11002_v13 = vpack.c.bf16 %v6093_v58, %v10654_v45  ;;  %v8866_v45 = vld [vmem:[%s11299_s17 + $0x40] sm:$0xff]  }
 0xfd3   : > { %5732 = vmatprep.subr.bf16.mxu0 %v8779_v4 }
 0xfd6   : > { %5733 = vmatpush1.bf16.msra.mxu0 %v8777_v19  ;;  %v6090_v19 = vsel %vm6089_vm1, 1.0, %v8986_v1 }
 0xfd7   : > { %5734 = vmatprep.subr.bf16.mxu0 %v8782_v47  ;;  %v11013_v47 = vpack.c.bf16 %v6090_v19, %v10667_v48  ;;  %v8869_v48 = vld [vmem:[%s11299_s17 + $0x8] sm:$0xff]  }
 0xfda   : > { %5735 = vmatpush1.bf16.msra.mxu0 %v8780_v49  ;;  %v8867_v49 = vld [vmem:[%s11299_s17] sm:$0xff]  }
 0xfdb   : > { %5736 = vmatprep.subr.bf16.mxu0 %v8785_v50  ;;  %v8868_v50 = vld [vmem:[%s11299_s17 + $0x48] sm:$0xff]  }
 0xfde   : > { %5737 = vmatpush1.bf16.msra.mxu0 %v8783_v51  ;;  %v6302_v51 = vadd.s32 4294967295, %v9165_v3 }
 0xfe1   : > { %5755 = vmatmul.mubr.bf16.vlgmr.msra.gmra.mrb[44].mxu0 %v5413_v53 }
 0xfe2   : > { %6140 = vmatprep.mubr.bf16.mxu0 %v8991_v23 }
0x1038   : > { %v5422_v54 = vpop.permute.xlu0 %5421 }
0x1039   : > { %v5428_v61 = vsel %vm970_vm11, %v10692_v57, %v5422_v54  ;;  %v8840_v57 = vld [vmem:[%s11297_s15 + $0x120] ss:$8 sps:$4 sm:$0xff]  }
0x103a   : > { %6037 = vmatprep.mubr.bf16.mxu1 %v5428_v61 }
0x103b   : > { %6038 = vmatmul.mubr.bf16.vlgmr.msra.gmra.mrb[84].mxu1 %v10687_v59  ;;  %v8845_v59 = vld [vmem:[%s11297_s15 + $0x134] ss:$8 sps:$4 sm:$0xff]  }
0x103c   : > { %6047 = vmatpush1.bf16.msra.mxu1 %v8834_v55  ;;  %6078 = vmatprep.mubr.bf16.mxu1 %v8991_v23  ;;  %v5424_v17 = vpop.permute.xlu0 %5423  ;;  %v8871_v55 = vld [vmem:[%s11299_s17 + $0x10] sm:$0xff]  }
0x103d   : > { %6048 = vmatprep.subr.bf16.mxu1 %v8839_v21  ;;  %v5425_v18 = vsel %vm970_vm11, %v5422_v54, %v5424_v17  ;;  %v8863_v17 = vld [vmem:[%s11299_s17 + $0xa8] sm:$0xff]  }
0x1040   : > { %6049 = vmatpush1.bf16.msra.mxu1 %v8837_v62 }
0x1041   : > { %6050 = vmatprep.subr.bf16.mxu1 %v8842_v6 }
0x1044   : > { %6051 = vmatpush1.bf16.msra.mxu1 %v8840_v57  ;;  %v8872_v57 = vld [vmem:[%s11299_s17 + $0x58] sm:$0xff]  }
0x1045   : > { %6052 = vmatprep.subr.bf16.mxu1 %v8845_v59 }
0x1048   : > { %6053 = vmatpush1.bf16.msra.mxu1 %v8843_v7  ;;  %v6354_v7 = vadd.s32 1, %v9165_v3  ;;  %v8875_v3 = vld [vmem:[%s11299_s17 + $0x20] sm:$0xff]  }
0x1049   : > { %6054 = vmatprep.subr.bf16.mxu1 %v8848_v8  ;;  %v8873_v8 = vld [vmem:[%s11299_s17 + $0x18] sm:$0xff]  }
0x104c   : > { %6055 = vmatpush1.bf16.msra.mxu1 %v8846_v9 }
0x104d   : > { %6056 = vmatprep.subr.bf16.mxu1 %v8851_v10  ;;  %v8874_v10 = vld [vmem:[%s11299_s17 + $0x60] sm:$0xff]  }
0x1050   : > { %6057 = vmatpush1.bf16.msra.mxu1 %v8849_v11 }
0x1051   : > { %6058 = vmatprep.subr.bf16.mxu1 %v8854_v12 }
0x1054   : > { %6059 = vmatpush1.bf16.msra.mxu1 %v8852_v14  ;;  %v8858_v14 = vld [vmem:[%s11299_s17 + $0x80] sm:$0xff]  }
0x1055   : > { %6060 = vmatprep.subr.bf16.mxu1 %v8857_v63  ;;  %v8861_v63 = vld [vmem:[%s11299_s17 + $0x98] sm:$0xff]  }
0x1058   : > { %6061 = vmatpush1.bf16.msra.mxu1 %v8855_v16  ;;  %v8862_v16 = vld [vmem:[%s11299_s17 + $0xa0] sm:$0xff]  }
0x105b   : > { %6079 = vmatmul.mubr.bf16.vlgmr.msra.gmra.mrb[84].mxu1 %v5425_v18  ;;  %v8864_v18 = vld [vmem:[%s11299_s17 + $0xb0] sm:$0xff]  }
0x105c   : > { %6341 = vmatprep.mubr.bf16.mxu1 %v8991_v23 }
0x10b4   : > { %v5756_v0 = vpop.f32.mrb[44].mxu0 }
0x10b5   : > { %v5758_v25 = vpop.f32.mrb[45].mxu0  ;;  %v7996_v30 = vadd.f32 %v5756_v0, %v5434_v27  ;;  %v8865_v0 = vld [vmem:[%s11299_s17 + $0xb8] sm:$0xff]  }
0x10b6   : > { %v5760_v15 = vpop.f32.mrb[46].mxu0  ;;  %v7997_v32 = vadd.f32 %v5758_v25, %v5438_v29  ;;  %v8878_v25 = vld [vmem:[%s11299_s17 + $0x70] sm:$0xff]  }
0x10b7   : > { %v5761_v26 = vpop.f32.mrb[47].mxu0  ;;  %v5763_v41 = vmax.f32 %v7996_v30, 0.0  ;;  %v8879_v15 = vld [vmem:[%s11299_s17 + $0x30] sm:$0xff]   ;;  %v8884_v30 = vld [vmem:[%s11300_s18 + $0x80] sm:$0xff]  }
0x10b8   : > { %v5764_v42 = vmax.f32 %v7997_v32, 0.0  ;;  %v8880_v26 = vld [vmem:[%s11299_s17 + $0x78] sm:$0xff]  }
0x10b9   : > { %v6095_v22 = vpack.c.bf16 %v5763_v41, %v5763_v41  ;;  %v8904_v41 = vld [vmem:[%s11300_s18 + $0xb8] sm:$0xff]  }
0x10ba   : > { %v6096_v46 = vpack.c.bf16 %v5764_v42, %v5764_v42 }
0x10bb   : > { %v6155_v4 = vsel %vm2343_vm13, %v6095_v22, 0  ;;  %v8883_v22 = vld [vmem:[%s11300_s18] sm:$0xff]  }
0x112e   : > { %v6080_v33 = vpop.f32.mrb[84].mxu1 }
0x112f   : > { %v7998_v34 = vadd.f32 %v6080_v33, %v5434_v27  ;;  %v6082_v35 = vpop.f32.mrb[85].mxu1  ;;  %v8882_v27 = vld [vmem:[%s11300_s18 + $0x40] sm:$0xff]  }
0x1130   : > { %v7999_v36 = vadd.f32 %v6082_v35, %v5438_v29  ;;  %v6084_v37 = vpop.f32.mrb[86].mxu1  ;;  %v8890_v35 = vld [vmem:[%s11300_s18 + $0x90] sm:$0xff]  }
0x1131   : > { %v6087_v39 = vmax.f32 %v7998_v34, 0.0  ;;  %v6085_v40 = vpop.f32.mrb[87].mxu1  ;;  %v8887_v34 = vld [vmem:[%s11300_s18 + $0x88] sm:$0xff]   ;;  %v8896_v37 = vld [vmem:[%s11300_s18 + $0xa0] sm:$0xff]  }
0x1132   : > { %v6088_v43 = vmax.f32 %v7999_v36, 0.0  ;;  %v8893_v36 = vld [vmem:[%s11300_s18 + $0x98] sm:$0xff]   ;;  %v8902_v40 = vld [vmem:[%s11300_s18 + $0xb0] sm:$0xff]  }
0x1133   : > { %v6097_v20 = vpack.c.bf16 %v6087_v39, %v6087_v39  ;;  %v8899_v39 = vld [vmem:[%s11300_s18 + $0xa8] sm:$0xff]  }
0x1134   : > { %v6098_v44 = vpack.c.bf16 %v6088_v43, %v6088_v43 }
0x1135   : > { %v6103_v60 = vsel %vm2343_vm13, %v6097_v20, 0 }
0x1136   : > { %7686 = vmatprep.subr.msk.bf16.mxu0 %vm2343_vm13, %v6098_v44 }
0x1137   : > { %6109 = vmatpush1.bf16.msra.mxu0 %v6103_v60 }
0x1138   : > { %7688 = vmatprep.subr.msk.bf16.mxu0 %vm2343_vm13, %v6096_v46  ;;  %vm6303_vm13 = vcmp.eq.s32.totalorder %v9173_v5, %v6302_v51  ;;  %v8888_v51 = vld [vmem:[%s11300_s18 + $0x50] sm:$0xff]  }
0x1139   : > { %v6304_v6 = vsel %vm6303_vm13, 1.0, %v8986_v1 }
0x113a   : > { %7687 = vmatmul.mubr.msk.bf16.vlgmr.msra.gmra.mrb[48].mxu0 %vm2340_vm14, %v11002_v13  ;;  %v6305_v9 = vpack.c.bf16 %v6304_v6, %v10308_v56  ;;  %v8876_v56 = vld [vmem:[%s11299_s17 + $0x68] sm:$0xff]   ;;  %v8895_v6 = vld [vmem:[%s11300_s18 + $0x20] sm:$0xff]  }
0x113b   : > { %6161 = vmatpush1.bf16.msra.mxu0 %v6155_v4  ;;  %6192 = vmatprep.mubr.bf16.mxu0 %v8991_v23  ;;  %v8885_v4 = vld [vmem:[%s11300_s18 + $0x48] sm:$0xff]  }
0x113c   : > { %7832 = vmatprep.subr.bf16.mxu0 %v8866_v45 }
0x1146   : > { %7689 = vmatmul.mubr.msk.bf16.vlgmr.msra.gmra.mrb[48].mxu0 %vm2340_vm14, %v11013_v47  ;;  %vm6355_vm14 = vcmp.eq.s32.totalorder %v9173_v5, %v6354_v7  ;;  %v8877_v5 = vld [vmem:[%s11299_s17 + $0x28] sm:$0xff]  }
0x1147   : > { %7833 = vmatpush3.bf16.msra.mxu0 %v8867_v49  ;;  %v6356_v11 = vsel %vm6355_vm14, 1.0, %v8986_v1  ;;  %v8886_v49 = vld [vmem:[%s11300_s18 + $0x8] sm:$0xff]  }
0x1148   : > { %7834 = vmatprep.subr.bf16.mxu0 %v8868_v50  ;;  %v6357_v12 = vpack.c.bf16 %v6356_v11, %v10314_v38  ;;  %v8860_v38 = vld [vmem:[%s11299_s17 + $0x90] sm:$0xff]   ;;  %v8898_v7 = vld [vmem:[%s11300_s18 + $0x28] sm:$0xff]  }
0x114b   : > { %7835 = vmatpush3.bf16.msra.mxu0 %v8869_v48 }
0x114c   : > { %7836 = vmatprep.subr.bf16.mxu0 %v8870_v52 }
0x114f   : > { %7837 = vmatpush3.bf16.msra.mxu0 %v8871_v55  ;;  %v8891_v55 = vld [vmem:[%s11300_s18 + $0x58] sm:$0xff]  }
0x1150   : > { %7838 = vmatprep.subr.bf16.mxu0 %v8872_v57  ;;  %v8897_v57 = vld [vmem:[%s11300_s18 + $0x68] sm:$0xff]  }
0x1153   : > { %7839 = vmatpush3.bf16.msra.mxu0 %v8873_v8  ;;  %v8900_v8 = vld [vmem:[%s11300_s18 + $0x70] sm:$0xff]  }
0x1154   : > { %7840 = vmatprep.subr.bf16.mxu0 %v8874_v10  ;;  %v8903_v10 = vld [vmem:[%s11300_s18 + $0x78] sm:$0xff]  }
0x1157   : > { %7841 = vmatpush3.bf16.msra.mxu0 %v8875_v3  ;;  %v8905_v3 = vld [vmem:[%s11300_s18 + $0x38] sm:$0xff]  }
0x1158   : > { %7842 = vmatprep.subr.bf16.mxu0 %v8876_v56 }
0x115b   : > { %7843 = vmatpush3.bf16.msra.mxu0 %v8877_v5 }
0x115c   : > { %7844 = vmatprep.subr.bf16.mxu0 %v8878_v25 }
0x115f   : > { %7845 = vmatpush3.bf16.msra.mxu0 %v8879_v15 }
0x1160   : > { %7846 = vmatprep.subr.bf16.mxu0 %v8880_v26 }
0x1163   : > { %7847 = vmatpush3.bf16.msra.mxu0 %v8881_v24 }
0x1164   : > { %7863 = vmatprep.subr.bf16.mxu0 %v8882_v27 }
0x1219   : > { %v6194_v53 = vpop.f32.mrb[48].mxu0 }
0x121a   : > { %v6196_v54 = vpop.f32.mrb[49].mxu0 }
0x121b   : > { %v6198_v61 = vpop.f32.mrb[50].mxu0 }
0x121c   : > { %v11037_v21 = vpack.c.bf16 %v6198_v61, %v6194_v53  ;;  %v6200_v62 = vpop.f32.mrb[51].mxu0  ;;  %v8892_v61 = vld [vmem:[%s11300_s18 + $0x18] sm:$0xff]  }
0x121d   : > { %v11043_v59 = vpack.c.bf16 %v6200_v62, %v6196_v54  ;;  %v8889_v54 = vld [vmem:[%s11300_s18 + $0x10] sm:$0xff]   ;;  %v8894_v62 = vld [vmem:[%s11300_s18 + $0x60] sm:$0xff]  }
0x121e   : > { %6408 = vrot.lane.b32.xlu0 %v11037_v21, %s11338_s1 }
0x121f   : > { %6410 = vrot.lane.b32.xlu1 %v11043_v59, %s11338_s1  ;;  %6309 = vmatprep.subr.bf16.mxu1 %v11043_v59 }
0x1220   : > { %6310 = vmatpush1.bf16.msra.mxu1 %v11037_v21 }
0x1221   : > { %6361 = vmatprep.subr.bf16.mxu1 %v11043_v59 }
0x1223   : > { %7690 = vmatmul.mubr.msk.bf16.vlgmr.msra.gmra.mrb[88].mxu1 %vm1419_vm12, %v6305_v9  ;;  %v8901_v9 = vld [vmem:[%s11300_s18 + $0x30] sm:$0xff]  }
0x1224   : > { %6362 = vmatpush1.bf16.msra.mxu1 %v11037_v21  ;;  %6393 = vmatprep.mubr.bf16.mxu1 %v8991_v23  ;;  %v8859_v23 = vld [vmem:[%s11299_s17 + $0x88] sm:$0xff]  }
0x1225   : > { %7932 = vmatprep.subr.bf16.mxu1 %v8986_v1 }
0x122b   : > { %7691 = vmatmul.mubr.msk.bf16.vlgmr.msra.gmra.mrb[92].mxu1 %vm1419_vm12, %v6357_v12 }
0x122c   : > { %7933 = vmatpush3.bf16.msra.mxu1 %v8858_v14  ;;  %7948 = vmatprep.mubr.msk.bf16.mxu1 %vm8987_vm0, %v8986_v1 }
0x122d   : > { %7934 = vmatprep.subr.bf16.mxu1 %v8986_v1 }
0x1230   : > { %7935 = vmatpush3.bf16.msra.mxu1 %v8859_v23 }
0x1231   : > { %7936 = vmatprep.subr.bf16.mxu1 %v8986_v1 }
0x1234   : > { %7937 = vmatpush3.bf16.msra.mxu1 %v8860_v38 }
0x1235   : > { %7938 = vmatprep.subr.bf16.mxu1 %v8986_v1 }
0x1238   : > { %7939 = vmatpush3.bf16.msra.mxu1 %v8861_v63 }
0x1239   : > { %7940 = vmatprep.subr.bf16.mxu1 %v8986_v1 }
0x123c   : > { %7941 = vmatpush3.bf16.msra.mxu1 %v8862_v16 }
0x123d   : > { %7942 = vmatprep.subr.bf16.mxu1 %v8986_v1 }
0x1240   : > { %7943 = vmatpush3.bf16.msra.mxu1 %v8863_v17  ;;  %v7692_v17 = vld [vmem:[%s11301_s19] ss:$0 sm:$0xff] }
0x1241   : > { %7944 = vmatprep.subr.bf16.mxu1 %v8986_v1 }
0x1244   : > { %7945 = vmatpush3.bf16.msra.mxu1 %v8864_v18 }
0x1245   : > { %7946 = vmatprep.subr.bf16.mxu1 %v8986_v1 }
0x1248   : > { %7947 = vmatpush3.bf16.msra.mxu1 %v8865_v0 }
0x1249   : > { %7952 = vmatprep.subr.bf16.mxu1 %v8986_v1 }
0x1290   : > { %v6409_v29 = vpop.permute.xlu0 %6408 }
0x1291   : > { %v6411_v32 = vpop.permute.xlu1 %6410 }
0x1292   : > { %v6412_v33 = vsel %vm970_vm11, %v6409_v29, %v6411_v32 }
0x1293   : > { %7949 = vmatmul.mubr.bf16.vlgmr.msra.gmra.mrb[96].mxu1 %v6412_v33 }
0x1294   : > { %7953 = vmatpush3.bf16.msra.mxu1 %v8884_v30  ;;  %7968 = vmatprep.mubr.msk.bf16.mxu1 %vm8987_vm0, %v8986_v1 }
0x1295   : > { %7954 = vmatprep.subr.bf16.mxu1 %v8986_v1 }
0x1298   : > { %7955 = vmatpush3.bf16.msra.mxu1 %v8887_v34 }
0x1299   : > { %7956 = vmatprep.subr.bf16.mxu1 %v8986_v1 }
0x129c   : > { %7957 = vmatpush3.bf16.msra.mxu1 %v8890_v35 }
0x129d   : > { %7958 = vmatprep.subr.bf16.mxu1 %v8986_v1 }
0x12a0   : > { %7959 = vmatpush3.bf16.msra.mxu1 %v8893_v36 }
0x12a1   : > { %7960 = vmatprep.subr.bf16.mxu1 %v8986_v1 }
0x12a4   : > { %7961 = vmatpush3.bf16.msra.mxu1 %v8896_v37 }
0x12a5   : > { %7962 = vmatprep.subr.bf16.mxu1 %v8986_v1 }
0x12a8   : > { %7963 = vmatpush3.bf16.msra.mxu1 %v8899_v39 }
0x12a9   : > { %7964 = vmatprep.subr.bf16.mxu1 %v8986_v1 }
0x12ac   : > { %7965 = vmatpush3.bf16.msra.mxu1 %v8902_v40 }
0x12ad   : > { %7966 = vmatprep.subr.bf16.mxu1 %v8986_v1 }
0x12b0   : > { %7967 = vmatpush3.bf16.msra.mxu1 %v8904_v41 }
0x12f6   : > { %v6343_v42 = vpop.f32.mrb[88].mxu1 }
0x12f7   : > { %v6345_v43 = vpop.f32.mrb[89].mxu1 }
0x12f8   : > { %v6347_v20 = vpop.f32.mrb[90].mxu1 }
0x12f9   : > { %v6352_v58 = vpack.c.bf16 %v6347_v20, %v6343_v42  ;;  %v6349_v44 = vpop.f32.mrb[91].mxu1 }
0x12fa   : > { %v6353_v60 = vpack.c.bf16 %v6349_v44, %v6345_v43 }
0x12fc   : > { %v6416_v46 = vsel %vm970_vm11, %v6353_v60, %v6409_v29 }
0x12fd   : > { %6612 = vmatprep.mubr.bf16.mxu0 %v6416_v46 }
0x12fe   : > { %v6395_v19 = vpop.f32.mrb[92].mxu1  ;;  %6613 = vmatmul.mubr.bf16.vlgmr.msra.gmra.mrb[52].mxu0 %v6352_v58 }
0x12ff   : > { %v6397_v45 = vpop.f32.mrb[93].mxu1  ;;  %7864 = vmatpush3.bf16.msra.mxu0 %v8883_v22 }
0x1300   : > { %v6399_v50 = vpop.f32.mrb[94].mxu1  ;;  %7865 = vmatprep.subr.bf16.mxu0 %v8885_v4 }
0x1301   : > { %v6404_v48 = vpack.c.bf16 %v6399_v50, %v6395_v19  ;;  %v6401_v52 = vpop.f32.mrb[95].mxu1 }
0x1302   : > { %v6405_v53 = vpack.c.bf16 %v6401_v52, %v6397_v45 }
0x1303   : > { %6420 = vrot.lane.b32.xlu0 %v6404_v48, %s11338_s1  ;;  %7866 = vmatpush3.bf16.msra.mxu0 %v8886_v49 }
0x1304   : > { %6422 = vrot.lane.b32.xlu1 %v6405_v53, %s11338_s1  ;;  %7867 = vmatprep.subr.bf16.mxu0 %v8888_v51  ;;  %s8992_s1 = smov [#allocation2]  }
0x1305   : > { %s8926_s22 = sshll.u32 %s8992_s1, 4  ;;  %s8927_s22 = int_to_ptr.vmem [resolvable:$false] %s8926_s22 }
0x1306   : > { %s8928_s4 = scalar_lea.vmem %s8927_s22, 32  ;;  %p8929_p0 = scmp.lt.s32.totalorder %s7057_s30, %s8927_s22 }
0x1307   : > { %7868 = vmatpush3.bf16.msra.mxu0 %v8889_v54  ;;  %v6912_v54 = vadd.s32 16, %v9158_v2  ;;  %p8930_p1 = scmp.lt.s32.totalorder %s8928_s4, %s8922_s26 }
0x1308   : > { %7869 = vmatprep.subr.bf16.mxu0 %v8891_v55  ;;  %v6913_v55 = vadd.s32 24, %v9158_v2 }
0x1309   : > { %vm6919_vm0 = vcmp.eq.s32.totalorder %v6912_v54, %v10649_v31  ;;  %vm6914_vm6 = vcmp.eq.s32.totalorder %v6912_v54, %v10644_v28  ;;  %p8931_p2 = por %p8930_p1, %p8929_p0 }
0x130a   : > { %vm6915_vm7 = vcmp.eq.s32.totalorder %v6913_v55, %v10644_v28  ;;  %v6916_v2 = vsel %vm6914_vm6, 1.0, %v8986_v1 }
0x130b   : > { %7870 = vmatpush3.bf16.msra.mxu0 %v8892_v61  ;;  %p8932_p3 = pnand %p8931_p2, %p8925_p13 }
0x130c   : > { %7871 = vmatprep.subr.bf16.mxu0 %v8894_v62 }
0x130f   : > { %7872 = vmatpush3.bf16.msra.mxu0 %v8895_v6  ;;  %v6921_v6 = vsel %vm6919_vm0, 1.0, %v8986_v1 }
0x1310   : > { %7873 = vmatprep.subr.bf16.mxu0 %v8897_v57 }
0x1313   : > { %7874 = vmatpush3.bf16.msra.mxu0 %v8898_v7 }
0x1314   : > { %7875 = vmatprep.subr.bf16.mxu0 %v8900_v8 }
0x1317   : > { %7876 = vmatpush3.bf16.msra.mxu0 %v8901_v9 }
0x1318   : > { %7877 = vmatprep.subr.bf16.mxu0 %v8903_v10 }
0x131b   : > { %7878 = vmatpush3.bf16.msra.mxu0 %v8905_v3 }
0x1366   : > { %v6655_v56 = vpop.f32.mrb[96].mxu1 }
0x1367   : > { %v7950_v11 = vpop.f32.mrb[97].mxu1 }
0x1368   : > { %v6658_v5 = vpop.f32.mrb[98].mxu1 }
0x1369   : > { %v7951_v12 = vpop.f32.mrb[99].mxu1 }
0x1375   : > { %v6421_v14 = vpop.permute.xlu0 %6420 }
0x1376   : > { %v6423_v23 = vpop.permute.xlu1 %6422  ;;  %v6428_v38 = vsel %vm970_vm11, %v11043_v59, %v6421_v14 }
0x1377   : > { %v6424_v63 = vsel %vm970_vm11, %v6421_v14, %v6423_v23  ;;  %6850 = vmatprep.mubr.bf16.mxu0 %v6428_v38  ;;  %vm6920_vm11 = vcmp.eq.s32.totalorder %v6913_v55, %v10649_v31  ;;  %v6917_v31 = vsel %vm6915_vm7, 1.0, %v8986_v1 }
0x1378   : > { %6851 = vmatmul.mubr.bf16.vlgmr.msra.gmra.mrb[56].mxu0 %v11037_v21  ;;  %7969 = vmatmul.mubr.bf16.vlgmr.msra.gmra.mrb[100].mxu1 %v6424_v63  ;;  %v6922_v57 = vsel %vm6920_vm11, 1.0, %v8986_v1  ;;  %v6918_v9 = vpack.c.bf16 %v6917_v31, %v6916_v2 }
0x1379   : > { %7974 = vmatprep.mubr.msk.bf16.mxu0 %vm1419_vm12, %v11002_v13  ;;  %v6923_v8 = vpack.c.bf16 %v6922_v57, %v6921_v6 }
0x13d1   : > { %v7848_v16 = vpop.f32.mrb[52].mxu0 }
0x13d2   : > { %v7849_v18 = vpop.f32.mrb[53].mxu0 }
0x13d3   : > { %v7850_v0 = vadd.f32 %v7849_v18, %v7848_v16  ;;  %v7851_v25 = vpop.f32.mrb[54].mxu0 }
0x13d4   : > { %v7852_v15 = vpop.f32.mrb[55].mxu0 }
0x13d5   : > { %v6615_v26 = vadd.f32 %v7850_v0, %v7692_v17  ;;  %v7853_v59 = vadd.f32 %v7852_v15, %v7851_v25 }
0x13d7   : > { %v6656_v24 = vadd.f32 %v6655_v56, %v6615_v26  ;;  %v6618_v27 = vadd.f32 %v7853_v59, %v7692_v17 }
0x13d9   : > { %v7717_v29 = vmul.f32 -1.442695, %v6656_v24  ;;  %v6659_v30 = vadd.f32 %v6658_v5, %v6618_v27 }
0x13db   : > { %8906 = vpow2.f32 %v7717_v29  ;;  %v7718_v21 = vmul.f32 -1.442695, %v6659_v30 }
0x13dd   : > { %8908 = vpow2.f32 %v7718_v21 }
0x13e5   : > { %v8907_v32 = vpop.eup %8906 }
0x13e6   : > { %v6668_v13 = vadd.f32 1.0, %v8907_v32 }
0x13e7   : > { %v8909_v33 = vpop.eup %8908 }
0x13e8   : > { %v6669_v34 = vadd.f32 1.0, %v8909_v33  ;;  %8910 = vrcp.f32 %v6668_v13 }
0x13ea   : > { %8912 = vrcp.f32 %v6669_v34 }
0x13f2   : > { %v8911_v35 = vpop.eup %8910 }
0x13f4   : > { %v8913_v36 = vpop.eup %8912 }
0x13f5   : > { %v6924_v37 = vpack.c.bf16 %v8913_v36, %v8911_v35 }
0x144b   : > { %v7879_v39 = vpop.f32.mrb[56].mxu0  ;;  %v6893_v40 = vpop.f32.mrb[100].mxu1 }
0x144c   : > { %v7880_v41 = vpop.f32.mrb[57].mxu0  ;;  %v7970_v42 = vpop.f32.mrb[101].mxu1 }
0x144d   : > { %v7881_v43 = vadd.f32 %v7880_v41, %v7879_v39  ;;  %v7882_v20 = vpop.f32.mrb[58].mxu0  ;;  %v6896_v58 = vpop.f32.mrb[102].mxu1 }
0x144e   : > { %v7883_v44 = vpop.f32.mrb[59].mxu0  ;;  %v7971_v60 = vpop.f32.mrb[103].mxu1 }
0x144f   : > { %v6853_v22 = vadd.f32 %v7881_v43, %v7692_v17  ;;  %v7884_v46 = vadd.f32 %v7883_v44, %v7882_v20 }
0x1451   : > { %v6894_v4 = vadd.f32 %v6893_v40, %v6853_v22  ;;  %v6856_v19 = vadd.f32 %v7884_v46, %v7692_v17 }
0x1453   : > { %v7743_v45 = vmul.f32 -1.442695, %v6894_v4  ;;  %v6897_v49 = vadd.f32 %v6896_v58, %v6856_v19 }
0x1455   : > { %8914 = vpow2.f32 %v7743_v45  ;;  %v7744_v50 = vmul.f32 -1.442695, %v6897_v49 }
0x1457   : > { %8916 = vpow2.f32 %v7744_v50 }
0x145f   : > { %v8915_v51 = vpop.eup %8914 }
0x1460   : > { %v6906_v48 = vadd.f32 1.0, %v8915_v51 }
0x1461   : > { %v8917_v52 = vpop.eup %8916 }
0x1462   : > { %v6907_v53 = vadd.f32 1.0, %v8917_v52  ;;  %8918 = vrcp.f32 %v6906_v48 }
0x1464   : > { %8920 = vrcp.f32 %v6907_v53 }
0x146c   : > { %v8919_v61 = vpop.eup %8918 }
0x146e   : > { %v8921_v62 = vpop.eup %8920 }
0x146f   : > { %v6925_v7 = vpack.c.bf16 %v8921_v62, %v8919_v61 }
0x1471   : > { %7972 = vmatprep.subr.bf16.mxu0 %v6925_v7 }
0x1472   : > { %7973 = vmatpush3.bf16.msra.mxu0 %v6925_v7 }
0x1473   : > { %7978 = vmatprep.subr.bf16.mxu0 %v6924_v37 }
0x1475   : > { %7975 = vmatmul.mubr.msk.bf16.vlgmr.msra.gmra.mrb[60].mxu0 %vm1419_vm12, %v6923_v8 }
0x1476   : > { %7979 = vmatpush3.bf16.msra.mxu0 %v6924_v37  ;;  %7980 = vmatprep.mubr.msk.bf16.mxu0 %vm1419_vm12, %v11013_v47 }
0x1481   : > { %7981 = vmatmul.mubr.msk.bf16.vlgmr.msra.gmra.mrb[60].mxu0 %vm1419_vm12, %v6918_v9 }
0x1482   : > { %8935 = shalt.err (!%p8932_p3)
}
0x1483   : > { %s8936_s3 = scalar_lea.hbm %s11236_s6, 16  ;;  %s8940_s27 = scalar_lea.hbm %s11302_s20, 32 }
0x1484   : > { %p8937_p4 = scmp.ne.s32.totalorder %s11236_s6, %s8936_s3  ;;  %p8941_p9 = scmp.lt.u32.totalorder %s11236_s6, %s11302_s20 }
0x1485   : > { %p8942_p10 = scmp.lt.u32.totalorder %s8940_s27, %s8936_s3  ;;  %p8944_p12 = scmp.lt.u32.totalorder %s8936_s3, %s11236_s6 }
0x1486   : > { %p8938_p7 = pnand %p8937_p4, %p9141_p5 }
0x1487   : > { %p8943_p11 = por %p8942_p10, %p8941_p9 }
0x1488   : > { %p8939_p8 = pneg %p8938_p7 }
0x1489   : > { %p8945_p13 = por %p8944_p12, %p8943_p11 }
0x148b   : > { %p8946_p0 = pnand %p8945_p13, %p8939_p8 }
0x148d   : > { %8949 = shalt.err (!%p8946_p0)
}
0x148e   : > { %8048 = dma.vmem_to_hbm [thread:$0]  (%p9141_p5), %s7057_s30, 16, %s11236_s6, %s7039_s0  }
0x148f   : > { %s7753_s26 = sshll.u32 %s9156_s23, 5  ;;  %s11343_s4 = sld [smem:[#allocation18_spill]] }
0x1495   : > { %s666_s21 = scalar_lea.vmem %s11343_s4, %s7753_s26 }
0x1554   : > { %v7982_v1 = vpop.f32.mrb[60].mxu0 }
0x1555   : > { %7036 = vst.msk [vmem:[%s666_s21 + $0x10] sm:$0xff] %vm967_vm10, %v7982_v1  ;;  %v7019_v28 = vpop.f32.mrb[61].mxu0 }
0x1556   : > { %7034 = vst.msk [vmem:[%s666_s21] sm:$0xff] %vm967_vm10, %v7019_v28  ;;  %v7983_v47 = vpop.f32.mrb[62].mxu0 }
0x1557   : > { %7037 = vst.msk [vmem:[%s666_s21 + $0x18] sm:$0xff] %vm967_vm10, %v7983_v47  ;;  %v7022_v10 = vpop.f32.mrb[63].mxu0 }
0x1558   : > { %7035 = vst.msk [vmem:[%s666_s21 + $0x8] sm:$0xff] %vm967_vm10, %v7022_v10 }
0x1559 PF: > { %s11344_s5 = sld [smem:[#allocation7_spill]]  ;;  %s11345_s30 = sld [smem:[#allocation5_spill]] }
0x155f   : > { %p8054_p5 = scmp.ge.s32.totalorder %s11344_s5, 2  ;;  %s7071_s6 = sand.u32 1, %s11345_s30  }
0x1560   : > { %s7072_s0 = scalar_lea.sflag [#allocation3], %s7071_s6 }
0x1561   : > { %p8051_p1 = pnand %p8054_p5, %p9145_p6 }
0x1563   : > { %8967 = dma.done.wait (!%p8051_p1), %s7072_s0, 16  }
0x1564   : > { %8969 = vsyncadd (!%p8051_p1), %s7072_s0, 4294967280  ;;  %s11347_s27 = sld [smem:[#allocation8_spill]]  ;;  %s11348_s3 = sld [smem:[#allocation6_spill]] }
0x1565   : > { %s11349_s26 = sld [smem:[#allocation9_spill]]  ;;  %s11350_s2 = smov %s8976_s25 }
0x156a   : > { %p32_p2 = scmp.ge.s32.totalorder %s11347_s27, 4   ;;  %s11351_s25 = smov %s11348_s3 }
0x156c   :  { %34 = sbr.rel (!%p32_p2) target bundleno = 12 (0xc), region = 147 }
0x1573   :  { %7084 = vsyncpa [#allocation3], 1 }
0x1574   :  { %7086 = vsyncpa [#allocation3 + $0x1], 1 }

</bundles_post_ra>
